<compile_context>
chip_gen: v6e
topology: v6e:2x2x1
jax: 0.10.0
libtpu: 0.0.40
codegen_flags: <defaults>
</compile_context>

<pallas_src>
import jax
import jax.numpy as jnp
from jax import lax
from jax.experimental import pallas as pl
from jax.experimental.pallas import tpu as pltpu

EPS = 1e-5  # PyTorch BatchNorm2d default eps


# ------------------------------ fused kernel --------------------------------

def _pseudo_branch_kernel(x_ref,
                          w1a_ref, b1a_ref, wda_ref, b2a_ref, w3a_ref, b3a_ref,
                          w1b_ref, b1b_ref, wdb_ref, b2b_ref, w3b_ref, b3b_ref,
                          wseg_ref, bseg_ref,
                          o_ref):
    f32, bf16 = jnp.float32, jnp.bfloat16

    # ---- AdaptiveMaxPool3d((1, 4, 4)): max over the K pooled slabs ----------
    pooled = jnp.max(x_ref[0], axis=0)                      # (16, C_in) bf16

    def linear(x2d, w_ref, b_ref):
        # 1x1 conv with BN folded into w, f32 bias epilogue, ReLU.
        y = jnp.dot(x2d, w_ref[...], preferred_element_type=f32) + b_ref[...]
        return jnp.maximum(y, 0.0).astype(bf16)

    def deconv_s2(a, wd_ref, b_ref):
        # ConvTranspose2d(k=3, stride=2, padding=1, output_padding=1) + folded
        # BN + ReLU via the 4-phase subpixel decomposition.  a: (H, W, Cin).
        H, W, C = a.shape
        Co = wd_ref.shape[-1]
        HW = H * W
        A = a.reshape(HW, C)

        def mm(kh, kw):                                     # (HW, Co) f32
            return jnp.dot(A, wd_ref[kh, kw], preferred_element_type=f32)

        p = lax.broadcasted_iota(jnp.int32, (HW, 1), 0)
        ok_x = (p % W) < (W - 1)                            # right neighbour exists
        ok_y = p < (H - 1) * W                              # lower neighbour exists

        # Shifting the f32 products is equivalent to shifting the inputs
        # (row-permutation commutes with right-multiplication).
        def sx(m):   # m[p] <- m[p + 1]  (next pixel in the row), else 0
            return jnp.where(ok_x, pltpu.roll(m, HW - 1, axis=0), 0.0)

        def sy(m):   # m[p] <- m[p + W]  (pixel one row down), else 0
            return jnp.where(ok_y, pltpu.roll(m, HW - W, axis=0), 0.0)

        def sxy(m):  # m[p] <- m[p + W + 1], else 0
            return jnp.where(ok_x & ok_y, pltpu.roll(m, HW - W - 1, axis=0), 0.0)

        bias = b_ref[...]
        ee = mm(1, 1) + bias                                # out[2y,   2x]
        eo = mm(1, 2) + sx(mm(1, 0)) + bias                 # out[2y,   2x+1]
        oe = mm(2, 1) + sy(mm(0, 1)) + bias                 # out[2y+1, 2x]
        oo = (mm(2, 2) + sx(mm(2, 0)) + sy(mm(0, 2))        # out[2y+1, 2x+1]
              + sxy(mm(0, 0)) + bias)

        ee, eo, oe, oo = [jnp.maximum(t, 0.0).astype(bf16).reshape(H, W, Co)
                          for t in (ee, eo, oe, oo)]
        # interleave the four phases back into the (2H, 2W) grid
        row_e = jnp.stack([ee, eo], axis=2).reshape(H, 2 * W, Co)
        row_o = jnp.stack([oe, oo], axis=2).reshape(H, 2 * W, Co)
        return jnp.stack([row_e, row_o], axis=1).reshape(2 * H, 2 * W, Co)

    def decoder(a, w1_ref, b1_ref, wd_ref, b2_ref, w3_ref, b3_ref):
        H, W, Cin = a.shape
        mid = w1_ref.shape[-1]
        h = linear(a.reshape(H * W, Cin), w1_ref, b1_ref).reshape(H, W, mid)
        h = deconv_s2(h, wd_ref, b2_ref)
        OH, OW, _ = h.shape
        y = linear(h.reshape(OH * OW, mid), w3_ref, b3_ref)
        return y.reshape(OH, OW, w3_ref.shape[-1])

    Cin = pooled.shape[-1]
    a = decoder(pooled.reshape(4, 4, Cin),
                w1a_ref, b1a_ref, wda_ref, b2a_ref, w3a_ref, b3a_ref)   # (8, 8, 256)
    a = decoder(a, w1b_ref, b1b_ref, wdb_ref, b2b_ref, w3b_ref, b3b_ref)  # (16,16,128)

    # TODO(synk): Dropout2d(p=0.1) is stochastic; identity here (eval mode).
    OH, OW, C = a.shape
    seg = (jnp.sum(a.reshape(OH * OW, C).astype(f32) * wseg_ref[...],
                   axis=-1, keepdims=True) + bseg_ref[...])             # (OH*OW, 1)
    o_ref[0] = seg.reshape(OH, OW, 1)


# --------------------------- parameter preparation ---------------------------

def _fold_bn(conv_bias, bn):
    s = bn['gamma'] / jnp.sqrt(bn['var'] + EPS)
    b = (conv_bias - bn['mean']) * s + bn['beta']
    return s, b


def _prep_decoder(p, pad_mid_to=128):
    """Fold BN scales into the conv weights, zero-pad mid channels to a
    lane-dense 128, and reorder the deconv weight to (kh, kw, Cin, Cout)."""
    s1, b1 = _fold_bn(p['b1'], p['bn1'])
    w1 = p['w1'] * s1[None, :]                      # (Cin, mid)
    s2, b2 = _fold_bn(p['bd'], p['bn2'])
    wd = p['wd'] * s2[None, :, None, None]          # (mid, mid, 3, 3) PyTorch layout
    s3, b3 = _fold_bn(p['b3'], p['bn3'])
    w3 = p['w3'] * s3[None, :]                      # (mid, Cout)

    mid = w1.shape[1]
    if mid < pad_mid_to:
        pad = pad_mid_to - mid                      # padded channels stay exactly 0
        w1 = jnp.pad(w1, ((0, 0), (0, pad)))
        b1 = jnp.pad(b1, (0, pad))
        wd = jnp.pad(wd, ((0, pad), (0, pad), (0, 0), (0, 0)))
        b2 = jnp.pad(b2, (0, pad))
        w3 = jnp.pad(w3, ((0, pad), (0, 0)))

    wd = wd.transpose(2, 3, 0, 1)                   # (kh, kw, Cin, Cout)
    return (w1.astype(jnp.bfloat16), b1[None, :].astype(jnp.float32),
            wd.astype(jnp.bfloat16), b2[None, :].astype(jnp.float32),
            w3.astype(jnp.bfloat16), b3[None, :].astype(jnp.float32))


# --------------------------------- forward -----------------------------------

def pseudo_branch_forward(x_ncdhw, params):
    N, C, D, H, W = x_ncdhw.shape
    assert H % 4 == 0 and W % 4 == 0, "AdaptiveMaxPool3d((1,4,4)) path needs H, W % 4 == 0"
    bh, bw = H // 4, W // 4
    K = D * bh * bw

    # Channels-last pooling-slab layout (one fused XLA copy).  The pooled
    # tensor and every later activation never touch HBM: the max-reduction and
    # the whole decoder run inside the single fused kernel below.
    x = (x_ncdhw.astype(jnp.bfloat16)
         .transpose(0, 2, 3, 4, 1)                  # (N, D, H, W, C)
         .reshape(N, D, 4, bh, 4, bw, C)
         .transpose(0, 1, 3, 5, 2, 4, 6)            # (N, D, bh, bw, 4, 4, C)
         .reshape(N, K, 16, C))

    blk1 = _prep_decoder(params['deconv1'])         # mid = 128
    blk2 = _prep_decoder(params['deconv2'])         # mid = 64 -> padded to 128
    wseg = params['w_seg'].reshape(1, -1).astype(jnp.float32)   # (1, 128)
    bseg = params['b_seg'].reshape(1, 1).astype(jnp.float32)

    args = (x,) + blk1 + blk2 + (wseg, bseg)

    def _replicated(a):
        nd = a.ndim
        return pl.BlockSpec(a.shape, lambda n, _nd=nd: (0,) * _nd)

    in_specs = ([pl.BlockSpec((1, K, 16, C), lambda n: (n, 0, 0, 0))]
                + [_replicated(a) for a in args[1:]])

    out = pl.pallas_call(
        _pseudo_branch_kernel,
        out_shape=jax.ShapeDtypeStruct((N, 16, 16, 1), jnp.float32),
        grid=(N,),
        in_specs=in_specs,
        out_specs=pl.BlockSpec((1, 16, 16, 1), lambda n: (n, 0, 0, 0)),
        compiler_params=pltpu.CompilerParams(
            dimension_semantics=("parallel",)),
    )(*args)
    return out.transpose(0, 3, 1, 2)                # NCHW (N, 1, 16, 16)


# ------------------------------ parameters -----------------------------------

def _bn_params(key, c):
    k1, k2, k3, k4 = jax.random.split(key, 4)
    return dict(
        gamma=1.0 + 0.1 * jax.random.normal(k1, (c,), jnp.float32),
        beta=0.1 * jax.random.normal(k2, (c,), jnp.float32),
        mean=0.1 * jax.random.normal(k3, (c,), jnp.float32),
        var=jnp.abs(1.0 + 0.1 * jax.random.normal(k4, (c,), jnp.float32)),
    )


def init_decoder_block(key, in_channels, n_filters):
    mid = in_channels // 4
    ks = jax.random.split(key, 9)
    return dict(
        w1=0.05 * jax.random.normal(ks[0], (in_channels, mid), jnp.float32),
        b1=0.05 * jax.random.normal(ks[1], (mid,), jnp.float32),
        bn1=_bn_params(ks[2], mid),
        wd=0.05 * jax.random.normal(ks[3], (mid, mid, 3, 3), jnp.float32),
        bd=0.05 * jax.random.normal(ks[4], (mid,), jnp.float32),
        bn2=_bn_params(ks[5], mid),
        w3=0.05 * jax.random.normal(ks[6], (mid, n_filters), jnp.float32),
        b3=0.05 * jax.random.normal(ks[7], (n_filters,), jnp.float32),
        bn3=_bn_params(ks[8], n_filters),
    )


# ---------------------------------- main --------------------------------------

if __name__ == "__main__":
    key = jax.random.PRNGKey(0)
    k_in, k1, k2, k3, k4 = jax.random.split(key, 5)
    params = dict(
        deconv1=init_decoder_block(k1, 512, 256),
        deconv2=init_decoder_block(k2, 256, 128),
        w_seg=0.05 * jax.random.normal(k3, (128, 1), jnp.float32),
        b_seg=0.05 * jax.random.normal(k4, (1,), jnp.float32),
    )
    # PyTorch-style 5-D input (N, C=512, D, H, W); H, W divisible by 4.
    x = jax.random.normal(k_in, (2, 512, 2, 8, 8), jnp.float32)

    fwd = jax.jit(lambda inp: pseudo_branch_forward(inp, params))
    out = fwd(x)
    jax.block_until_ready(out)
    assert out.shape == (2, 1, 16, 16), out.shape
    assert bool(jnp.all(jnp.isfinite(out)))
    print("KERNEL_OK")
</pallas_src>

<mosaic_0001>
module attributes {stable_mosaic.version = 11 : i64} {
  func.func @_pseudo_branch_kernel(%arg0: i32, %arg1: memref<1x8x16x512xbf16, #tpu.memory_space<vmem>>, %arg2: memref<512x128xbf16, #tpu.memory_space<vmem>>, %arg3: memref<1x128xf32, #tpu.memory_space<vmem>>, %arg4: memref<3x3x128x128xbf16, #tpu.memory_space<vmem>>, %arg5: memref<1x128xf32, #tpu.memory_space<vmem>>, %arg6: memref<128x256xbf16, #tpu.memory_space<vmem>>, %arg7: memref<1x256xf32, #tpu.memory_space<vmem>>, %arg8: memref<256x128xbf16, #tpu.memory_space<vmem>>, %arg9: memref<1x128xf32, #tpu.memory_space<vmem>>, %arg10: memref<3x3x128x128xbf16, #tpu.memory_space<vmem>>, %arg11: memref<1x128xf32, #tpu.memory_space<vmem>>, %arg12: memref<128x128xbf16, #tpu.memory_space<vmem>>, %arg13: memref<1x128xf32, #tpu.memory_space<vmem>>, %arg14: memref<1x128xf32, #tpu.memory_space<vmem>>, %arg15: memref<1x1xf32, #tpu.memory_space<vmem>>, %arg16: memref<1x16x16x1xf32, #tpu.memory_space<vmem>>) attributes {dimension_semantics = [#tpu.dimension_semantics<parallel>], iteration_bounds = array<i64: 2>, scalar_prefetch = 0 : i64, scratch_operands = 0 : i64, tpu.core_type = #tpu.core_type<tc>, window_params = [{transform_indices = @transform_0, window_bounds = array<i64: 1, 8, 16, 512>}, {pipeline_mode = #tpu.pipeline_mode<synchronous>, transform_indices = @transform_1, window_bounds = array<i64: 512, 128>}, {pipeline_mode = #tpu.pipeline_mode<synchronous>, transform_indices = @transform_2, window_bounds = array<i64: 1, 128>}, {pipeline_mode = #tpu.pipeline_mode<synchronous>, transform_indices = @transform_3, window_bounds = array<i64: 3, 3, 128, 128>}, {pipeline_mode = #tpu.pipeline_mode<synchronous>, transform_indices = @transform_4, window_bounds = array<i64: 1, 128>}, {pipeline_mode = #tpu.pipeline_mode<synchronous>, transform_indices = @transform_5, window_bounds = array<i64: 128, 256>}, {pipeline_mode = #tpu.pipeline_mode<synchronous>, transform_indices = @transform_6, window_bounds = array<i64: 1, 256>}, {pipeline_mode = #tpu.pipeline_mode<synchronous>, transform_indices = @transform_7, window_bounds = array<i64: 256, 128>}, {pipeline_mode = #tpu.pipeline_mode<synchronous>, transform_indices = @transform_8, window_bounds = array<i64: 1, 128>}, {pipeline_mode = #tpu.pipeline_mode<synchronous>, transform_indices = @transform_9, window_bounds = array<i64: 3, 3, 128, 128>}, {pipeline_mode = #tpu.pipeline_mode<synchronous>, transform_indices = @transform_10, window_bounds = array<i64: 1, 128>}, {pipeline_mode = #tpu.pipeline_mode<synchronous>, transform_indices = @transform_11, window_bounds = array<i64: 128, 128>}, {pipeline_mode = #tpu.pipeline_mode<synchronous>, transform_indices = @transform_12, window_bounds = array<i64: 1, 128>}, {pipeline_mode = #tpu.pipeline_mode<synchronous>, transform_indices = @transform_13, window_bounds = array<i64: 1, 128>}, {pipeline_mode = #tpu.pipeline_mode<synchronous>, transform_indices = @transform_14, window_bounds = array<i64: 1, 1>}, {transform_indices = @transform_15, window_bounds = array<i64: 1, 16, 16, 1>}]} {
    %c0 = arith.constant 0 : index
    %c0_0 = arith.constant 0 : index
    %c0_1 = arith.constant 0 : index
    %c0_2 = arith.constant 0 : index
    %0 = vector.load %arg1[%c0, %c0_0, %c0_1, %c0_2] : memref<1x8x16x512xbf16, #tpu.memory_space<vmem>>, vector<1x8x16x512xbf16>
    %1 = vector.shape_cast %0 : vector<1x8x16x512xbf16> to vector<8x16x512xbf16>
    %cst = arith.constant dense<0xFF80> : vector<16x512xbf16>
    %2 = vector.multi_reduction <maximumf>, %1, %cst [0] : vector<8x16x512xbf16> to vector<16x512xbf16>
    %3 = vector.shape_cast %2 : vector<16x512xbf16> to vector<4x4x512xbf16>
    %4 = vector.shape_cast %3 : vector<4x4x512xbf16> to vector<16x512xbf16>
    %c0_3 = arith.constant 0 : index
    %c0_4 = arith.constant 0 : index
    %5 = vector.load %arg2[%c0_3, %c0_4] : memref<512x128xbf16, #tpu.memory_space<vmem>>, vector<512x128xbf16>
    %cst_5 = arith.constant dense<0.000000e+00> : vector<16x128xf32>
    %6 = tpu.matmul %4, %5, %cst_5 {dimension_numbers = #tpu.dot_dimension_numbers<[1], [0], [0], [1], [0, 0, 1, 1], [], []>} : vector<16x512xbf16>, vector<512x128xbf16>, vector<16x128xf32> -> vector<16x128xf32>
    %c0_6 = arith.constant 0 : index
    %c0_7 = arith.constant 0 : index
    %7 = vector.load %arg3[%c0_6, %c0_7] : memref<1x128xf32, #tpu.memory_space<vmem>>, vector<1x128xf32>
    %8 = vector.broadcast %7 : vector<1x128xf32> to vector<16x128xf32>
    %9 = arith.addf %6, %8 : vector<16x128xf32>
    %cst_8 = arith.constant 0.000000e+00 : f32
    %10 = vector.broadcast %cst_8 : f32 to vector<16x128xf32>
    %11 = arith.maximumf %9, %10 : vector<16x128xf32>
    %12 = arith.truncf %11 : vector<16x128xf32> to vector<16x128xbf16>
    %13 = vector.shape_cast %12 : vector<16x128xbf16> to vector<4x4x128xbf16>
    %14 = vector.shape_cast %13 : vector<4x4x128xbf16> to vector<16x128xbf16>
    %15 = tpu.iota {dimensions = array<i32: 0>} : vector<16x1xi32>
    %c4_i32 = arith.constant 4 : i32
    %c0_i32 = arith.constant 0 : i32
    %16 = arith.cmpi eq, %c4_i32, %c0_i32 : i32
    %c1_i32 = arith.constant 1 : i32
    %17 = arith.select %16, %c1_i32, %c4_i32 : i32
    %18 = vector.broadcast %17 : i32 to vector<16x1xi32>
    %19 = arith.remsi %15, %18 : vector<16x1xi32>
    %c0_i32_9 = arith.constant 0 : i32
    %20 = vector.broadcast %c0_i32_9 : i32 to vector<16x1xi32>
    %21 = arith.cmpi ne, %19, %20 : vector<16x1xi32>
    %c0_i32_10 = arith.constant 0 : i32
    %22 = vector.broadcast %c0_i32_10 : i32 to vector<16x1xi32>
    %23 = arith.cmpi slt, %19, %22 : vector<16x1xi32>
    %c0_i32_11 = arith.constant 0 : i32
    %24 = arith.cmpi slt, %17, %c0_i32_11 : i32
    %25 = vector.broadcast %24 : i1 to vector<16x1xi1>
    %26 = vector.broadcast %25 : vector<16x1xi1> to vector<16x1xi1>
    %27 = arith.xori %23, %26 : vector<16x1xi1>
    %28 = arith.andi %27, %21 : vector<16x1xi1>
    %29 = vector.broadcast %17 : i32 to vector<16x1xi32>
    %30 = arith.addi %19, %29 : vector<16x1xi32>
    %31 = arith.select %28, %30, %19 : vector<16x1xi1>, vector<16x1xi32>
    %c3_i32 = arith.constant 3 : i32
    %32 = vector.broadcast %c3_i32 : i32 to vector<16x1xi32>
    %33 = arith.cmpi slt, %31, %32 : vector<16x1xi32>
    %c12_i32 = arith.constant 12 : i32
    %34 = vector.broadcast %c12_i32 : i32 to vector<16x1xi32>
    %35 = arith.cmpi slt, %15, %34 : vector<16x1xi32>
    %c0_12 = arith.constant 0 : index
    %c0_13 = arith.constant 0 : index
    %36 = vector.load %arg5[%c0_12, %c0_13] : memref<1x128xf32, #tpu.memory_space<vmem>>, vector<1x128xf32>
    %c1 = arith.constant 1 : index
    %c1_14 = arith.constant 1 : index
    %c0_15 = arith.constant 0 : index
    %c0_16 = arith.constant 0 : index
    %37 = vector.load %arg4[%c1, %c1_14, %c0_15, %c0_16] : memref<3x3x128x128xbf16, #tpu.memory_space<vmem>>, vector<1x1x128x128xbf16>
    %38 = vector.shape_cast %37 : vector<1x1x128x128xbf16> to vector<128x128xbf16>
    %cst_17 = arith.constant dense<0.000000e+00> : vector<16x128xf32>
    %39 = tpu.matmul %14, %38, %cst_17 {dimension_numbers = #tpu.dot_dimension_numbers<[1], [0], [0], [1], [0, 0, 1, 1], [], []>} : vector<16x128xbf16>, vector<128x128xbf16>, vector<16x128xf32> -> vector<16x128xf32>
    %40 = vector.broadcast %36 : vector<1x128xf32> to vector<16x128xf32>
    %41 = arith.addf %39, %40 : vector<16x128xf32>
    %c1_18 = arith.constant 1 : index
    %c2 = arith.constant 2 : index
    %c0_19 = arith.constant 0 : index
    %c0_20 = arith.constant 0 : index
    %42 = vector.load %arg4[%c1_18, %c2, %c0_19, %c0_20] : memref<3x3x128x128xbf16, #tpu.memory_space<vmem>>, vector<1x1x128x128xbf16>
    %43 = vector.shape_cast %42 : vector<1x1x128x128xbf16> to vector<128x128xbf16>
    %cst_21 = arith.constant dense<0.000000e+00> : vector<16x128xf32>
    %44 = tpu.matmul %14, %43, %cst_21 {dimension_numbers = #tpu.dot_dimension_numbers<[1], [0], [0], [1], [0, 0, 1, 1], [], []>} : vector<16x128xbf16>, vector<128x128xbf16>, vector<16x128xf32> -> vector<16x128xf32>
    %c1_22 = arith.constant 1 : index
    %c0_23 = arith.constant 0 : index
    %c0_24 = arith.constant 0 : index
    %c0_25 = arith.constant 0 : index
    %45 = vector.load %arg4[%c1_22, %c0_23, %c0_24, %c0_25] : memref<3x3x128x128xbf16, #tpu.memory_space<vmem>>, vector<1x1x128x128xbf16>
    %46 = vector.shape_cast %45 : vector<1x1x128x128xbf16> to vector<128x128xbf16>
    %cst_26 = arith.constant dense<0.000000e+00> : vector<16x128xf32>
    %47 = tpu.matmul %14, %46, %cst_26 {dimension_numbers = #tpu.dot_dimension_numbers<[1], [0], [0], [1], [0, 0, 1, 1], [], []>} : vector<16x128xbf16>, vector<128x128xbf16>, vector<16x128xf32> -> vector<16x128xf32>
    %c15_i32 = arith.constant 15 : i32
    %48 = tpu.dynamic_rotate %47 by %c15_i32 dim 0 : vector<16x128xf32>, i32 -> vector<16x128xf32>
    %cst_27 = arith.constant 0.000000e+00 : f32
    %49 = vector.shape_cast %33 : vector<16x1xi1> to vector<16x1xi1>
    %50 = vector.broadcast %49 : vector<16x1xi1> to vector<16x128xi1>
    %51 = vector.broadcast %cst_27 : f32 to vector<16x128xf32>
    %52 = arith.select %50, %48, %51 : vector<16x128xi1>, vector<16x128xf32>
    %53 = arith.addf %44, %52 : vector<16x128xf32>
    %54 = vector.broadcast %36 : vector<1x128xf32> to vector<16x128xf32>
    %55 = arith.addf %53, %54 : vector<16x128xf32>
    %c2_28 = arith.constant 2 : index
    %c1_29 = arith.constant 1 : index
    %c0_30 = arith.constant 0 : index
    %c0_31 = arith.constant 0 : index
    %56 = vector.load %arg4[%c2_28, %c1_29, %c0_30, %c0_31] : memref<3x3x128x128xbf16, #tpu.memory_space<vmem>>, vector<1x1x128x128xbf16>
    %57 = vector.shape_cast %56 : vector<1x1x128x128xbf16> to vector<128x128xbf16>
    %cst_32 = arith.constant dense<0.000000e+00> : vector<16x128xf32>
    %58 = tpu.matmul %14, %57, %cst_32 {dimension_numbers = #tpu.dot_dimension_numbers<[1], [0], [0], [1], [0, 0, 1, 1], [], []>} : vector<16x128xbf16>, vector<128x128xbf16>, vector<16x128xf32> -> vector<16x128xf32>
    %c0_33 = arith.constant 0 : index
    %c1_34 = arith.constant 1 : index
    %c0_35 = arith.constant 0 : index
    %c0_36 = arith.constant 0 : index
    %59 = vector.load %arg4[%c0_33, %c1_34, %c0_35, %c0_36] : memref<3x3x128x128xbf16, #tpu.memory_space<vmem>>, vector<1x1x128x128xbf16>
    %60 = vector.shape_cast %59 : vector<1x1x128x128xbf16> to vector<128x128xbf16>
    %cst_37 = arith.constant dense<0.000000e+00> : vector<16x128xf32>
    %61 = tpu.matmul %14, %60, %cst_37 {dimension_numbers = #tpu.dot_dimension_numbers<[1], [0], [0], [1], [0, 0, 1, 1], [], []>} : vector<16x128xbf16>, vector<128x128xbf16>, vector<16x128xf32> -> vector<16x128xf32>
    %c12_i32_38 = arith.constant 12 : i32
    %62 = tpu.dynamic_rotate %61 by %c12_i32_38 dim 0 : vector<16x128xf32>, i32 -> vector<16x128xf32>
    %cst_39 = arith.constant 0.000000e+00 : f32
    %63 = vector.shape_cast %35 : vector<16x1xi1> to vector<16x1xi1>
    %64 = vector.broadcast %63 : vector<16x1xi1> to vector<16x128xi1>
    %65 = vector.broadcast %cst_39 : f32 to vector<16x128xf32>
    %66 = arith.select %64, %62, %65 : vector<16x128xi1>, vector<16x128xf32>
    %67 = arith.addf %58, %66 : vector<16x128xf32>
    %68 = vector.broadcast %36 : vector<1x128xf32> to vector<16x128xf32>
    %69 = arith.addf %67, %68 : vector<16x128xf32>
    %c2_40 = arith.constant 2 : index
    %c2_41 = arith.constant 2 : index
    %c0_42 = arith.constant 0 : index
    %c0_43 = arith.constant 0 : index
    %70 = vector.load %arg4[%c2_40, %c2_41, %c0_42, %c0_43] : memref<3x3x128x128xbf16, #tpu.memory_space<vmem>>, vector<1x1x128x128xbf16>
    %71 = vector.shape_cast %70 : vector<1x1x128x128xbf16> to vector<128x128xbf16>
    %cst_44 = arith.constant dense<0.000000e+00> : vector<16x128xf32>
    %72 = tpu.matmul %14, %71, %cst_44 {dimension_numbers = #tpu.dot_dimension_numbers<[1], [0], [0], [1], [0, 0, 1, 1], [], []>} : vector<16x128xbf16>, vector<128x128xbf16>, vector<16x128xf32> -> vector<16x128xf32>
    %c2_45 = arith.constant 2 : index
    %c0_46 = arith.constant 0 : index
    %c0_47 = arith.constant 0 : index
    %c0_48 = arith.constant 0 : index
    %73 = vector.load %arg4[%c2_45, %c0_46, %c0_47, %c0_48] : memref<3x3x128x128xbf16, #tpu.memory_space<vmem>>, vector<1x1x128x128xbf16>
    %74 = vector.shape_cast %73 : vector<1x1x128x128xbf16> to vector<128x128xbf16>
    %cst_49 = arith.constant dense<0.000000e+00> : vector<16x128xf32>
    %75 = tpu.matmul %14, %74, %cst_49 {dimension_numbers = #tpu.dot_dimension_numbers<[1], [0], [0], [1], [0, 0, 1, 1], [], []>} : vector<16x128xbf16>, vector<128x128xbf16>, vector<16x128xf32> -> vector<16x128xf32>
    %c15_i32_50 = arith.constant 15 : i32
    %76 = tpu.dynamic_rotate %75 by %c15_i32_50 dim 0 : vector<16x128xf32>, i32 -> vector<16x128xf32>
    %cst_51 = arith.constant 0.000000e+00 : f32
    %77 = vector.shape_cast %33 : vector<16x1xi1> to vector<16x1xi1>
    %78 = vector.broadcast %77 : vector<16x1xi1> to vector<16x128xi1>
    %79 = vector.broadcast %cst_51 : f32 to vector<16x128xf32>
    %80 = arith.select %78, %76, %79 : vector<16x128xi1>, vector<16x128xf32>
    %81 = arith.addf %72, %80 : vector<16x128xf32>
    %c0_52 = arith.constant 0 : index
    %c2_53 = arith.constant 2 : index
    %c0_54 = arith.constant 0 : index
    %c0_55 = arith.constant 0 : index
    %82 = vector.load %arg4[%c0_52, %c2_53, %c0_54, %c0_55] : memref<3x3x128x128xbf16, #tpu.memory_space<vmem>>, vector<1x1x128x128xbf16>
    %83 = vector.shape_cast %82 : vector<1x1x128x128xbf16> to vector<128x128xbf16>
    %cst_56 = arith.constant dense<0.000000e+00> : vector<16x128xf32>
    %84 = tpu.matmul %14, %83, %cst_56 {dimension_numbers = #tpu.dot_dimension_numbers<[1], [0], [0], [1], [0, 0, 1, 1], [], []>} : vector<16x128xbf16>, vector<128x128xbf16>, vector<16x128xf32> -> vector<16x128xf32>
    %c12_i32_57 = arith.constant 12 : i32
    %85 = tpu.dynamic_rotate %84 by %c12_i32_57 dim 0 : vector<16x128xf32>, i32 -> vector<16x128xf32>
    %cst_58 = arith.constant 0.000000e+00 : f32
    %86 = vector.shape_cast %35 : vector<16x1xi1> to vector<16x1xi1>
    %87 = vector.broadcast %86 : vector<16x1xi1> to vector<16x128xi1>
    %88 = vector.broadcast %cst_58 : f32 to vector<16x128xf32>
    %89 = arith.select %87, %85, %88 : vector<16x128xi1>, vector<16x128xf32>
    %90 = arith.addf %81, %89 : vector<16x128xf32>
    %c0_59 = arith.constant 0 : index
    %c0_60 = arith.constant 0 : index
    %c0_61 = arith.constant 0 : index
    %c0_62 = arith.constant 0 : index
    %91 = vector.load %arg4[%c0_59, %c0_60, %c0_61, %c0_62] : memref<3x3x128x128xbf16, #tpu.memory_space<vmem>>, vector<1x1x128x128xbf16>
    %92 = vector.shape_cast %91 : vector<1x1x128x128xbf16> to vector<128x128xbf16>
    %cst_63 = arith.constant dense<0.000000e+00> : vector<16x128xf32>
    %93 = tpu.matmul %14, %92, %cst_63 {dimension_numbers = #tpu.dot_dimension_numbers<[1], [0], [0], [1], [0, 0, 1, 1], [], []>} : vector<16x128xbf16>, vector<128x128xbf16>, vector<16x128xf32> -> vector<16x128xf32>
    %94 = arith.andi %33, %35 : vector<16x1xi1>
    %c11_i32 = arith.constant 11 : i32
    %95 = tpu.dynamic_rotate %93 by %c11_i32 dim 0 : vector<16x128xf32>, i32 -> vector<16x128xf32>
    %cst_64 = arith.constant 0.000000e+00 : f32
    %96 = vector.shape_cast %94 : vector<16x1xi1> to vector<16x1xi1>
    %97 = vector.broadcast %96 : vector<16x1xi1> to vector<16x128xi1>
    %98 = vector.broadcast %cst_64 : f32 to vector<16x128xf32>
    %99 = arith.select %97, %95, %98 : vector<16x128xi1>, vector<16x128xf32>
    %100 = arith.addf %90, %99 : vector<16x128xf32>
    %101 = vector.broadcast %36 : vector<1x128xf32> to vector<16x128xf32>
    %102 = arith.addf %100, %101 : vector<16x128xf32>
    %cst_65 = arith.constant 0.000000e+00 : f32
    %103 = vector.broadcast %cst_65 : f32 to vector<16x128xf32>
    %104 = arith.maximumf %41, %103 : vector<16x128xf32>
    %105 = arith.truncf %104 : vector<16x128xf32> to vector<16x128xbf16>
    %106 = vector.shape_cast %105 : vector<16x128xbf16> to vector<4x4x128xbf16>
    %cst_66 = arith.constant 0.000000e+00 : f32
    %107 = vector.broadcast %cst_66 : f32 to vector<16x128xf32>
    %108 = arith.maximumf %55, %107 : vector<16x128xf32>
    %109 = arith.truncf %108 : vector<16x128xf32> to vector<16x128xbf16>
    %110 = vector.shape_cast %109 : vector<16x128xbf16> to vector<4x4x128xbf16>
    %cst_67 = arith.constant 0.000000e+00 : f32
    %111 = vector.broadcast %cst_67 : f32 to vector<16x128xf32>
    %112 = arith.maximumf %69, %111 : vector<16x128xf32>
    %113 = arith.truncf %112 : vector<16x128xf32> to vector<16x128xbf16>
    %114 = vector.shape_cast %113 : vector<16x128xbf16> to vector<4x4x128xbf16>
    %cst_68 = arith.constant 0.000000e+00 : f32
    %115 = vector.broadcast %cst_68 : f32 to vector<16x128xf32>
    %116 = arith.maximumf %102, %115 : vector<16x128xf32>
    %117 = arith.truncf %116 : vector<16x128xf32> to vector<16x128xbf16>
    %118 = vector.shape_cast %117 : vector<16x128xbf16> to vector<4x4x128xbf16>
    %119 = vector.shape_cast %106 : vector<4x4x128xbf16> to vector<4x4x1x128xbf16>
    %120 = vector.shape_cast %110 : vector<4x4x128xbf16> to vector<4x4x1x128xbf16>
    %121 = tpu.concatenate %119, %120 in 2 : vector<4x4x1x128xbf16>, vector<4x4x1x128xbf16> -> vector<4x4x2x128xbf16>
    %122 = vector.shape_cast %121 : vector<4x4x2x128xbf16> to vector<4x8x128xbf16>
    %123 = vector.shape_cast %114 : vector<4x4x128xbf16> to vector<4x4x1x128xbf16>
    %124 = vector.shape_cast %118 : vector<4x4x128xbf16> to vector<4x4x1x128xbf16>
    %125 = tpu.concatenate %123, %124 in 2 : vector<4x4x1x128xbf16>, vector<4x4x1x128xbf16> -> vector<4x4x2x128xbf16>
    %126 = vector.shape_cast %125 : vector<4x4x2x128xbf16> to vector<4x8x128xbf16>
    %127 = vector.shape_cast %122 : vector<4x8x128xbf16> to vector<4x1x8x128xbf16>
    %128 = vector.shape_cast %126 : vector<4x8x128xbf16> to vector<4x1x8x128xbf16>
    %129 = tpu.concatenate %127, %128 in 1 : vector<4x1x8x128xbf16>, vector<4x1x8x128xbf16> -> vector<4x2x8x128xbf16>
    %130 = vector.shape_cast %129 : vector<4x2x8x128xbf16> to vector<8x8x128xbf16>
    %131 = vector.shape_cast %130 : vector<8x8x128xbf16> to vector<64x128xbf16>
    %c0_69 = arith.constant 0 : index
    %c0_70 = arith.constant 0 : index
    %132 = vector.load %arg6[%c0_69, %c0_70] : memref<128x256xbf16, #tpu.memory_space<vmem>>, vector<128x256xbf16>
    %cst_71 = arith.constant dense<0.000000e+00> : vector<64x256xf32>
    %133 = tpu.matmul %131, %132, %cst_71 {dimension_numbers = #tpu.dot_dimension_numbers<[1], [0], [0], [1], [0, 0, 1, 1], [], []>} : vector<64x128xbf16>, vector<128x256xbf16>, vector<64x256xf32> -> vector<64x256xf32>
    %c0_72 = arith.constant 0 : index
    %c0_73 = arith.constant 0 : index
    %134 = vector.load %arg7[%c0_72, %c0_73] : memref<1x256xf32, #tpu.memory_space<vmem>>, vector<1x256xf32>
    %135 = vector.broadcast %134 : vector<1x256xf32> to vector<64x256xf32>
    %136 = arith.addf %133, %135 : vector<64x256xf32>
    %cst_74 = arith.constant 0.000000e+00 : f32
    %137 = vector.broadcast %cst_74 : f32 to vector<64x256xf32>
    %138 = arith.maximumf %136, %137 : vector<64x256xf32>
    %139 = arith.truncf %138 : vector<64x256xf32> to vector<64x256xbf16>
    %140 = vector.shape_cast %139 : vector<64x256xbf16> to vector<8x8x256xbf16>
    %141 = vector.shape_cast %140 : vector<8x8x256xbf16> to vector<64x256xbf16>
    %c0_75 = arith.constant 0 : index
    %c0_76 = arith.constant 0 : index
    %142 = vector.load %arg8[%c0_75, %c0_76] : memref<256x128xbf16, #tpu.memory_space<vmem>>, vector<256x128xbf16>
    %cst_77 = arith.constant dense<0.000000e+00> : vector<64x128xf32>
    %143 = tpu.matmul %141, %142, %cst_77 {dimension_numbers = #tpu.dot_dimension_numbers<[1], [0], [0], [1], [0, 0, 1, 1], [], []>} : vector<64x256xbf16>, vector<256x128xbf16>, vector<64x128xf32> -> vector<64x128xf32>
    %c0_78 = arith.constant 0 : index
    %c0_79 = arith.constant 0 : index
    %144 = vector.load %arg9[%c0_78, %c0_79] : memref<1x128xf32, #tpu.memory_space<vmem>>, vector<1x128xf32>
    %145 = vector.broadcast %144 : vector<1x128xf32> to vector<64x128xf32>
    %146 = arith.addf %143, %145 : vector<64x128xf32>
    %cst_80 = arith.constant 0.000000e+00 : f32
    %147 = vector.broadcast %cst_80 : f32 to vector<64x128xf32>
    %148 = arith.maximumf %146, %147 : vector<64x128xf32>
    %149 = arith.truncf %148 : vector<64x128xf32> to vector<64x128xbf16>
    %150 = vector.shape_cast %149 : vector<64x128xbf16> to vector<8x8x128xbf16>
    %151 = vector.shape_cast %150 : vector<8x8x128xbf16> to vector<64x128xbf16>
    %152 = tpu.iota {dimensions = array<i32: 0>} : vector<64x1xi32>
    %c8_i32 = arith.constant 8 : i32
    %c0_i32_81 = arith.constant 0 : i32
    %153 = arith.cmpi eq, %c8_i32, %c0_i32_81 : i32
    %c1_i32_82 = arith.constant 1 : i32
    %154 = arith.select %153, %c1_i32_82, %c8_i32 : i32
    %155 = vector.broadcast %154 : i32 to vector<64x1xi32>
    %156 = arith.remsi %152, %155 : vector<64x1xi32>
    %c0_i32_83 = arith.constant 0 : i32
    %157 = vector.broadcast %c0_i32_83 : i32 to vector<64x1xi32>
    %158 = arith.cmpi ne, %156, %157 : vector<64x1xi32>
    %c0_i32_84 = arith.constant 0 : i32
    %159 = vector.broadcast %c0_i32_84 : i32 to vector<64x1xi32>
    %160 = arith.cmpi slt, %156, %159 : vector<64x1xi32>
    %c0_i32_85 = arith.constant 0 : i32
    %161 = arith.cmpi slt, %154, %c0_i32_85 : i32
    %162 = vector.broadcast %161 : i1 to vector<64x1xi1>
    %163 = vector.broadcast %162 : vector<64x1xi1> to vector<64x1xi1>
    %164 = arith.xori %160, %163 : vector<64x1xi1>
    %165 = arith.andi %164, %158 : vector<64x1xi1>
    %166 = vector.broadcast %154 : i32 to vector<64x1xi32>
    %167 = arith.addi %156, %166 : vector<64x1xi32>
    %168 = arith.select %165, %167, %156 : vector<64x1xi1>, vector<64x1xi32>
    %c7_i32 = arith.constant 7 : i32
    %169 = vector.broadcast %c7_i32 : i32 to vector<64x1xi32>
    %170 = arith.cmpi slt, %168, %169 : vector<64x1xi32>
    %c56_i32 = arith.constant 56 : i32
    %171 = vector.broadcast %c56_i32 : i32 to vector<64x1xi32>
    %172 = arith.cmpi slt, %152, %171 : vector<64x1xi32>
    %c0_86 = arith.constant 0 : index
    %c0_87 = arith.constant 0 : index
    %173 = vector.load %arg11[%c0_86, %c0_87] : memref<1x128xf32, #tpu.memory_space<vmem>>, vector<1x128xf32>
    %c1_88 = arith.constant 1 : index
    %c1_89 = arith.constant 1 : index
    %c0_90 = arith.constant 0 : index
    %c0_91 = arith.constant 0 : index
    %174 = vector.load %arg10[%c1_88, %c1_89, %c0_90, %c0_91] : memref<3x3x128x128xbf16, #tpu.memory_space<vmem>>, vector<1x1x128x128xbf16>
    %175 = vector.shape_cast %174 : vector<1x1x128x128xbf16> to vector<128x128xbf16>
    %cst_92 = arith.constant dense<0.000000e+00> : vector<64x128xf32>
    %176 = tpu.matmul %151, %175, %cst_92 {dimension_numbers = #tpu.dot_dimension_numbers<[1], [0], [0], [1], [0, 0, 1, 1], [], []>} : vector<64x128xbf16>, vector<128x128xbf16>, vector<64x128xf32> -> vector<64x128xf32>
    %177 = vector.broadcast %173 : vector<1x128xf32> to vector<64x128xf32>
    %178 = arith.addf %176, %177 : vector<64x128xf32>
    %c1_93 = arith.constant 1 : index
    %c2_94 = arith.constant 2 : index
    %c0_95 = arith.constant 0 : index
    %c0_96 = arith.constant 0 : index
    %179 = vector.load %arg10[%c1_93, %c2_94, %c0_95, %c0_96] : memref<3x3x128x128xbf16, #tpu.memory_space<vmem>>, vector<1x1x128x128xbf16>
    %180 = vector.shape_cast %179 : vector<1x1x128x128xbf16> to vector<128x128xbf16>
    %cst_97 = arith.constant dense<0.000000e+00> : vector<64x128xf32>
    %181 = tpu.matmul %151, %180, %cst_97 {dimension_numbers = #tpu.dot_dimension_numbers<[1], [0], [0], [1], [0, 0, 1, 1], [], []>} : vector<64x128xbf16>, vector<128x128xbf16>, vector<64x128xf32> -> vector<64x128xf32>
    %c1_98 = arith.constant 1 : index
    %c0_99 = arith.constant 0 : index
    %c0_100 = arith.constant 0 : index
    %c0_101 = arith.constant 0 : index
    %182 = vector.load %arg10[%c1_98, %c0_99, %c0_100, %c0_101] : memref<3x3x128x128xbf16, #tpu.memory_space<vmem>>, vector<1x1x128x128xbf16>
    %183 = vector.shape_cast %182 : vector<1x1x128x128xbf16> to vector<128x128xbf16>
    %cst_102 = arith.constant dense<0.000000e+00> : vector<64x128xf32>
    %184 = tpu.matmul %151, %183, %cst_102 {dimension_numbers = #tpu.dot_dimension_numbers<[1], [0], [0], [1], [0, 0, 1, 1], [], []>} : vector<64x128xbf16>, vector<128x128xbf16>, vector<64x128xf32> -> vector<64x128xf32>
    %c63_i32 = arith.constant 63 : i32
    %185 = tpu.dynamic_rotate %184 by %c63_i32 dim 0 : vector<64x128xf32>, i32 -> vector<64x128xf32>
    %cst_103 = arith.constant 0.000000e+00 : f32
    %186 = vector.shape_cast %170 : vector<64x1xi1> to vector<64x1xi1>
    %187 = vector.broadcast %186 : vector<64x1xi1> to vector<64x128xi1>
    %188 = vector.broadcast %cst_103 : f32 to vector<64x128xf32>
    %189 = arith.select %187, %185, %188 : vector<64x128xi1>, vector<64x128xf32>
    %190 = arith.addf %181, %189 : vector<64x128xf32>
    %191 = vector.broadcast %173 : vector<1x128xf32> to vector<64x128xf32>
    %192 = arith.addf %190, %191 : vector<64x128xf32>
    %c2_104 = arith.constant 2 : index
    %c1_105 = arith.constant 1 : index
    %c0_106 = arith.constant 0 : index
    %c0_107 = arith.constant 0 : index
    %193 = vector.load %arg10[%c2_104, %c1_105, %c0_106, %c0_107] : memref<3x3x128x128xbf16, #tpu.memory_space<vmem>>, vector<1x1x128x128xbf16>
    %194 = vector.shape_cast %193 : vector<1x1x128x128xbf16> to vector<128x128xbf16>
    %cst_108 = arith.constant dense<0.000000e+00> : vector<64x128xf32>
    %195 = tpu.matmul %151, %194, %cst_108 {dimension_numbers = #tpu.dot_dimension_numbers<[1], [0], [0], [1], [0, 0, 1, 1], [], []>} : vector<64x128xbf16>, vector<128x128xbf16>, vector<64x128xf32> -> vector<64x128xf32>
    %c0_109 = arith.constant 0 : index
    %c1_110 = arith.constant 1 : index
    %c0_111 = arith.constant 0 : index
    %c0_112 = arith.constant 0 : index
    %196 = vector.load %arg10[%c0_109, %c1_110, %c0_111, %c0_112] : memref<3x3x128x128xbf16, #tpu.memory_space<vmem>>, vector<1x1x128x128xbf16>
    %197 = vector.shape_cast %196 : vector<1x1x128x128xbf16> to vector<128x128xbf16>
    %cst_113 = arith.constant dense<0.000000e+00> : vector<64x128xf32>
    %198 = tpu.matmul %151, %197, %cst_113 {dimension_numbers = #tpu.dot_dimension_numbers<[1], [0], [0], [1], [0, 0, 1, 1], [], []>} : vector<64x128xbf16>, vector<128x128xbf16>, vector<64x128xf32> -> vector<64x128xf32>
    %c56_i32_114 = arith.constant 56 : i32
    %199 = tpu.dynamic_rotate %198 by %c56_i32_114 dim 0 : vector<64x128xf32>, i32 -> vector<64x128xf32>
    %cst_115 = arith.constant 0.000000e+00 : f32
    %200 = vector.shape_cast %172 : vector<64x1xi1> to vector<64x1xi1>
    %201 = vector.broadcast %200 : vector<64x1xi1> to vector<64x128xi1>
    %202 = vector.broadcast %cst_115 : f32 to vector<64x128xf32>
    %203 = arith.select %201, %199, %202 : vector<64x128xi1>, vector<64x128xf32>
    %204 = arith.addf %195, %203 : vector<64x128xf32>
    %205 = vector.broadcast %173 : vector<1x128xf32> to vector<64x128xf32>
    %206 = arith.addf %204, %205 : vector<64x128xf32>
    %c2_116 = arith.constant 2 : index
    %c2_117 = arith.constant 2 : index
    %c0_118 = arith.constant 0 : index
    %c0_119 = arith.constant 0 : index
    %207 = vector.load %arg10[%c2_116, %c2_117, %c0_118, %c0_119] : memref<3x3x128x128xbf16, #tpu.memory_space<vmem>>, vector<1x1x128x128xbf16>
    %208 = vector.shape_cast %207 : vector<1x1x128x128xbf16> to vector<128x128xbf16>
    %cst_120 = arith.constant dense<0.000000e+00> : vector<64x128xf32>
    %209 = tpu.matmul %151, %208, %cst_120 {dimension_numbers = #tpu.dot_dimension_numbers<[1], [0], [0], [1], [0, 0, 1, 1], [], []>} : vector<64x128xbf16>, vector<128x128xbf16>, vector<64x128xf32> -> vector<64x128xf32>
    %c2_121 = arith.constant 2 : index
    %c0_122 = arith.constant 0 : index
    %c0_123 = arith.constant 0 : index
    %c0_124 = arith.constant 0 : index
    %210 = vector.load %arg10[%c2_121, %c0_122, %c0_123, %c0_124] : memref<3x3x128x128xbf16, #tpu.memory_space<vmem>>, vector<1x1x128x128xbf16>
    %211 = vector.shape_cast %210 : vector<1x1x128x128xbf16> to vector<128x128xbf16>
    %cst_125 = arith.constant dense<0.000000e+00> : vector<64x128xf32>
    %212 = tpu.matmul %151, %211, %cst_125 {dimension_numbers = #tpu.dot_dimension_numbers<[1], [0], [0], [1], [0, 0, 1, 1], [], []>} : vector<64x128xbf16>, vector<128x128xbf16>, vector<64x128xf32> -> vector<64x128xf32>
    %c63_i32_126 = arith.constant 63 : i32
    %213 = tpu.dynamic_rotate %212 by %c63_i32_126 dim 0 : vector<64x128xf32>, i32 -> vector<64x128xf32>
    %cst_127 = arith.constant 0.000000e+00 : f32
    %214 = vector.shape_cast %170 : vector<64x1xi1> to vector<64x1xi1>
    %215 = vector.broadcast %214 : vector<64x1xi1> to vector<64x128xi1>
    %216 = vector.broadcast %cst_127 : f32 to vector<64x128xf32>
    %217 = arith.select %215, %213, %216 : vector<64x128xi1>, vector<64x128xf32>
    %218 = arith.addf %209, %217 : vector<64x128xf32>
    %c0_128 = arith.constant 0 : index
    %c2_129 = arith.constant 2 : index
    %c0_130 = arith.constant 0 : index
    %c0_131 = arith.constant 0 : index
    %219 = vector.load %arg10[%c0_128, %c2_129, %c0_130, %c0_131] : memref<3x3x128x128xbf16, #tpu.memory_space<vmem>>, vector<1x1x128x128xbf16>
    %220 = vector.shape_cast %219 : vector<1x1x128x128xbf16> to vector<128x128xbf16>
    %cst_132 = arith.constant dense<0.000000e+00> : vector<64x128xf32>
    %221 = tpu.matmul %151, %220, %cst_132 {dimension_numbers = #tpu.dot_dimension_numbers<[1], [0], [0], [1], [0, 0, 1, 1], [], []>} : vector<64x128xbf16>, vector<128x128xbf16>, vector<64x128xf32> -> vector<64x128xf32>
    %c56_i32_133 = arith.constant 56 : i32
    %222 = tpu.dynamic_rotate %221 by %c56_i32_133 dim 0 : vector<64x128xf32>, i32 -> vector<64x128xf32>
    %cst_134 = arith.constant 0.000000e+00 : f32
    %223 = vector.shape_cast %172 : vector<64x1xi1> to vector<64x1xi1>
    %224 = vector.broadcast %223 : vector<64x1xi1> to vector<64x128xi1>
    %225 = vector.broadcast %cst_134 : f32 to vector<64x128xf32>
    %226 = arith.select %224, %222, %225 : vector<64x128xi1>, vector<64x128xf32>
    %227 = arith.addf %218, %226 : vector<64x128xf32>
    %c0_135 = arith.constant 0 : index
    %c0_136 = arith.constant 0 : index
    %c0_137 = arith.constant 0 : index
    %c0_138 = arith.constant 0 : index
    %228 = vector.load %arg10[%c0_135, %c0_136, %c0_137, %c0_138] : memref<3x3x128x128xbf16, #tpu.memory_space<vmem>>, vector<1x1x128x128xbf16>
    %229 = vector.shape_cast %228 : vector<1x1x128x128xbf16> to vector<128x128xbf16>
    %cst_139 = arith.constant dense<0.000000e+00> : vector<64x128xf32>
    %230 = tpu.matmul %151, %229, %cst_139 {dimension_numbers = #tpu.dot_dimension_numbers<[1], [0], [0], [1], [0, 0, 1, 1], [], []>} : vector<64x128xbf16>, vector<128x128xbf16>, vector<64x128xf32> -> vector<64x128xf32>
    %231 = arith.andi %170, %172 : vector<64x1xi1>
    %c55_i32 = arith.constant 55 : i32
    %232 = tpu.dynamic_rotate %230 by %c55_i32 dim 0 : vector<64x128xf32>, i32 -> vector<64x128xf32>
    %cst_140 = arith.constant 0.000000e+00 : f32
    %233 = vector.shape_cast %231 : vector<64x1xi1> to vector<64x1xi1>
    %234 = vector.broadcast %233 : vector<64x1xi1> to vector<64x128xi1>
    %235 = vector.broadcast %cst_140 : f32 to vector<64x128xf32>
    %236 = arith.select %234, %232, %235 : vector<64x128xi1>, vector<64x128xf32>
    %237 = arith.addf %227, %236 : vector<64x128xf32>
    %238 = vector.broadcast %173 : vector<1x128xf32> to vector<64x128xf32>
    %239 = arith.addf %237, %238 : vector<64x128xf32>
    %cst_141 = arith.constant 0.000000e+00 : f32
    %240 = vector.broadcast %cst_141 : f32 to vector<64x128xf32>
    %241 = arith.maximumf %178, %240 : vector<64x128xf32>
    %242 = arith.truncf %241 : vector<64x128xf32> to vector<64x128xbf16>
    %243 = vector.shape_cast %242 : vector<64x128xbf16> to vector<8x8x128xbf16>
    %cst_142 = arith.constant 0.000000e+00 : f32
    %244 = vector.broadcast %cst_142 : f32 to vector<64x128xf32>
    %245 = arith.maximumf %192, %244 : vector<64x128xf32>
    %246 = arith.truncf %245 : vector<64x128xf32> to vector<64x128xbf16>
    %247 = vector.shape_cast %246 : vector<64x128xbf16> to vector<8x8x128xbf16>
    %cst_143 = arith.constant 0.000000e+00 : f32
    %248 = vector.broadcast %cst_143 : f32 to vector<64x128xf32>
    %249 = arith.maximumf %206, %248 : vector<64x128xf32>
    %250 = arith.truncf %249 : vector<64x128xf32> to vector<64x128xbf16>
    %251 = vector.shape_cast %250 : vector<64x128xbf16> to vector<8x8x128xbf16>
    %cst_144 = arith.constant 0.000000e+00 : f32
    %252 = vector.broadcast %cst_144 : f32 to vector<64x128xf32>
    %253 = arith.maximumf %239, %252 : vector<64x128xf32>
    %254 = arith.truncf %253 : vector<64x128xf32> to vector<64x128xbf16>
    %255 = vector.shape_cast %254 : vector<64x128xbf16> to vector<8x8x128xbf16>
    %256 = vector.shape_cast %243 : vector<8x8x128xbf16> to vector<8x8x1x128xbf16>
    %257 = vector.shape_cast %247 : vector<8x8x128xbf16> to vector<8x8x1x128xbf16>
    %258 = tpu.concatenate %256, %257 in 2 : vector<8x8x1x128xbf16>, vector<8x8x1x128xbf16> -> vector<8x8x2x128xbf16>
    %259 = vector.shape_cast %258 : vector<8x8x2x128xbf16> to vector<8x16x128xbf16>
    %260 = vector.shape_cast %251 : vector<8x8x128xbf16> to vector<8x8x1x128xbf16>
    %261 = vector.shape_cast %255 : vector<8x8x128xbf16> to vector<8x8x1x128xbf16>
    %262 = tpu.concatenate %260, %261 in 2 : vector<8x8x1x128xbf16>, vector<8x8x1x128xbf16> -> vector<8x8x2x128xbf16>
    %263 = vector.shape_cast %262 : vector<8x8x2x128xbf16> to vector<8x16x128xbf16>
    %264 = vector.shape_cast %259 : vector<8x16x128xbf16> to vector<8x1x16x128xbf16>
    %265 = vector.shape_cast %263 : vector<8x16x128xbf16> to vector<8x1x16x128xbf16>
    %266 = tpu.concatenate %264, %265 in 1 : vector<8x1x16x128xbf16>, vector<8x1x16x128xbf16> -> vector<8x2x16x128xbf16>
    %267 = vector.shape_cast %266 : vector<8x2x16x128xbf16> to vector<16x16x128xbf16>
    %268 = vector.shape_cast %267 : vector<16x16x128xbf16> to vector<256x128xbf16>
    %c0_145 = arith.constant 0 : index
    %c0_146 = arith.constant 0 : index
    %269 = vector.load %arg12[%c0_145, %c0_146] : memref<128x128xbf16, #tpu.memory_space<vmem>>, vector<128x128xbf16>
    %cst_147 = arith.constant dense<0.000000e+00> : vector<256x128xf32>
    %270 = tpu.matmul %268, %269, %cst_147 {dimension_numbers = #tpu.dot_dimension_numbers<[1], [0], [0], [1], [0, 0, 1, 1], [], []>} : vector<256x128xbf16>, vector<128x128xbf16>, vector<256x128xf32> -> vector<256x128xf32>
    %c0_148 = arith.constant 0 : index
    %c0_149 = arith.constant 0 : index
    %271 = vector.load %arg13[%c0_148, %c0_149] : memref<1x128xf32, #tpu.memory_space<vmem>>, vector<1x128xf32>
    %272 = vector.broadcast %271 : vector<1x128xf32> to vector<256x128xf32>
    %273 = arith.addf %270, %272 : vector<256x128xf32>
    %cst_150 = arith.constant 0.000000e+00 : f32
    %274 = vector.broadcast %cst_150 : f32 to vector<256x128xf32>
    %275 = arith.maximumf %273, %274 : vector<256x128xf32>
    %276 = arith.truncf %275 : vector<256x128xf32> to vector<256x128xbf16>
    %277 = vector.shape_cast %276 : vector<256x128xbf16> to vector<16x16x128xbf16>
    %278 = vector.shape_cast %277 : vector<16x16x128xbf16> to vector<256x128xbf16>
    %279 = arith.extf %278 : vector<256x128xbf16> to vector<256x128xf32>
    %c0_151 = arith.constant 0 : index
    %c0_152 = arith.constant 0 : index
    %280 = vector.load %arg14[%c0_151, %c0_152] : memref<1x128xf32, #tpu.memory_space<vmem>>, vector<1x128xf32>
    %281 = vector.broadcast %280 : vector<1x128xf32> to vector<256x128xf32>
    %282 = arith.mulf %279, %281 : vector<256x128xf32>
    %cst_153 = arith.constant dense<0.000000e+00> : vector<256xf32>
    %283 = vector.multi_reduction <add>, %282, %cst_153 [1] : vector<256x128xf32> to vector<256xf32>
    %284 = vector.shape_cast %283 : vector<256xf32> to vector<256x1xf32>
    %c0_154 = arith.constant 0 : index
    %c0_155 = arith.constant 0 : index
    %285 = vector.load %arg15[%c0_154, %c0_155] : memref<1x1xf32, #tpu.memory_space<vmem>>, vector<1x1xf32>
    %286 = vector.broadcast %285 : vector<1x1xf32> to vector<256x1xf32>
    %287 = arith.addf %284, %286 : vector<256x1xf32>
    %288 = vector.shape_cast %287 : vector<256x1xf32> to vector<16x16x1xf32>
    %c0_156 = arith.constant 0 : index
    %c0_157 = arith.constant 0 : index
    %c0_158 = arith.constant 0 : index
    %c0_159 = arith.constant 0 : index
    %289 = vector.load %arg16[%c0_156, %c0_157, %c0_158, %c0_159] : memref<1x16x16x1xf32, #tpu.memory_space<vmem>>, vector<1x16x16x1xf32>
    %290 = vector.shape_cast %289 : vector<1x16x16x1xf32> to vector<16x16x1xf32>
    %291 = vector.shape_cast %288 : vector<16x16x1xf32> to vector<1x16x16x1xf32>
    tpu.vector_store %arg16[%c0_156, %c0_157, %c0_158, %c0_159], %291 {strides = array<i32>} : memref<1x16x16x1xf32, #tpu.memory_space<vmem>>, vector<1x16x16x1xf32>,
    return
  }
  func.func @transform_0(%arg0: i32) -> (i32, i32, i32, i32) {
    %c0_i32 = arith.constant 0 : i32
    %c0_i32_0 = arith.constant 0 : i32
    %c0_i32_1 = arith.constant 0 : i32
    %c0_i32_2 = arith.constant 0 : i32
    return %arg0, %c0_i32, %c0_i32_0, %c0_i32_1 : i32, i32, i32, i32
  }
  func.func @transform_1(%arg0: i32) -> (i32, i32) {
    %c0_i32 = arith.constant 0 : i32
    %c0_i32_0 = arith.constant 0 : i32
    %c0_i32_1 = arith.constant 0 : i32
    return %c0_i32, %c0_i32_0 : i32, i32
  }
  func.func @transform_2(%arg0: i32) -> (i32, i32) {
    %c0_i32 = arith.constant 0 : i32
    %c0_i32_0 = arith.constant 0 : i32
    %c0_i32_1 = arith.constant 0 : i32
    return %c0_i32, %c0_i32_0 : i32, i32
  }
  func.func @transform_3(%arg0: i32) -> (i32, i32, i32, i32) {
    %c0_i32 = arith.constant 0 : i32
    %c0_i32_0 = arith.constant 0 : i32
    %c0_i32_1 = arith.constant 0 : i32
    %c0_i32_2 = arith.constant 0 : i32
    %c0_i32_3 = arith.constant 0 : i32
    return %c0_i32, %c0_i32_0, %c0_i32_1, %c0_i32_2 : i32, i32, i32, i32
  }
  func.func @transform_4(%arg0: i32) -> (i32, i32) {
    %c0_i32 = arith.constant 0 : i32
    %c0_i32_0 = arith.constant 0 : i32
    %c0_i32_1 = arith.constant 0 : i32
    return %c0_i32, %c0_i32_0 : i32, i32
  }
  func.func @transform_5(%arg0: i32) -> (i32, i32) {
    %c0_i32 = arith.constant 0 : i32
    %c0_i32_0 = arith.constant 0 : i32
    %c0_i32_1 = arith.constant 0 : i32
    return %c0_i32, %c0_i32_0 : i32, i32
  }
  func.func @transform_6(%arg0: i32) -> (i32, i32) {
    %c0_i32 = arith.constant 0 : i32
    %c0_i32_0 = arith.constant 0 : i32
    %c0_i32_1 = arith.constant 0 : i32
    return %c0_i32, %c0_i32_0 : i32, i32
  }
  func.func @transform_7(%arg0: i32) -> (i32, i32) {
    %c0_i32 = arith.constant 0 : i32
    %c0_i32_0 = arith.constant 0 : i32
    %c0_i32_1 = arith.constant 0 : i32
    return %c0_i32, %c0_i32_0 : i32, i32
  }
  func.func @transform_8(%arg0: i32) -> (i32, i32) {
    %c0_i32 = arith.constant 0 : i32
    %c0_i32_0 = arith.constant 0 : i32
    %c0_i32_1 = arith.constant 0 : i32
    return %c0_i32, %c0_i32_0 : i32, i32
  }
  func.func @transform_9(%arg0: i32) -> (i32, i32, i32, i32) {
    %c0_i32 = arith.constant 0 : i32
    %c0_i32_0 = arith.constant 0 : i32
    %c0_i32_1 = arith.constant 0 : i32
    %c0_i32_2 = arith.constant 0 : i32
    %c0_i32_3 = arith.constant 0 : i32
    return %c0_i32, %c0_i32_0, %c0_i32_1, %c0_i32_2 : i32, i32, i32, i32
  }
  func.func @transform_10(%arg0: i32) -> (i32, i32) {
    %c0_i32 = arith.constant 0 : i32
    %c0_i32_0 = arith.constant 0 : i32
    %c0_i32_1 = arith.constant 0 : i32
    return %c0_i32, %c0_i32_0 : i32, i32
  }
  func.func @transform_11(%arg0: i32) -> (i32, i32) {
    %c0_i32 = arith.constant 0 : i32
    %c0_i32_0 = arith.constant 0 : i32
    %c0_i32_1 = arith.constant 0 : i32
    return %c0_i32, %c0_i32_0 : i32, i32
  }
  func.func @transform_12(%arg0: i32) -> (i32, i32) {
    %c0_i32 = arith.constant 0 : i32
    %c0_i32_0 = arith.constant 0 : i32
    %c0_i32_1 = arith.constant 0 : i32
    return %c0_i32, %c0_i32_0 : i32, i32
  }
  func.func @transform_13(%arg0: i32) -> (i32, i32) {
    %c0_i32 = arith.constant 0 : i32
    %c0_i32_0 = arith.constant 0 : i32
    %c0_i32_1 = arith.constant 0 : i32
    return %c0_i32, %c0_i32_0 : i32, i32
  }
  func.func @transform_14(%arg0: i32) -> (i32, i32) {
    %c0_i32 = arith.constant 0 : i32
    %c0_i32_0 = arith.constant 0 : i32
    %c0_i32_1 = arith.constant 0 : i32
    return %c0_i32, %c0_i32_0 : i32, i32
  }
  func.func @transform_15(%arg0: i32) -> (i32, i32, i32, i32) {
    %c0_i32 = arith.constant 0 : i32
    %c0_i32_0 = arith.constant 0 : i32
    %c0_i32_1 = arith.constant 0 : i32
    %c0_i32_2 = arith.constant 0 : i32
    return %arg0, %c0_i32, %c0_i32_0, %c0_i32_1 : i32, i32, i32, i32
  }
}

</mosaic_0001>

<bundles_post_ra>
// kernel: _lambda_.1
= control target key start
LH: loop header
LB: loop body
LE: loop exit
PB: predicated region body
PF: predicated region fallthrough
CT: control target
= control target key end

     0   :  { %s10783_s20 = smov 0   ;;  %s14787_s0 = inlined_call_operand.vmem [shape: bf16[2,8,16,512], index: 0, kind: input, shape index: {}]   ;;  %s14788_s1 = inlined_call_operand.vmem [shape: bf16[512,128], index: 1, kind: input, shape index: {}]   ;;  %s14789_s2 = inlined_call_operand.vmem [shape: f32[1,128], index: 2, kind: input, shape index: {}]   ;;  %s14790_s3 = inlined_call_operand.vmem [shape: bf16[3,3,128,128], index: 3, kind: input, shape index: {}]   ;;  %s14791_s4 = inlined_call_operand.vmem [shape: f32[1,128], index: 4, kind: input, shape index: {}]   ;;  %s14792_s5 = inlined_call_operand.vmem [shape: bf16[128,256], index: 5, kind: input, shape index: {}]   ;;  %s14793_s6 = inlined_call_operand.vmem [shape: f32[1,256], index: 6, kind: input, shape index: {}]   ;;  %s14794_s7 = inlined_call_operand.vmem [shape: bf16[256,128], index: 7, kind: input, shape index: {}]   ;;  %s14795_s8 = inlined_call_operand.vmem [shape: f32[1,128], index: 8, kind: input, shape index: {}]   ;;  %s14796_s9 = inlined_call_operand.vmem [shape: bf16[3,3,128,128], index: 9, kind: input, shape index: {}]   ;;  %s14797_s10 = inlined_call_operand.vmem [shape: f32[1,128], index: 10, kind: input, shape index: {}]   ;;  %s14798_s11 = inlined_call_operand.vmem [shape: bf16[128,128], index: 11, kind: input, shape index: {}]   ;;  %s14799_s12 = inlined_call_operand.vmem [shape: f32[1,128], index: 12, kind: input, shape index: {}]   ;;  %s14800_s13 = inlined_call_operand.vmem [shape: f32[1,128], index: 13, kind: input, shape index: {}]   ;;  %s14801_s14 = inlined_call_operand.<no memory space> [shape: f32[1,1], index: 14, kind: input, shape index: {}]   ;;  %s14802_s15 = inlined_call_operand.vmem [shape: f32[2,16,16,1], index: 15, kind: output, shape index: {}]  }
   0x1   :  { %v20_v0 = vstv %s14801_s14 }
   0x2   :  { %21 = vst [vmem:[#allocation2] sm:$0x1] %v20_v0 }
   0x3 LB: > { %s9034_s21 = sadd.s32 4294967295, %s10694_s20   ;;  %p9038_p0 = scmp.ge.s32.totalorder %s10694_s20, 1  ;;  %s10694_s20 = sphi %s10783_s20, %s27_s20  }
   0x4   : > { %p439_p1 = scmp.lt.s32.totalorder %s10694_s20, 3 }
   0x6   : > { %p440_p2 = pnand %p9038_p0, %p439_p1 }
   0x8   : > { %443 = sbr.rel (%p440_p2) target bundleno = 1986 (0x7c2), region = 80 }
   0xd   : > { %v10463_v1 = vld [vmem:[%s14788_s1 + $0x78] sm:$0xff]   ;;  %v10465_v3 = vld [vmem:[%s14788_s1 + $0x70] sm:$0xff]   ;;  %p487_p3 = scmp.lt.s32.totalorder %s9034_s21, 1  ;;  %v10467_v5 = vld [vmem:[%s14788_s1 + $0x68] sm:$0xff]   ;;  %vm10697_vm0 = vmmov 0   ;;  %vm2310_vm5 = vcmask 1040384  }
   0xe   : > { %v10464_v2 = vld [vmem:[%s14788_s1 + $0x38] sm:$0xff]   ;;  %9710 = vmatprep.subr.bf16.mxu1 %v10463_v1  ;;  %v10466_v4 = vld [vmem:[%s14788_s1 + $0x30] sm:$0xff]   ;;  %v10468_v6 = vld [vmem:[%s14788_s1 + $0x28] sm:$0xff]   ;;  %vm2311_vm6 = vsmask.f32 256 }
   0xf   : > { %9711 = vmatpush3.bf16.msra.mxu1 %v10464_v2  ;;  %s15450_s21 = smov (!%p487_p3, %s9034_s21), 1  ;;  %v10469_v7 = vld [vmem:[%s14788_s1 + $0x60] sm:$0xff]   ;;  %v10471_v9 = vld [vmem:[%s14788_s1 + $0x58] sm:$0xff]   ;;  %v10473_v11 = vld [vmem:[%s14788_s1 + $0x50] sm:$0xff]  }
  0x10   : > { %9712 = vmatprep.subr.bf16.mxu1 %v10465_v3  ;;  %s9708_s22 = sshll.u32 %s15450_s21, 8  ;;  %v10470_v8 = vld [vmem:[%s14788_s1 + $0x20] sm:$0xff]   ;;  %v10472_v10 = vld [vmem:[%s14788_s1 + $0x18] sm:$0xff]   ;;  %v10474_v21 = vld [vmem:[%s14788_s1 + $0x10] sm:$0xff]  }
  0x11   : > { %s10826_s28 = scalar_lea.vmem %s14787_s0, %s9708_s22  ;;  %v10475_v24 = vld [vmem:[%s14788_s1 + $0x48] sm:$0xff]   ;;  %v10477_v30 = vld [vmem:[%s14788_s1 + $0x40] sm:$0xff]   ;;  %v10479_v45 = vld [vmem:[%s14788_s1 + $0xf8] sm:$0xff]   ;;  %s14686_s19 = scalar_lea.vmem %s14802_s15, %s9708_s22 }
  0x12   : > { %v498_v12 = vld [vmem:[%s10826_s28] sm:$0xff]  ;;  %v500_v13 = vld [vmem:[%s10826_s28 + $0x10] sm:$0xff]  ;;  %v10476_v27 = vld [vmem:[%s14788_s1 + $0x8] sm:$0xff]  }
  0x13   : > { %9713 = vmatpush3.bf16.msra.mxu1 %v10466_v4  ;;  %v502_v14 = vld [vmem:[%s10826_s28 + $0x20] sm:$0xff]  ;;  %v504_v15 = vld [vmem:[%s10826_s28 + $0x30] sm:$0xff]  ;;  %v10480_v50 = vld [vmem:[%s14788_s1 + $0xb8] sm:$0xff]  }
  0x14   : > { %9714 = vmatprep.subr.bf16.mxu1 %v10467_v5  ;;  %v506_v16 = vld [vmem:[%s10826_s28 + $0x40] sm:$0xff]  ;;  %v508_v17 = vld [vmem:[%s10826_s28 + $0x50] sm:$0xff]  ;;  %v530_v18 = vmax.bf16 %v502_v14, %v498_v12  ;;  %v544_v20 = vmax.bf16 %v504_v15, %v500_v13  ;;  %v10483_v53 = vld [vmem:[%s14788_s1 + $0xe8] sm:$0xff]  }
  0x15   : > { %v510_v19 = vld [vmem:[%s10826_s28 + $0x60] sm:$0xff]  ;;  %v512_v22 = vld [vmem:[%s10826_s28 + $0x70] sm:$0xff]  ;;  %v499_v54 = vld [vmem:[%s10826_s28 + $0x8] sm:$0xff] }
  0x16   : > { %v531_v23 = vmax.bf16 %v530_v18, %v506_v16  ;;  %v514_v25 = vld [vmem:[%s10826_s28 + $0x80] sm:$0xff]  ;;  %v545_v26 = vmax.bf16 %v544_v20, %v508_v17  ;;  %v516_v28 = vld [vmem:[%s10826_s28 + $0x90] sm:$0xff]  ;;  %v501_v55 = vld [vmem:[%s10826_s28 + $0x18] sm:$0xff] }
  0x17   : > { %9715 = vmatpush3.bf16.msra.mxu1 %v10468_v6  ;;  %v518_v31 = vld [vmem:[%s10826_s28 + $0xa0] sm:$0xff]  ;;  %v520_v33 = vld [vmem:[%s10826_s28 + $0xb0] sm:$0xff]  ;;  %v503_v56 = vld [vmem:[%s10826_s28 + $0x28] sm:$0xff] }
  0x18   : > { %9716 = vmatprep.subr.bf16.mxu1 %v10469_v7  ;;  %v532_v29 = vmax.bf16 %v531_v23, %v510_v19  ;;  %v546_v32 = vmax.bf16 %v545_v26, %v512_v22  ;;  %v522_v35 = vld [vmem:[%s10826_s28 + $0xc0] sm:$0xff]  ;;  %v524_v38 = vld [vmem:[%s10826_s28 + $0xd0] sm:$0xff]  ;;  %v505_v57 = vld [vmem:[%s10826_s28 + $0x38] sm:$0xff]  ;;  %v537_v60 = vmax.bf16 %v503_v56, %v499_v54 }
  0x19   : > { %v10478_v37 = vld [vmem:[%s14788_s1] sm:$0xff]   ;;  %v528_v42 = vld [vmem:[%s10826_s28 + $0xf0] sm:$0xff]  ;;  %v507_v58 = vld [vmem:[%s10826_s28 + $0x48] sm:$0xff]  ;;  %v551_v61 = vmax.bf16 %v505_v57, %v501_v55 }
  0x1a   : > { %v533_v34 = vmax.bf16 %v532_v29, %v514_v25  ;;  %v547_v36 = vmax.bf16 %v546_v32, %v516_v28  ;;  %v526_v40 = vld [vmem:[%s10826_s28 + $0xe0] sm:$0xff]  ;;  %v10481_v51 = vld [vmem:[%s14788_s1 + $0xf0] sm:$0xff]   ;;  %v509_v59 = vld [vmem:[%s10826_s28 + $0x58] sm:$0xff]  ;;  %v538_v4 = vmax.bf16 %v537_v60, %v507_v58 }
  0x1b   : > { %9717 = vmatpush3.bf16.msra.mxu1 %v10470_v8  ;;  %v10482_v52 = vld [vmem:[%s14788_s1 + $0xb0] sm:$0xff]   ;;  %v10484_v62 = vld [vmem:[%s14788_s1 + $0xa8] sm:$0xff]   ;;  %v513_v0 = vld [vmem:[%s10826_s28 + $0x78] sm:$0xff]  ;;  %v552_v5 = vmax.bf16 %v551_v61, %v509_v59 }
  0x1c   : > { %9718 = vmatprep.subr.bf16.mxu1 %v10471_v9  ;;  %v534_v39 = vmax.bf16 %v533_v34, %v518_v31  ;;  %v548_v41 = vmax.bf16 %v547_v36, %v520_v33  ;;  %v511_v63 = vld [vmem:[%s10826_s28 + $0x68] sm:$0xff]  ;;  %v10485_v1 = vld [vmem:[%s14788_s1 + $0xe0] sm:$0xff]   ;;  %v517_v3 = vld [vmem:[%s10826_s28 + $0x98] sm:$0xff] }
  0x1d   : > { %v515_v2 = vld [vmem:[%s10826_s28 + $0x88] sm:$0xff]  ;;  %v10486_v6 = vld [vmem:[%s14788_s1 + $0xa0] sm:$0xff]   ;;  %v521_v8 = vld [vmem:[%s10826_s28 + $0xb8] sm:$0xff] }
  0x1e   : > { %v535_v43 = vmax.bf16 %v534_v39, %v522_v35  ;;  %v549_v44 = vmax.bf16 %v548_v41, %v524_v38  ;;  %v519_v7 = vld [vmem:[%s10826_s28 + $0xa8] sm:$0xff]  ;;  %v10487_v9 = vld [vmem:[%s14788_s1 + $0xd8] sm:$0xff]   ;;  %v10489_v19 = vld [vmem:[%s14788_s1 + $0xd0] sm:$0xff]   ;;  %v10696_v35 = vmov 0.0  }
  0x1f   : > { %9719 = vmatpush3.bf16.msra.mxu1 %v10472_v10  ;;  %v539_v10 = vmax.bf16 %v538_v4, %v511_v63  ;;  %v523_v12 = vld [vmem:[%s10826_s28 + $0xc8] sm:$0xff]  ;;  %v525_v13 = vld [vmem:[%s10826_s28 + $0xd8] sm:$0xff]  ;;  %v10494_v31 = vld [vmem:[%s14788_s1 + $0x80] sm:$0xff]   ;;  %10007 = vmatprep.subr.bf16.mxu0 %v10696_v35 }
  0x20   : > { %9720 = vmatprep.subr.bf16.mxu1 %v10473_v11  ;;  %v536_v46 = vmax.bf16 %v535_v43, %v526_v40  ;;  %v550_v47 = vmax.bf16 %v549_v44, %v528_v42  ;;  %v553_v11 = vmax.bf16 %v552_v5, %v513_v0  ;;  %v10488_v16 = vld [vmem:[%s14788_s1 + $0x98] sm:$0xff]   ;;  %v527_v17 = vld [vmem:[%s10826_s28 + $0xe8] sm:$0xff]  ;;  %v10497_v36 = vld [vmem:[%s14790_s3 + $0x130] sm:$0xff]   ;;  %10023 = vmatprep.mubr.msk.bf16.mxu0 %vm10697_vm0, %v10696_v35 }
  0x21   : > { %v540_v14 = vmax.bf16 %v539_v10, %v515_v2  ;;  %v529_v18 = vld [vmem:[%s10826_s28 + $0xf8] sm:$0xff]  ;;  %v10491_v25 = vld [vmem:[%s14788_s1 + $0xc8] sm:$0xff]   ;;  %v10501_v40 = vld [vmem:[%s14790_s3 + $0x120] sm:$0xff]  }
  0x22   : > { %v9045_v48 = vcombine.high %v536_v46, %v550_v47  ;;  %v9044_v49 = vcombine.low %v536_v46, %v550_v47  ;;  %v554_v15 = vmax.bf16 %v553_v11, %v517_v3  ;;  %v10492_v29 = vld [vmem:[%s14788_s1 + $0x88] sm:$0xff]   ;;  %v10495_v33 = vld [vmem:[%s14790_s3 + $0x138] sm:$0xff]   ;;  %v10502_v41 = vld [vmem:[%s14790_s3 + $0xe0] sm:$0xff]  }
  0x23   : > { %9721 = vmatpush3.bf16.msra.mxu1 %v10474_v21  ;;  %v541_v20 = vmax.bf16 %v540_v14, %v519_v7  ;;  %v10496_v34 = vld [vmem:[%s14790_s3 + $0xf8] sm:$0xff]   ;;  %10008 = vmatpush3.bf16.msra.mxu0 %v10495_v33  ;;  %v10499_v38 = vld [vmem:[%s14790_s3 + $0x128] sm:$0xff]   ;;  %v10505_v44 = vld [vmem:[%s14790_s3 + $0x110] sm:$0xff]  }
  0x24   : > { %9722 = vmatprep.subr.bf16.mxu1 %v10475_v24  ;;  %873 = vmatprep.mubr.bf16.mxu1 %v9045_v48  ;;  %v555_v21 = vmax.bf16 %v554_v15, %v521_v8  ;;  %v10490_v24 = vld [vmem:[%s14788_s1 + $0x90] sm:$0xff]   ;;  %v10500_v39 = vld [vmem:[%s14790_s3 + $0xe8] sm:$0xff]   ;;  %v10503_v42 = vld [vmem:[%s14790_s3 + $0x118] sm:$0xff]  }
  0x25   : > { %v542_v22 = vmax.bf16 %v541_v20, %v523_v12  ;;  %10009 = vmatprep.subr.bf16.mxu0 %v10696_v35  ;;  %v10504_v43 = vld [vmem:[%s14790_s3 + $0xd8] sm:$0xff]   ;;  %v10507_v46 = vld [vmem:[%s14790_s3 + $0x108] sm:$0xff]   ;;  %v10509_v48 = vld [vmem:[%s14790_s3 + $0x100] sm:$0xff]  }
  0x26   : > { %v556_v23 = vmax.bf16 %v555_v21, %v525_v13  ;;  %v10508_v47 = vld [vmem:[%s14790_s3 + $0xc8] sm:$0xff]   ;;  %v9043_v56 = vld [vmem:[%s14789_s2] ss:$0 sm:$0xff]  ;;  %v10511_v5 = vld [vmem:[%s14790_s3 + $0x178] sm:$0xff]  }
  0x27   : > { %9723 = vmatpush3.bf16.msra.mxu1 %v10476_v27  ;;  %v543_v26 = vmax.bf16 %v542_v22, %v527_v17  ;;  %10010 = vmatpush3.bf16.msra.mxu0 %v10497_v36  ;;  %v10513_v8 = vld [vmem:[%s14790_s3 + $0x170] sm:$0xff]   ;;  %v10515_v10 = vld [vmem:[%s14790_s3 + $0x168] sm:$0xff]   ;;  %v10517_v12 = vld [vmem:[%s14790_s3 + $0x160] sm:$0xff]  }
  0x28   : > { %9724 = vmatprep.subr.bf16.mxu1 %v10477_v30  ;;  %v557_v27 = vmax.bf16 %v556_v23, %v529_v18  ;;  %v10493_v30 = vld [vmem:[%s14788_s1 + $0xc0] sm:$0xff]   ;;  %10011 = vmatprep.subr.bf16.mxu0 %v10696_v35  ;;  %v10516_v11 = vld [vmem:[%s14790_s3 + $0x68] sm:$0xff]   ;;  %v10519_v14 = vld [vmem:[%s14790_s3 + $0x158] sm:$0xff]  }
  0x29   : > { %v10518_v13 = vld [vmem:[%s14790_s3 + $0x60] sm:$0xff]   ;;  %v10520_v15 = vld [vmem:[%s14790_s3 + $0x58] sm:$0xff]   ;;  %v10522_v17 = vld [vmem:[%s14790_s3 + $0x50] sm:$0xff]  }
  0x2a   : > { %v9047_v28 = vcombine.high %v543_v26, %v557_v27  ;;  %v9046_v32 = vcombine.low %v543_v26, %v557_v27  ;;  %v10523_v18 = vld [vmem:[%s14790_s3 + $0x148] sm:$0xff]   ;;  %v10525_v20 = vld [vmem:[%s14790_s3 + $0x140] sm:$0xff]   ;;  %v10527_v22 = vld [vmem:[%s14790_s3 + $0x1f8] sm:$0xff]  }
  0x2b   : > { %9725 = vmatpush3.bf16.msra.mxu1 %v10478_v37  ;;  %v10498_v37 = vld [vmem:[%s14790_s3 + $0xf0] sm:$0xff]   ;;  %10012 = vmatpush3.bf16.msra.mxu0 %v10499_v38  ;;  %v10526_v21 = vld [vmem:[%s14790_s3 + $0x40] sm:$0xff]   ;;  %v10528_v23 = vld [vmem:[%s14790_s3 + $0x1b8] sm:$0xff]  }
  0x2c   : > { %9732 = vmatprep.subr.bf16.mxu1 %v10479_v45  ;;  %10013 = vmatprep.subr.bf16.mxu0 %v10696_v35  ;;  %v10506_v45 = vld [vmem:[%s14790_s3 + $0xd0] sm:$0xff]   ;;  %v10531_v26 = vld [vmem:[%s14790_s3 + $0x1e8] sm:$0xff]   ;;  %v10542_v38 = vld [vmem:[%s14790_s3 + $0x180] sm:$0xff]  }
  0x2d   : > { %v10532_v27 = vld [vmem:[%s14790_s3 + $0x1a8] sm:$0xff]   ;;  %v10538_v33 = vld [vmem:[%s14790_s3 + $0x190] sm:$0xff]   ;;  %vm11468_vm7 = vmand %vm2310_vm5, %vm2311_vm6 }
  0x2e   : > { %874 = vmatmul.mubr.bf16.vlgmr.msra.gmra.mxu1 %v9044_v49  ;;  %v10510_v49 = vld [vmem:[%s14790_s3 + $0xc0] sm:$0xff]   ;;  %v10540_v36 = vld [vmem:[%s14790_s3 + $0x188] sm:$0xff]  }
  0x2f   : > { %9733 = vmatpush3.bf16.msra.mxu1 %v10480_v50  ;;  %914 = vmatprep.mubr.bf16.mxu1 %v9047_v28  ;;  %v10533_v28 = vld [vmem:[%s14790_s3 + $0x1e0] sm:$0xff]  }
  0x30   : > { %9734 = vmatprep.subr.bf16.mxu1 %v10481_v51  ;;  %10014 = vmatpush3.bf16.msra.mxu0 %v10501_v40  ;;  %v10544_v40 = vld [vmem:[%s14790_s3 + $0xb8] sm:$0xff]  }
  0x31   : > { %10015 = vmatprep.subr.bf16.mxu0 %v10696_v35 }
  0x33   : > { %9735 = vmatpush3.bf16.msra.mxu1 %v10482_v52 }
  0x34   : > { %9736 = vmatprep.subr.bf16.mxu1 %v10483_v53  ;;  %10016 = vmatpush3.bf16.msra.mxu0 %v10503_v42  ;;  %v10546_v42 = vld [vmem:[%s14790_s3 + $0xb0] sm:$0xff]  }
  0x35   : > { %10017 = vmatprep.subr.bf16.mxu0 %v10696_v35 }
  0x37   : > { %9737 = vmatpush3.bf16.msra.mxu1 %v10484_v62 }
  0x38   : > { %9738 = vmatprep.subr.bf16.mxu1 %v10485_v1  ;;  %10018 = vmatpush3.bf16.msra.mxu0 %v10505_v44  ;;  %v10548_v44 = vld [vmem:[%s14790_s3 + $0xa8] sm:$0xff]  }
  0x39   : > { %10019 = vmatprep.subr.bf16.mxu0 %v10696_v35 }
  0x3b   : > { %9739 = vmatpush3.bf16.msra.mxu1 %v10486_v6  ;;  %v10512_v6 = vld [vmem:[%s14790_s3 + $0x78] sm:$0xff]  }
  0x3c   : > { %9740 = vmatprep.subr.bf16.mxu1 %v10487_v9  ;;  %10020 = vmatpush3.bf16.msra.mxu0 %v10507_v46  ;;  %v10514_v9 = vld [vmem:[%s14790_s3 + $0x70] sm:$0xff]   ;;  %v10550_v46 = vld [vmem:[%s14790_s3 + $0xa0] sm:$0xff]  }
  0x3d   : > { %10021 = vmatprep.subr.bf16.mxu0 %v10696_v35 }
  0x3f   : > { %9741 = vmatpush3.bf16.msra.mxu1 %v10488_v16  ;;  %v10521_v16 = vld [vmem:[%s14790_s3 + $0x150] sm:$0xff]  }
  0x40   : > { %9742 = vmatprep.subr.bf16.mxu1 %v10489_v19  ;;  %10022 = vmatpush3.bf16.msra.mxu0 %v10509_v48  ;;  %v10524_v19 = vld [vmem:[%s14790_s3 + $0x48] sm:$0xff]   ;;  %v10552_v48 = vld [vmem:[%s14790_s3 + $0x98] sm:$0xff]  }
  0x41   : > { %10047 = vmatprep.subr.bf16.mxu0 %v10696_v35 }
  0x43   : > { %9743 = vmatpush3.bf16.msra.mxu1 %v10490_v24  ;;  %v10529_v24 = vld [vmem:[%s14790_s3 + $0x1f0] sm:$0xff]  }
  0x44   : > { %9744 = vmatprep.subr.bf16.mxu1 %v10491_v25  ;;  %v10530_v25 = vld [vmem:[%s14790_s3 + $0x1b0] sm:$0xff]  }
  0x47   : > { %9745 = vmatpush3.bf16.msra.mxu1 %v10492_v29  ;;  %v10534_v29 = vld [vmem:[%s14790_s3 + $0x1a0] sm:$0xff]  }
  0x48   : > { %9746 = vmatprep.subr.bf16.mxu1 %v10493_v30  ;;  %v10535_v30 = vld [vmem:[%s14790_s3 + $0x1d8] sm:$0xff]  }
  0x4b   : > { %9747 = vmatpush3.bf16.msra.mxu1 %v10494_v31  ;;  %v10536_v31 = vld [vmem:[%s14790_s3 + $0x198] sm:$0xff]  }
  0x4c   : > { %10027 = vmatprep.subr.bf16.mxu1 %v10696_v35 }
  0x4e   : > { %915 = vmatmul.mubr.bf16.vlgmr.msra.gmra.mxu1 %v9046_v32  ;;  %v10537_v32 = vld [vmem:[%s14790_s3 + $0x1d0] sm:$0xff]  }
  0x4f   : > { %10028 = vmatpush3.bf16.msra.mxu1 %v10496_v34  ;;  %10043 = vmatprep.mubr.msk.bf16.mxu1 %vm10697_vm0, %v10696_v35  ;;  %v10539_v34 = vld [vmem:[%s14790_s3 + $0x1c8] sm:$0xff]  }
  0x50   : > { %10029 = vmatprep.subr.bf16.mxu1 %v10696_v35 }
  0x53   : > { %10030 = vmatpush3.bf16.msra.mxu1 %v10498_v37  ;;  %v10541_v37 = vld [vmem:[%s14790_s3 + $0x1c0] sm:$0xff]  }
  0x54   : > { %10031 = vmatprep.subr.bf16.mxu1 %v10696_v35 }
  0x57   : > { %10032 = vmatpush3.bf16.msra.mxu1 %v10500_v39  ;;  %v10543_v39 = vld [vmem:[%s14790_s3 + $0x238] sm:$0xff]  }
  0x58   : > { %10033 = vmatprep.subr.bf16.mxu1 %v10696_v35 }
  0x5b   : > { %10034 = vmatpush3.bf16.msra.mxu1 %v10502_v41  ;;  %v10545_v41 = vld [vmem:[%s14790_s3 + $0x230] sm:$0xff]  }
  0x5c   : > { %10035 = vmatprep.subr.bf16.mxu1 %v10696_v35 }
  0x5f   : > { %10036 = vmatpush3.bf16.msra.mxu1 %v10504_v43  ;;  %v10547_v43 = vld [vmem:[%s14790_s3 + $0x228] sm:$0xff]  }
  0x60   : > { %10037 = vmatprep.subr.bf16.mxu1 %v10696_v35 }
  0x63   : > { %10038 = vmatpush3.bf16.msra.mxu1 %v10506_v45  ;;  %v10549_v45 = vld [vmem:[%s14790_s3 + $0x220] sm:$0xff]  }
  0x64   : > { %10039 = vmatprep.subr.bf16.mxu1 %v10696_v35 }
  0x67   : > { %10040 = vmatpush3.bf16.msra.mxu1 %v10508_v47  ;;  %v10551_v47 = vld [vmem:[%s14790_s3 + $0x218] sm:$0xff]  }
  0x68   : > { %10041 = vmatprep.subr.bf16.mxu1 %v10696_v35 }
  0x6b   : > { %10042 = vmatpush3.bf16.msra.mxu1 %v10510_v49  ;;  %v10553_v49 = vld [vmem:[%s14790_s3 + $0x210] sm:$0xff]  }
  0x6c   : > { %10067 = vmatprep.subr.bf16.mxu1 %v10696_v35 }
  0xee   : > { %v9726_v50 = vpop.f32.mrf.mxu1 }
  0xf0   : > { %v9727_v51 = vpop.f32.mrf.mxu1 }
  0xf1   : > { %v9728_v55 = vadd.f32 %v9727_v51, %v9726_v50  ;;  %v10554_v50 = vld [vmem:[%s14790_s3 + $0x90] sm:$0xff]   ;;  %v10555_v51 = vld [vmem:[%s14790_s3 + $0x208] sm:$0xff]  }
  0xf2   : > { %v9729_v52 = vpop.f32.mrf.mxu1 }
  0xf3   : > { %v876_v61 = vadd.f32 %v9728_v55, %v9043_v56  ;;  %v10559_v55 = vld [vmem:[%s14790_s3 + $0x38] sm:$0xff]  }
  0xf4   : > { %v9730_v53 = vpop.f32.mrf.mxu1 }
  0xf5   : > { %v9731_v58 = vadd.f32 %v9730_v53, %v9729_v52  ;;  %v10556_v52 = vld [vmem:[%s14790_s3 + $0x88] sm:$0xff]   ;;  %v10557_v53 = vld [vmem:[%s14790_s3 + $0x200] sm:$0xff]  }
  0xf7   : > { %v879_v63 = vadd.f32 %v9731_v58, %v9043_v56  ;;  %v10560_v56 = vld [vmem:[%s14790_s3 + $0x30] sm:$0xff]   ;;  %v10562_v58 = vld [vmem:[%s14790_s3 + $0x20] sm:$0xff]  }
 0x10e   : > { %v9748_v54 = vpop.f32.mrf.mxu1 }
 0x110   : > { %v9749_v57 = vpop.f32.mrf.mxu1 }
 0x111   : > { %v9750_v59 = vadd.f32 %v9749_v57, %v9748_v54  ;;  %v10558_v54 = vld [vmem:[%s14790_s3 + $0x80] sm:$0xff]   ;;  %v10561_v57 = vld [vmem:[%s14790_s3 + $0x28] sm:$0xff]  }
 0x112   : > { %v9751_v60 = vpop.f32.mrf.mxu1 }
 0x113   : > { %v917_v0 = vadd.f32 %v9750_v59, %v876_v61  ;;  %v10563_v59 = vld [vmem:[%s14790_s3 + $0x18] sm:$0xff]   ;;  %v10565_v61 = vld [vmem:[%s14790_s3 + $0x8] sm:$0xff]  }
 0x114   : > { %v9752_v62 = vpop.f32.mrf.mxu1 }
 0x115   : > { %v9753_v1 = vadd.f32 %v9752_v62, %v9751_v60  ;;  %v923_v3 = vmax.f32 %v917_v0, 0.0  ;;  %v10564_v60 = vld [vmem:[%s14790_s3 + $0x10] sm:$0xff]   ;;  %v10566_v62 = vld [vmem:[%s14790_s3] sm:$0xff]  }
 0x116   : > { %v11252_v0 = vld [vmem:[%s14791_s4] ss:$0 sm:$0xff] }
 0x117   : > { %v920_v2 = vadd.f32 %v9753_v1, %v879_v63  ;;  %v926_v63 = vlaneseq }
 0x119   : > { %v924_v4 = vmax.f32 %v920_v2, 0.0 }
 0x11b   : > { %v11008_v7 = vpack.c.bf16 %v924_v4, %v923_v3 }
 0x11d   : > { %10024 = vmatmul.mubr.bf16.vlgmr.msra.gmra.mxu0 %v11008_v7  ;;  %10044 = vmatmul.mubr.bf16.vlgmr.msra.gmra.mxu1 %v11008_v7 }
 0x11e   : > { %10048 = vmatpush3.bf16.msra.mxu0 %v10511_v5  ;;  %10068 = vmatpush3.bf16.msra.mxu1 %v10512_v6  ;;  %v11254_v5 = vshrl.u32 %v926_v63, 7 }
 0x11f   : > { %10049 = vmatprep.subr.bf16.mxu0 %v10696_v35  ;;  %10069 = vmatprep.subr.bf16.mxu1 %v10696_v35 }
 0x120   : > { %10063 = vmatprep.mubr.msk.bf16.mxu0 %vm10697_vm0, %v10696_v35  ;;  %10083 = vmatprep.mubr.msk.bf16.mxu1 %vm10697_vm0, %v10696_v35  ;;  %vm1195_vm1 = vcmp.lt.s32.totalorder %v11254_v5, 7  ;;  %vm1420_vm4 = vcmp.lt.s32.totalorder %v11254_v5, 4  ;;  %vm1961_vm9 = vcmp.lt.s32.totalorder %v11254_v5, 3 }
 0x122   : > { %10050 = vmatpush3.bf16.msra.mxu0 %v10513_v8  ;;  %10070 = vmatpush3.bf16.msra.mxu1 %v10514_v9 }
 0x123   : > { %10051 = vmatprep.subr.bf16.mxu0 %v10696_v35  ;;  %10071 = vmatprep.subr.bf16.mxu1 %v10696_v35 }
 0x126   : > { %10052 = vmatpush3.bf16.msra.mxu0 %v10515_v10  ;;  %10072 = vmatpush3.bf16.msra.mxu1 %v10516_v11 }
 0x127   : > { %10053 = vmatprep.subr.bf16.mxu0 %v10696_v35  ;;  %10073 = vmatprep.subr.bf16.mxu1 %v10696_v35 }
 0x12a   : > { %10054 = vmatpush3.bf16.msra.mxu0 %v10517_v12  ;;  %10074 = vmatpush3.bf16.msra.mxu1 %v10518_v13 }
 0x12b   : > { %10055 = vmatprep.subr.bf16.mxu0 %v10696_v35  ;;  %10075 = vmatprep.subr.bf16.mxu1 %v10696_v35 }
 0x12e   : > { %10056 = vmatpush3.bf16.msra.mxu0 %v10519_v14  ;;  %10076 = vmatpush3.bf16.msra.mxu1 %v10520_v15 }
 0x12f   : > { %10057 = vmatprep.subr.bf16.mxu0 %v10696_v35  ;;  %10077 = vmatprep.subr.bf16.mxu1 %v10696_v35 }
 0x132   : > { %10058 = vmatpush3.bf16.msra.mxu0 %v10521_v16  ;;  %10078 = vmatpush3.bf16.msra.mxu1 %v10522_v17 }
 0x133   : > { %10059 = vmatprep.subr.bf16.mxu0 %v10696_v35  ;;  %10079 = vmatprep.subr.bf16.mxu1 %v10696_v35 }
 0x136   : > { %10060 = vmatpush3.bf16.msra.mxu0 %v10523_v18  ;;  %10080 = vmatpush3.bf16.msra.mxu1 %v10524_v19  ;;  %v10698_v18 = vmov 1966171168  }
 0x137   : > { %10061 = vmatprep.subr.bf16.mxu0 %v10696_v35  ;;  %10081 = vmatprep.subr.bf16.mxu1 %v10696_v35  ;;  %v1989_v19 = vunpack.c.l.s4 %v10698_v18 }
 0x13a   : > { %10062 = vmatpush3.bf16.msra.mxu0 %v10525_v20  ;;  %10082 = vmatpush3.bf16.msra.mxu1 %v10526_v21  ;;  %v10569_v20 = vld [vmem:[%s14792_s5 + $0x74] ss:$8 sps:$4 sm:$0xff]   ;;  %v10567_v21 = vld [vmem:[%s14792_s5 + $0x70] ss:$8 sps:$4 sm:$0xff]  }
 0x13b   : > { %10087 = vmatprep.subr.bf16.mxu0 %v10696_v35  ;;  %10107 = vmatprep.subr.bf16.mxu1 %v10696_v35 }
 0x13d   : > { %10064 = vmatmul.mubr.bf16.vlgmr.msra.gmra.mxu0 %v11008_v7  ;;  %10084 = vmatmul.mubr.bf16.vlgmr.msra.gmra.mxu1 %v11008_v7 }
 0x13e   : > { %10088 = vmatpush3.bf16.msra.mxu0 %v10527_v22  ;;  %10108 = vmatpush3.bf16.msra.mxu1 %v10528_v23  ;;  %v1990_v22 = vunpack.c.0.s8 %v1989_v19  ;;  %v10572_v23 = vld [vmem:[%s14792_s5 + $0x64] ss:$8 sps:$4 sm:$0xff]  }
 0x13f   : > { %10089 = vmatprep.subr.bf16.mxu0 %v10696_v35  ;;  %10109 = vmatprep.subr.bf16.mxu1 %v10696_v35 }
 0x140   : > { %10103 = vmatprep.mubr.msk.bf16.mxu0 %vm10697_vm0, %v10696_v35  ;;  %10123 = vmatprep.mubr.msk.bf16.mxu1 %vm10697_vm0, %v10696_v35 }
 0x142   : > { %10090 = vmatpush3.bf16.msra.mxu0 %v10529_v24  ;;  %10110 = vmatpush3.bf16.msra.mxu1 %v10530_v25  ;;  %v10570_v24 = vld [vmem:[%s14792_s5 + $0x60] ss:$8 sps:$4 sm:$0xff]   ;;  %v11278_v25 = vsub.s32 %v1990_v22, %v11254_v5 }
 0x143   : > { %10091 = vmatprep.subr.bf16.mxu0 %v10696_v35  ;;  %10111 = vmatprep.subr.bf16.mxu1 %v10696_v35 }
 0x146   : > { %10092 = vmatpush3.bf16.msra.mxu0 %v10531_v26  ;;  %10112 = vmatpush3.bf16.msra.mxu1 %v10532_v27  ;;  %v10575_v27 = vld [vmem:[%s14792_s5 + $0x54] ss:$8 sps:$4 sm:$0xff]  }
 0x147   : > { %10093 = vmatprep.subr.bf16.mxu0 %v10696_v35  ;;  %10113 = vmatprep.subr.bf16.mxu1 %v10696_v35 }
 0x14a   : > { %10094 = vmatpush3.bf16.msra.mxu0 %v10533_v28  ;;  %10114 = vmatpush3.bf16.msra.mxu1 %v10534_v29  ;;  %v10573_v28 = vld [vmem:[%s14792_s5 + $0x50] ss:$8 sps:$4 sm:$0xff]  }
 0x14b   : > { %10095 = vmatprep.subr.bf16.mxu0 %v10696_v35  ;;  %10115 = vmatprep.subr.bf16.mxu1 %v10696_v35 }
 0x14e   : > { %10096 = vmatpush3.bf16.msra.mxu0 %v10535_v30  ;;  %10116 = vmatpush3.bf16.msra.mxu1 %v10536_v31  ;;  %v11289_v31 = vadd.s32 8, %v11254_v5 }
 0x14f   : > { %10097 = vmatprep.subr.bf16.mxu0 %v10696_v35  ;;  %10117 = vmatprep.subr.bf16.mxu1 %v10696_v35 }
 0x150   : > { %vm956_vm8 = vcmp.lt.s32.totalorder %v11289_v31, 12 }
 0x152   : > { %10098 = vmatpush3.bf16.msra.mxu0 %v10537_v32  ;;  %10118 = vmatpush3.bf16.msra.mxu1 %v10538_v33  ;;  %v10578_v32 = vld [vmem:[%s14792_s5 + $0x44] ss:$8 sps:$4 sm:$0xff]   ;;  %v933_v33 = vand.u32 3, %v11254_v5 }
 0x153   : > { %10099 = vmatprep.subr.bf16.mxu0 %v10696_v35  ;;  %10119 = vmatprep.subr.bf16.mxu1 %v10696_v35 }
 0x154   : > { %vm11311_vm2 = vcmp.lt.s32.totalorder %v933_v33, 3 }
 0x156   : > { %10100 = vmatpush3.bf16.msra.mxu0 %v10539_v34  ;;  %10120 = vmatpush3.bf16.msra.mxu1 %v10540_v36  ;;  %v10576_v34 = vld [vmem:[%s14792_s5 + $0x40] ss:$8 sps:$4 sm:$0xff]   ;;  %v10581_v36 = vld [vmem:[%s14792_s5 + $0x34] ss:$8 sps:$4 sm:$0xff]  }
 0x157   : > { %10101 = vmatprep.subr.bf16.mxu0 %v10696_v35  ;;  %10121 = vmatprep.subr.bf16.mxu1 %v10696_v35 }
 0x15a   : > { %10102 = vmatpush3.bf16.msra.mxu0 %v10541_v37  ;;  %10122 = vmatpush3.bf16.msra.mxu1 %v10542_v38  ;;  %v10579_v38 = vld [vmem:[%s14792_s5 + $0x30] ss:$8 sps:$4 sm:$0xff]  }
 0x15b   : > { %10127 = vmatprep.subr.bf16.mxu0 %v10696_v35  ;;  %10147 = vmatprep.subr.bf16.mxu1 %v10696_v35 }
 0x15d   : > { %10104 = vmatmul.mubr.bf16.vlgmr.msra.gmra.mxu0 %v11008_v7  ;;  %10124 = vmatmul.mubr.bf16.vlgmr.msra.gmra.mxu1 %v11008_v7 }
 0x15e   : > { %10128 = vmatpush3.bf16.msra.mxu0 %v10543_v39  ;;  %10148 = vmatpush3.bf16.msra.mxu1 %v10544_v40 }
 0x15f   : > { %10129 = vmatprep.subr.bf16.mxu0 %v10696_v35  ;;  %10149 = vmatprep.subr.bf16.mxu1 %v10696_v35 }
 0x160   : > { %10143 = vmatprep.mubr.msk.bf16.mxu0 %vm10697_vm0, %v10696_v35  ;;  %10163 = vmatprep.mubr.msk.bf16.mxu1 %vm10697_vm0, %v10696_v35 }
 0x162   : > { %10130 = vmatpush3.bf16.msra.mxu0 %v10545_v41  ;;  %10150 = vmatpush3.bf16.msra.mxu1 %v10546_v42  ;;  %v940_v41 = vand.u32 3, %v11289_v31  ;;  %v10584_v42 = vld [vmem:[%s14792_s5 + $0x24] ss:$8 sps:$4 sm:$0xff]  }
 0x163   : > { %10131 = vmatprep.subr.bf16.mxu0 %v10696_v35  ;;  %10151 = vmatprep.subr.bf16.mxu1 %v10696_v35 }
 0x164   : > { %vm11334_vm3 = vcmp.lt.s32.totalorder %v940_v41, 3 }
 0x165   : > { %vm11649_vm10 = vmand %vm11334_vm3, %vm956_vm8 }
 0x166   : > { %10132 = vmatpush3.bf16.msra.mxu0 %v10547_v43  ;;  %10152 = vmatpush3.bf16.msra.mxu1 %v10548_v44  ;;  %v10699_v44 = vmov 0  }
 0x167   : > { %10133 = vmatprep.subr.bf16.mxu0 %v10696_v35  ;;  %10153 = vmatprep.subr.bf16.mxu1 %v10696_v35 }
 0x16a   : > { %10134 = vmatpush3.bf16.msra.mxu0 %v10549_v45  ;;  %10154 = vmatpush3.bf16.msra.mxu1 %v10550_v46 }
 0x16b   : > { %10135 = vmatprep.subr.bf16.mxu0 %v10696_v35  ;;  %10155 = vmatprep.subr.bf16.mxu1 %v10696_v35 }
 0x16e   : > { %10136 = vmatpush3.bf16.msra.mxu0 %v10551_v47  ;;  %10156 = vmatpush3.bf16.msra.mxu1 %v10552_v48  ;;  %v10582_v47 = vld [vmem:[%s14792_s5 + $0x20] ss:$8 sps:$4 sm:$0xff]  }
 0x16f   : > { %10137 = vmatprep.subr.bf16.mxu0 %v10696_v35  ;;  %10157 = vmatprep.subr.bf16.mxu1 %v10696_v35 }
 0x172   : > { %10138 = vmatpush3.bf16.msra.mxu0 %v10553_v49  ;;  %10158 = vmatpush3.bf16.msra.mxu1 %v10554_v50 }
 0x173   : > { %10139 = vmatprep.subr.bf16.mxu0 %v10696_v35  ;;  %10159 = vmatprep.subr.bf16.mxu1 %v10696_v35 }
 0x176   : > { %10140 = vmatpush3.bf16.msra.mxu0 %v10555_v51  ;;  %10160 = vmatpush3.bf16.msra.mxu1 %v10556_v52 }
 0x177   : > { %10141 = vmatprep.subr.bf16.mxu0 %v10696_v35  ;;  %10161 = vmatprep.subr.bf16.mxu1 %v10696_v35 }
 0x17a   : > { %10142 = vmatpush3.bf16.msra.mxu0 %v10557_v53  ;;  %10162 = vmatpush3.bf16.msra.mxu1 %v10558_v54  ;;  %v10587_v54 = vld [vmem:[%s14792_s5 + $0x14] ss:$8 sps:$4 sm:$0xff]  }
 0x17b   : > { %10167 = vmatprep.subr.bf16.mxu0 %v10696_v35  ;;  %3009 = vmatprep.subr.bf16.mxu1 %v10569_v20 }
 0x17d   : > { %10144 = vmatmul.mubr.bf16.vlgmr.msra.gmra.mxu0 %v11008_v7  ;;  %10164 = vmatmul.mubr.bf16.vlgmr.msra.gmra.mxu1 %v11008_v7 }
 0x17e   : > { %10168 = vmatpush3.bf16.msra.mxu0 %v10559_v55  ;;  %10183 = vmatprep.mubr.msk.bf16.mxu0 %vm10697_vm0, %v10696_v35 }
 0x17f   : > { %10169 = vmatprep.subr.bf16.mxu0 %v10696_v35  ;;  %3010 = vmatpush1.bf16.msra.mxu1 %v10567_v21 }
 0x180   : > { %3011 = vmatprep.subr.bf16.mxu1 %v10572_v23  ;;  %3041 = vmatprep.mubr.bf16.mxu1 %v10699_v44 }
 0x182   : > { %10170 = vmatpush3.bf16.msra.mxu0 %v10560_v56 }
 0x183   : > { %10171 = vmatprep.subr.bf16.mxu0 %v10696_v35  ;;  %3012 = vmatpush1.bf16.msra.mxu1 %v10570_v24  ;;  %v10588_v24 = vld [vmem:[%s14792_s5] ss:$8 sps:$4 sm:$0xff]  }
 0x184   : > { %3013 = vmatprep.subr.bf16.mxu1 %v10575_v27 }
 0x186   : > { %10172 = vmatpush3.bf16.msra.mxu0 %v10561_v57 }
 0x187   : > { %10173 = vmatprep.subr.bf16.mxu0 %v10696_v35  ;;  %3014 = vmatpush1.bf16.msra.mxu1 %v10573_v28 }
 0x188   : > { %3015 = vmatprep.subr.bf16.mxu1 %v10578_v32 }
 0x18a   : > { %10174 = vmatpush3.bf16.msra.mxu0 %v10562_v58 }
 0x18b   : > { %10175 = vmatprep.subr.bf16.mxu0 %v10696_v35  ;;  %3016 = vmatpush1.bf16.msra.mxu1 %v10576_v34 }
 0x18c   : > { %3017 = vmatprep.subr.bf16.mxu1 %v10581_v36 }
 0x18e   : > { %10176 = vmatpush3.bf16.msra.mxu0 %v10563_v59  ;;  %v11351_v59 = vsub.s32 0, %v11254_v5 }
 0x18f   : > { %10177 = vmatprep.subr.bf16.mxu0 %v10696_v35  ;;  %3018 = vmatpush1.bf16.msra.mxu1 %v10579_v38 }
 0x190   : > { %3019 = vmatprep.subr.bf16.mxu1 %v10584_v42 }
 0x192   : > { %10178 = vmatpush3.bf16.msra.mxu0 %v10564_v60 }
 0x193   : > { %10179 = vmatprep.subr.bf16.mxu0 %v10696_v35  ;;  %3020 = vmatpush1.bf16.msra.mxu1 %v10582_v47 }
 0x194   : > { %3021 = vmatprep.subr.bf16.mxu1 %v10587_v54 }
 0x196   : > { %10180 = vmatpush3.bf16.msra.mxu0 %v10565_v61 }
 0x197   : > { %10181 = vmatprep.subr.bf16.mxu0 %v10696_v35 }
 0x19a   : > { %10182 = vmatpush3.bf16.msra.mxu0 %v10566_v62 }
 0x19d   : > { %10184 = vmatmul.mubr.bf16.vlgmr.msra.gmra.mxu0 %v11008_v7 }
 0x1dd   : > { %v1063_v1 = vpop.f32.mrf.mxu0  ;;  %v1186_v2 = vpop.f32.mrf.mxu1 }
 0x1de   : > { %v1064_v6 = vadd.f32 %v11252_v0, %v1063_v1  ;;  %v1193_v35 = vrot.slane %v1186_v2, 1  ;;  %v10585_v2 = vld [vmem:[%s14792_s5 + $0x10] ss:$8 sps:$4 sm:$0xff]  }
 0x1df   : > { %v10025_v3 = vpop.f32.mrf.mxu0  ;;  %v10045_v4 = vpop.f32.mrf.mxu1  ;;  %3022 = vmatpush1.bf16.msra.mxu1 %v10585_v2 }
 0x1e0   : > { %v1974_v13 = vmax.f32 %v1064_v6, 0.0 }
 0x1e1   : > { %v1066_v8 = vpop.f32.mrf.mxu0  ;;  %v1189_v9 = vpop.f32.mrf.mxu1 }
 0x1e2   : > { %v1067_v7 = vadd.f32 %v11252_v0, %v1066_v8  ;;  %v1194_v10 = vrot.slane %v1189_v9, 1 }
 0x1e3   : > { %v10026_v11 = vpop.f32.mrf.mxu0  ;;  %v10046_v12 = vpop.f32.mrf.mxu1 }
 0x1e4   : > { %v1975_v14 = vmax.f32 %v1067_v7, 0.0  ;;  %v1196_v15 = vsel %vm1195_vm1, %v1193_v35, %v1194_v10  ;;  %v11263_v16 = vsel %vm1195_vm1, %v1194_v10, %v1193_v35  ;;  %v10590_v7 = vld [vmem:[%s14792_s5 + $0x4] ss:$8 sps:$4 sm:$0xff]  }
 0x1e5   : > { %v1202_v50 = vsel %vm11311_vm2, %v1196_v15, 0.0  ;;  %v1203_v1 = vsel %vm11334_vm3, %v11263_v16, 0.0  ;;  %3023 = vmatprep.subr.bf16.mxu1 %v10590_v7 }
 0x1e6   : > { %v1976_v17 = vpack.c.bf16 %v1975_v14, %v1974_v13  ;;  %v9281_v26 = vpack.c.bf16 %v1975_v14, %v1975_v14  ;;  %3024 = vmatpush1.bf16.msra.mxu1 %v10588_v24 }
 0x1e8   : > { %v1994_v29 = vrot.slane %v1976_v17, %v11278_v25  ;;  %v2001_v30 = vrot.slane %v9281_v26, %v11278_v25 }
 0x1ea   : > { %v2002_v37 = vcombine.high %v1994_v29, %v1994_v29  ;;  %v2003_v39 = vcombine.high %v2001_v30, %v2001_v30  ;;  %v11305_v40 = vrot.slane %v1994_v29, %v11278_v25  ;;  %v11317_v45 = vrot.slane %v2001_v30, %v11278_v25 }
 0x1ec   : > { %v11320_v46 = vrot.slane %v2002_v37, %v11278_v25  ;;  %v11326_v48 = vrot.slane %v2003_v39, %v11278_v25  ;;  %v11330_v49 = vcombine.high %v11305_v40, %v11305_v40  ;;  %v11343_v56 = vcombine.high %v11317_v45, %v11317_v45 }
 0x1ed   : > { %v2037_v58 = vunpack.i.h.s16 %v11305_v40  ;;  %v2045_v62 = vunpack.i.h.s16 %v11317_v45  ;;  %v9283_v63 = vpack.i.b16 %v11305_v40, %v11305_v40  ;;  %v9287_v8 = vpack.i.b16 %v11317_v45, %v11317_v45 }
 0x1ee   : > { %v11347_v57 = vcombine.high %v11320_v46, %v11320_v46  ;;  %v11365_v3 = vcombine.high %v11326_v48, %v11326_v48  ;;  %v2039_v4 = vunpack.i.h.s16 %v11320_v46  ;;  %v2041_v6 = vunpack.i.h.s16 %v11330_v49 }
 0x1ef   : > { %v2047_v15 = vunpack.i.h.s16 %v11326_v48  ;;  %v2049_v16 = vunpack.i.h.s16 %v11343_v56  ;;  %v11378_v17 = vpack.i.b16 %v2037_v58, %v2037_v58  ;;  %v9284_v20 = vpack.i.b16 %v11320_v46, %v11320_v46 }
 0x1f0   : > { %v2043_v14 = vunpack.i.h.s16 %v11347_v57  ;;  %v2051_v26 = vunpack.i.h.s16 %v11365_v3  ;;  %v11395_v27 = vpack.i.b16 %v2039_v4, %v2039_v4  ;;  %v9285_v28 = vpack.i.b16 %v11330_v49, %v11330_v49 }
 0x1f1   : > { %v11399_v29 = vpack.i.b16 %v2041_v6, %v2041_v6  ;;  %v9286_v30 = vpack.i.b16 %v11347_v57, %v11347_v57  ;;  %v11403_v32 = vpack.i.b16 %v2045_v62, %v2045_v62  ;;  %v9288_v37 = vpack.i.b16 %v11326_v48, %v11326_v48 }
 0x1f2   : > { %v11405_v36 = vpack.i.b16 %v2043_v14, %v2043_v14  ;;  %v11409_v38 = vpack.i.b16 %v2047_v15, %v2047_v15  ;;  %v9289_v39 = vpack.i.b16 %v11343_v56, %v11343_v56  ;;  %v11413_v40 = vpack.i.b16 %v2049_v16, %v2049_v16 }
 0x1f3   : > { %v9290_v41 = vpack.i.b16 %v11365_v3, %v11365_v3  ;;  %v11417_v46 = vpack.i.b16 %v2051_v26, %v2051_v26  ;;  %v11420_v47 = vrot.slane %v9283_v63, %v11351_v59  ;;  %v2141_v48 = vrot.slane %v11378_v17, %v11351_v59 }
 0x1f4   : > { %v11425_v49 = vrot.slane %v9284_v20, %v11351_v59  ;;  %v11437_v56 = vrot.slane %v9287_v8, %v11351_v59  ;;  %v2173_v57 = vrot.slane %v11403_v32, %v11351_v59  ;;  %v11442_v58 = vrot.slane %v9288_v37, %v11351_v59 }
 0x1f5   : > { %v11449_v2 = vrot.slane %v9289_v39, %v11351_v59  ;;  %v2189_v4 = vrot.slane %v11413_v40, %v11351_v59  ;;  %v2161_v6 = vrot.slane %v9286_v30, %v11351_v59 }
 0x1fd   : > { %v1286_v51 = vpop.f32.mrf.mxu0  ;;  %v1411_v52 = vpop.f32.mrf.mxu1 }
 0x1fe   : > { %v1287_v55 = vadd.f32 %v1286_v51, %v1202_v50  ;;  %v1418_v11 = vrot.slane %v1411_v52, 4  ;;  %v2149_v50 = vrot.slane %v11395_v27, %v11351_v59  ;;  %v11430_v51 = vrot.slane %v9285_v28, %v11351_v59 }
 0x1ff   : > { %v10065_v60 = vpop.f32.mrf.mxu0  ;;  %v10085_v61 = vpop.f32.mrf.mxu1 }
 0x200   : > { %v1293_v10 = vadd.f32 %v11252_v0, %v1287_v55  ;;  %v2157_v55 = vrot.slane %v11399_v29, %v11351_v59 }
 0x201   : > { %v1289_v9 = vpop.f32.mrf.mxu0  ;;  %v1414_v35 = vpop.f32.mrf.mxu1 }
 0x202   : > { %v1290_v12 = vadd.f32 %v1289_v9, %v1203_v1  ;;  %v1419_v13 = vrot.slane %v1414_v35, 4  ;;  %v1977_v33 = vmax.f32 %v1293_v10, 0.0  ;;  %v2181_v1 = vrot.slane %v11409_v38, %v11351_v59 }
 0x203   : > { %v10066_v18 = vpop.f32.mrf.mxu0  ;;  %v10086_v19 = vpop.f32.mrf.mxu1 }
 0x204   : > { %v1294_v21 = vadd.f32 %v11252_v0, %v1290_v12  ;;  %v11385_v22 = vsel %vm1420_vm4, %v1418_v11, %v1419_v13  ;;  %v11389_v23 = vsel %vm1420_vm4, %v1419_v13, %v1418_v11  ;;  %v2165_v13 = vrot.slane %v11405_v36, %v11351_v59 }
 0x206   : > { %v1978_v34 = vmax.f32 %v1294_v21, 0.0 }
 0x208   : > { %v1979_v42 = vpack.c.bf16 %v1978_v34, %v1977_v33  ;;  %v9282_v45 = vpack.c.bf16 %v1978_v34, %v1978_v34 }
 0x20a   : > { %v2060_v52 = vrot.slane %v1979_v42, %v11278_v25  ;;  %v2067_v54 = vrot.slane %v9282_v45, %v11278_v25 }
 0x20c   : > { %v2068_v60 = vcombine.high %v2060_v52, %v2060_v52  ;;  %v2069_v61 = vcombine.high %v2067_v54, %v2067_v54  ;;  %v2076_v62 = vrot.slane %v2060_v52, %v11278_v25  ;;  %v2083_v63 = vrot.slane %v2067_v54, %v11278_v25 }
 0x20e   : > { %v2090_v8 = vrot.slane %v2068_v60, %v11278_v25  ;;  %v2097_v9 = vrot.slane %v2069_v61, %v11278_v25  ;;  %v2098_v35 = vcombine.high %v2076_v62, %v2076_v62  ;;  %v11456_v7 = vcombine.high %v2083_v63, %v2083_v63 }
 0x20f   : > { %v2103_v10 = vunpack.i.h.s16 %v2076_v62  ;;  %v2111_v11 = vunpack.i.h.s16 %v2083_v63  ;;  %v9291_v12 = vpack.i.b16 %v2076_v62, %v2076_v62  ;;  %v9295_v21 = vpack.i.b16 %v2083_v63, %v2083_v63 }
 0x210   : > { %v2100_v14 = vcombine.high %v2090_v8, %v2090_v8  ;;  %v11460_v15 = vcombine.high %v2097_v9, %v2097_v9  ;;  %v2105_v16 = vunpack.i.h.s16 %v2090_v8  ;;  %v2107_v17 = vunpack.i.h.s16 %v2098_v35 }
 0x211   : > { %v2113_v18 = vunpack.i.h.s16 %v2097_v9  ;;  %v2115_v19 = vunpack.i.h.s16 %v11456_v7  ;;  %v2215_v20 = vpack.i.b16 %v2103_v10, %v2103_v10  ;;  %v9292_v27 = vpack.i.b16 %v2090_v8, %v2090_v8 }
 0x212   : > { %v2109_v24 = vunpack.i.h.s16 %v2100_v14  ;;  %v2117_v26 = vunpack.i.h.s16 %v11460_v15  ;;  %v2217_v28 = vpack.i.b16 %v2105_v16, %v2105_v16  ;;  %v9293_v29 = vpack.i.b16 %v2098_v35, %v2098_v35 }
 0x213   : > { %v2219_v30 = vpack.i.b16 %v2107_v17, %v2107_v17  ;;  %v9294_v33 = vpack.i.b16 %v2100_v14, %v2100_v14  ;;  %v2223_v34 = vpack.i.b16 %v2111_v11, %v2111_v11  ;;  %v9296_v37 = vpack.i.b16 %v2097_v9, %v2097_v9 }
 0x214   : > { %v2221_v36 = vpack.i.b16 %v2109_v24, %v2109_v24  ;;  %v2225_v39 = vpack.i.b16 %v2113_v18, %v2113_v18  ;;  %v9297_v42 = vpack.i.b16 %v11456_v7, %v11456_v7  ;;  %v11472_v52 = vpack.i.b16 %v2115_v19, %v2115_v19 }
 0x215   : > { %v9298_v54 = vpack.i.b16 %v11460_v15, %v11460_v15  ;;  %v2233_v60 = vrot.slane %v9291_v12, %v11351_v59  ;;  %v2237_v61 = vrot.slane %v2215_v20, %v11351_v59  ;;  %v2241_v62 = vrot.slane %v9292_v27, %v11351_v59 }
 0x216   : > { %v2245_v63 = vrot.slane %v2217_v28, %v11351_v59  ;;  %v2265_v8 = vrot.slane %v9295_v21, %v11351_v59  ;;  %v2269_v9 = vrot.slane %v2223_v34, %v11351_v59  ;;  %v2249_v10 = vrot.slane %v9293_v29, %v11351_v59  ;;  %v10593_v34 = vld [vmem:[%s14794_s7 + $0x70] sm:$0xff]  }
 0x217   : > { %v2313_v35 = vsel %vm11468_vm7, %v11420_v47, %v2233_v60  ;;  %v2314_v7 = vsel %vm11468_vm7, %v2141_v48, %v2237_v61  ;;  %v2253_v11 = vrot.slane %v2219_v30, %v11351_v59  ;;  %v2315_v12 = vsel %vm11468_vm7, %v11425_v49, %v2241_v62 }
 0x218   : > { %v2316_v14 = vsel %vm11468_vm7, %v2149_v50, %v2245_v63  ;;  %v2729_v15 = vcombine.low %v2313_v35, %v2314_v7  ;;  %v2257_v16 = vrot.slane %v9294_v33, %v11351_v59  ;;  %v2261_v47 = vrot.slane %v2221_v36, %v11351_v59 }
 0x219   : > { %v2730_v17 = vcombine.low %v2315_v12, %v2316_v14  ;;  %v2317_v48 = vsel %vm11468_vm7, %v11430_v51, %v2249_v10  ;;  %v2318_v18 = vsel %vm11468_vm7, %v2157_v55, %v2253_v11  ;;  %v2273_v50 = vrot.slane %v9296_v37, %v11351_v59  ;;  %v10595_v10 = vld [vmem:[%s14794_s7 + $0x68] sm:$0xff]  }
 0x21a   : > { %v2739_v19 = vrot.slane %v2729_v15, %v11278_v25  ;;  %v2319_v49 = vsel %vm11468_vm7, %v2161_v6, %v2257_v16  ;;  %v2778_v20 = vcombine.low %v2317_v48, %v2318_v18  ;;  %v2320_v24 = vsel %vm11468_vm7, %v2165_v13, %v2261_v47  ;;  %v10596_v47 = vld [vmem:[%s14794_s7 + $0x28] sm:$0xff]   ;;  %v10597_v48 = vld [vmem:[%s14794_s7 + $0x60] sm:$0xff]  }
 0x21b   : > { %v2746_v21 = vrot.slane %v2730_v17, %v11278_v25  ;;  %v2277_v27 = vrot.slane %v2225_v39, %v11351_v59  ;;  %v2321_v51 = vsel %vm11468_vm7, %v11437_v56, %v2265_v8  ;;  %v2229_v55 = vpack.i.b16 %v2117_v26, %v2117_v26 }
 0x21c   : > { %v2779_v28 = vcombine.low %v2319_v49, %v2320_v24  ;;  %v2322_v6 = vsel %vm11468_vm7, %v2173_v57, %v2269_v9  ;;  %v2323_v29 = vsel %vm11468_vm7, %v11442_v58, %v2273_v50  ;;  %v2281_v32 = vrot.slane %v9297_v42, %v11351_v59  ;;  %v10591_v57 = vld [vmem:[%s14794_s7 + $0x78] sm:$0xff]   ;;  %v10598_v24 = vld [vmem:[%s14794_s7 + $0x20] sm:$0xff]  }
 0x21d   : > { %v1511_v30 = vpop.f32.mrf.mxu0  ;;  %v11521_v13 = vpop.f32.mrf.mxu1  ;;  %v11523_v33 = vcombine.low %v2739_v19, %v2746_v21  ;;  %v2324_v56 = vsel %vm11468_vm7, %v2181_v1, %v2277_v27  ;;  %v2827_v26 = vcombine.low %v2321_v51, %v2322_v6  ;;  %v10592_v58 = vld [vmem:[%s14794_s7 + $0x38] sm:$0xff]   ;;  %v2788_v36 = vrot.slane %v2778_v20, %v11278_v25  ;;  %9835 = vmatprep.subr.bf16.mxu0 %v10591_v57 }
 0x21e   : > { %v1512_v38 = vadd.f32 %v1511_v30, %v11385_v22  ;;  %v2795_v1 = vrot.slane %v2779_v28, %v11278_v25  ;;  %v2828_v37 = vcombine.low %v2323_v29, %v2324_v56  ;;  %v2193_v60 = vrot.slane %v9290_v41, %v11351_v59  ;;  %9836 = vmatpush3.bf16.msra.mxu0 %v10592_v58  ;;  %v10594_v41 = vld [vmem:[%s14794_s7 + $0x30] sm:$0xff]   ;;  %v10599_v27 = vld [vmem:[%s14794_s7 + $0x58] sm:$0xff]  }
 0x21f   : > { %v10105_v39 = vpop.f32.mrf.mxu0  ;;  %v10125_v42 = vpop.f32.mrf.mxu1  ;;  %v2197_v61 = vrot.slane %v11417_v46, %v11351_v59  ;;  %v2285_v62 = vrot.slane %v11472_v52, %v11351_v59  ;;  %v2289_v22 = vrot.slane %v9298_v54, %v11351_v59  ;;  %v1428_v63 = vsel %vm956_vm8, %v11389_v23, 0.0  ;;  %9837 = vmatprep.subr.bf16.mxu0 %v10593_v34  ;;  %v10600_v51 = vld [vmem:[%s14794_s7 + $0x18] sm:$0xff]  }
 0x220   : > { %v11555_v8 = vcombine.low %v2788_v36, %v2795_v1  ;;  %v2844_v9 = vrot.slane %v2828_v37, %v11278_v25  ;;  %v2293_v3 = vrot.slane %v2229_v55, %v11351_v59  ;;  %v2837_v54 = vrot.slane %v2827_v26, %v11278_v25 }
 0x221   : > { %v1514_v46 = vpop.f32.mrf.mxu0  ;;  %v1639_v52 = vpop.f32.mrf.mxu1  ;;  %v2325_v35 = vsel %vm11468_vm7, %v11449_v2, %v2281_v32  ;;  %v2326_v23 = vsel %vm11468_vm7, %v2189_v4, %v2285_v62  ;;  %v2327_v7 = vsel %vm11468_vm7, %v2193_v60, %v2289_v22  ;;  %v1518_v11 = vadd.f32 %v11252_v0, %v1512_v38 }
 0x222   : > { %v1515_v12 = vadd.f32 %v1514_v46, %v1428_v63  ;;  %v11577_v2 = vcombine.low %v2837_v54, %v2844_v9  ;;  %v2328_v40 = vsel %vm11468_vm7, %v2197_v61, %v2293_v3  ;;  %v2876_v16 = vcombine.low %v2325_v35, %v2326_v23  ;;  %9838 = vmatpush3.bf16.msra.mxu0 %v10594_v41 }
 0x223   : > { %v10106_v14 = vpop.f32.mrf.mxu0  ;;  %v10126_v15 = vpop.f32.mrf.mxu1  ;;  %v2877_v17 = vcombine.low %v2327_v7, %v2328_v40  ;;  %9839 = vmatprep.subr.bf16.mxu0 %v10595_v10  ;;  %v1980_v18 = vmax.f32 %v1518_v11, 0.0  ;;  %v1644_v36 = vrot.slane %v1639_v52, 1  ;;  %v1643_v37 = vrot.slane %v11521_v13, 1 }
 0x224   : > { %v1519_v4 = vadd.f32 %v11252_v0, %v1515_v12  ;;  %v2886_v49 = vrot.slane %v2876_v16, %v11278_v25  ;;  %v2769_v46 = vrot.slane %v11523_v33, %v11278_v25  ;;  %v2818_v23 = vrot.slane %v11555_v8, %v11278_v25 }
 0x225   : > { %v2893_v20 = vrot.slane %v2877_v17, %v11278_v25  ;;  %v1645_v22 = vsel %vm1195_vm1, %v1643_v37, %v1644_v36  ;;  %v1646_v63 = vsel %vm1195_vm1, %v1644_v36, %v1643_v37 }
 0x226   : > { %v1981_v19 = vmax.f32 %v1519_v4, 0.0  ;;  %9840 = vmatpush3.bf16.msra.mxu0 %v10596_v47  ;;  %v1647_v54 = vsel %vm11311_vm2, %v1645_v22, 0.0  ;;  %v1648_v35 = vsel %vm11334_vm3, %v1646_v63, 0.0 }
 0x227   : > { %v11590_v21 = vcombine.low %v2886_v49, %v2893_v20  ;;  %9841 = vmatprep.subr.bf16.mxu0 %v10597_v48 }
 0x228   : > { %v1982_v50 = vpack.c.bf16 %v1981_v19, %v1980_v18  ;;  %v9299_v57 = vpack.c.bf16 %v1981_v19, %v1981_v19 }
 0x22a   : > { %9842 = vmatpush3.bf16.msra.mxu0 %v10598_v24  ;;  %v2337_v58 = vrot.slane %v1982_v50, %v11278_v25  ;;  %v2344_v34 = vrot.slane %v9299_v57, %v11278_v25 }
 0x22b   : > { %9843 = vmatprep.subr.bf16.mxu0 %v10599_v27 }
 0x22c   : > { %v2345_v38 = vcombine.high %v2337_v58, %v2337_v58  ;;  %v2346_v39 = vcombine.high %v2344_v34, %v2344_v34  ;;  %v11605_v42 = vrot.slane %v2337_v58, %v11278_v25  ;;  %v11608_v61 = vrot.slane %v2344_v34, %v11278_v25 }
 0x22e   : > { %9844 = vmatpush3.bf16.msra.mxu0 %v10600_v51  ;;  %v11611_v62 = vrot.slane %v2345_v38, %v11278_v25  ;;  %v11620_v3 = vrot.slane %v2346_v39, %v11278_v25  ;;  %v11627_v52 = vcombine.high %v11605_v42, %v11605_v42  ;;  %v11637_v7 = vcombine.high %v11608_v61, %v11608_v61 }
 0x22f   : > { %v2380_v48 = vunpack.i.h.s16 %v11605_v42  ;;  %v2388_v19 = vunpack.i.h.s16 %v11608_v61  ;;  %v9301_v51 = vpack.i.b16 %v11605_v42, %v11605_v42 }
 0x230   : > { %v2377_v10 = vcombine.high %v11611_v62, %v11611_v62  ;;  %v2378_v47 = vcombine.high %v11620_v3, %v11620_v3  ;;  %v2382_v18 = vunpack.i.h.s16 %v11611_v62  ;;  %v2384_v27 = vunpack.i.h.s16 %v11627_v52 }
 0x231   : > { %v11673_v57 = vpack.i.b16 %v2380_v48, %v2380_v48  ;;  %v9302_v58 = vpack.i.b16 %v11611_v62, %v11611_v62  ;;  %v11685_v42 = vpack.i.b16 %v2388_v19, %v2388_v19 }
 0x232   : > { %v2394_v43 = vunpack.i.h.s16 %v2378_v47  ;;  %v11677_v34 = vpack.i.b16 %v2382_v18, %v2382_v18  ;;  %v11683_v37 = vpack.i.b16 %v2384_v27, %v2384_v27  ;;  %v9304_v39 = vpack.i.b16 %v2377_v10, %v2377_v10 }
 0x23d   : > { %v1731_v55 = vpop.f32.mrf.mxu0  ;;  %v1837_v28 = vpop.f32.mrf.mxu1 }
 0x23e   : > { %v1844_v60 = vrot.slane %v1837_v28, 4  ;;  %v1732_v40 = vadd.f32 %v1731_v55, %v1647_v54 }
 0x23f   : > { %v10145_v6 = vpop.f32.mrf.mxu0  ;;  %v10165_v29 = vpop.f32.mrf.mxu1 }
 0x240   : > { %v2386_v6 = vunpack.i.h.s16 %v2377_v10  ;;  %v9305_v29 = vpack.i.b16 %v11608_v61, %v11608_v61  ;;  %v9306_v61 = vpack.i.b16 %v11620_v3, %v11620_v3  ;;  %v2484_v10 = vrot.slane %v11673_v57, %v11351_v59 }
 0x241   : > { %v1734_v30 = vpop.f32.mrf.mxu0  ;;  %v1840_v56 = vpop.f32.mrf.mxu1 }
 0x242   : > { %v1845_v1 = vrot.slane %v1840_v56, 4  ;;  %v1735_v16 = vadd.f32 %v1734_v30, %v1648_v35 }
 0x243   : > { %v10146_v26 = vpop.f32.mrf.mxu0  ;;  %v10166_v32 = vpop.f32.mrf.mxu1 }
 0x244   : > { %v1847_v13 = vsel %vm1420_vm4, %v1845_v1, %v1844_v60  ;;  %v1846_v11 = vsel %vm1420_vm4, %v1844_v60, %v1845_v1  ;;  %v2390_v26 = vunpack.i.h.s16 %v11620_v3  ;;  %v2392_v32 = vunpack.i.h.s16 %v11637_v7 }
 0x245   : > { %v1849_v12 = vsel %vm956_vm8, %v1847_v13, 0.0  ;;  %v1850_v20 = vadd.f32 %v1846_v11, %v1732_v40  ;;  %v9303_v1 = vpack.i.b16 %v11627_v52, %v11627_v52  ;;  %v11687_v60 = vpack.i.b16 %v2386_v6, %v2386_v6 }
 0x246   : > { %v1851_v53 = vadd.f32 %v1849_v12, %v1735_v16  ;;  %v11691_v63 = vpack.i.b16 %v2390_v26, %v2390_v26  ;;  %v9308_v13 = vpack.i.b16 %v2378_v47, %v2378_v47  ;;  %v2480_v52 = vrot.slane %v9301_v51, %v11351_v59 }
 0x247   : > { %v2488_v3 = vrot.slane %v9302_v58, %v11351_v59  ;;  %v2492_v11 = vrot.slane %v11677_v34, %v11351_v59  ;;  %v11706_v12 = vrot.slane %v9305_v29, %v11351_v59  ;;  %v2496_v40 = vrot.slane %v9303_v1, %v11351_v59 }
 0x248   : > { %v2500_v16 = vrot.slane %v11683_v37, %v11351_v59  ;;  %v11719_v47 = vrot.slane %v9306_v61, %v11351_v59 }
 0x25d   : > { %v1950_v9 = vpop.f32.mrf.mxu0 }
 0x25e   : > { %v1959_v4 = vrot.slane %v1950_v9, 5  ;;  %v11695_v9 = vpack.i.b16 %v2392_v32, %v2392_v32 }
 0x25f   : > { %v10185_v41 = vpop.f32.mrf.mxu0 }
 0x260   : > { %v11697_v41 = vpack.i.b16 %v2394_v43, %v2394_v43 }
 0x261   : > { %v1953_v14 = vpop.f32.mrf.mxu0 }
 0x262   : > { %v1960_v17 = vrot.slane %v1953_v14, 5 }
 0x263   : > { %v10186_v49 = vpop.f32.mrf.mxu0 }
 0x264   : > { %v1962_v50 = vsel %vm1961_vm9, %v1959_v4, %v1960_v17  ;;  %v1963_v24 = vsel %vm1961_vm9, %v1960_v17, %v1959_v4  ;;  %v2504_v4 = vrot.slane %v9304_v39, %v11351_v59  ;;  %v2508_v17 = vrot.slane %v11687_v60, %v11351_v59 }
 0x265   : > { %v1968_v55 = vsel %vm11311_vm2, %v1962_v50, 0.0  ;;  %v1969_v28 = vsel %vm11649_vm10, %v1963_v24, 0.0  ;;  %v2532_v50 = vrot.slane %v11695_v9, %v11351_v59  ;;  %v11731_v24 = vrot.slane %v9308_v13, %v11351_v59 }
 0x266   : > { %v1970_v30 = vadd.f32 %v1968_v55, %v1850_v20  ;;  %v1971_v56 = vadd.f32 %v1969_v28, %v1851_v53  ;;  %v2524_v20 = vrot.slane %v11691_v63, %v11351_v59 }
 0x268   : > { %v1972_v38 = vadd.f32 %v11252_v0, %v1970_v30  ;;  %v1973_v36 = vadd.f32 %v11252_v0, %v1971_v56  ;;  %v9307_v0 = vpack.i.b16 %v11637_v7, %v11637_v7  ;;  %v2516_v7 = vrot.slane %v11685_v42, %v11351_v59 }
 0x26a   : > { %v1983_v62 = vmax.f32 %v1972_v38, 0.0  ;;  %v1984_v22 = vmax.f32 %v1973_v36, 0.0  ;;  %v11726_v53 = vrot.slane %v9307_v0, %v11351_v59 }
 0x26c   : > { %v1985_v54 = vpack.c.bf16 %v1984_v22, %v1983_v62  ;;  %v9300_v35 = vpack.c.bf16 %v1984_v22, %v1984_v22 }
 0x26e   : > { %v2403_v14 = vrot.slane %v1985_v54, %v11278_v25  ;;  %v2410_v15 = vrot.slane %v9300_v35, %v11278_v25 }
 0x270   : > { %v2411_v48 = vcombine.high %v2403_v14, %v2403_v14  ;;  %v2412_v18 = vcombine.high %v2410_v15, %v2410_v15  ;;  %v2419_v19 = vrot.slane %v2403_v14, %v11278_v25  ;;  %v2426_v49 = vrot.slane %v2410_v15, %v11278_v25 }
 0x272   : > { %v2433_v27 = vrot.slane %v2411_v48, %v11278_v25  ;;  %v2440_v51 = vrot.slane %v2412_v18, %v11278_v25  ;;  %v2441_v55 = vcombine.high %v2419_v19, %v2419_v19  ;;  %v11735_v28 = vcombine.high %v2426_v49, %v2426_v49 }
 0x273   : > { %v2446_v6 = vunpack.i.h.s16 %v2419_v19  ;;  %v9309_v29 = vpack.i.b16 %v2419_v19, %v2419_v19  ;;  %v2454_v30 = vunpack.i.h.s16 %v2426_v49  ;;  %v9313_v56 = vpack.i.b16 %v2426_v49, %v2426_v49 }
 0x274   : > { %v2448_v26 = vunpack.i.h.s16 %v2433_v27  ;;  %v9310_v32 = vpack.i.b16 %v2433_v27, %v2433_v27  ;;  %v2443_v57 = vcombine.high %v2433_v27, %v2433_v27  ;;  %v2450_v58 = vunpack.i.h.s16 %v2441_v55 }
 0x275   : > { %v2558_v43 = vpack.i.b16 %v2446_v6, %v2446_v6  ;;  %v2576_v34 = vrot.slane %v9309_v29, %v11351_v59  ;;  %v9311_v38 = vpack.i.b16 %v2441_v55, %v2441_v55  ;;  %v2456_v36 = vunpack.i.h.s16 %v2440_v51 }
 0x276   : > { %v2560_v1 = vpack.i.b16 %v2448_v26, %v2448_v26  ;;  %v2584_v37 = vrot.slane %v9310_v32, %v11351_v59  ;;  %v2452_v39 = vunpack.i.h.s16 %v2443_v57  ;;  %v2562_v60 = vpack.i.b16 %v2450_v58, %v2450_v58 }
 0x277   : > { %v2580_v61 = vrot.slane %v2558_v43, %v11351_v59  ;;  %v2653_v62 = vsel %vm11468_vm7, %v2480_v52, %v2576_v34  ;;  %v9312_v22 = vpack.i.b16 %v2443_v57, %v2443_v57  ;;  %v2592_v63 = vrot.slane %v9311_v38, %v11351_v59 }
 0x278   : > { %v2588_v0 = vrot.slane %v2560_v1, %v11351_v59  ;;  %v2655_v13 = vsel %vm11468_vm7, %v2488_v3, %v2584_v37  ;;  %v2564_v54 = vpack.i.b16 %v2452_v39, %v2452_v39  ;;  %v2596_v35 = vrot.slane %v2562_v60, %v11351_v59 }
 0x279   : > { %v2654_v14 = vsel %vm11468_vm7, %v2484_v10, %v2580_v61  ;;  %v2600_v15 = vrot.slane %v9312_v22, %v11351_v59  ;;  %v2657_v48 = vsel %vm11468_vm7, %v2496_v40, %v2592_v63  ;;  %v2566_v52 = vpack.i.b16 %v2454_v30, %v2454_v30 }
 0x27a   : > { %v2656_v18 = vsel %vm11468_vm7, %v2492_v11, %v2588_v0  ;;  %v2731_v19 = vcombine.low %v2653_v62, %v2654_v14  ;;  %v2604_v49 = vrot.slane %v2564_v54, %v11351_v59  ;;  %v2658_v3 = vsel %vm11468_vm7, %v2500_v16, %v2596_v35 }
 0x27b   : > { %v2732_v27 = vcombine.low %v2655_v13, %v2656_v18  ;;  %v2659_v55 = vsel %vm11468_vm7, %v2504_v4, %v2600_v15  ;;  %v2780_v10 = vcombine.low %v2657_v48, %v2658_v3  ;;  %v9314_v6 = vpack.i.b16 %v2440_v51, %v2440_v51 }
 0x27c   : > { %v2753_v29 = vrot.slane %v2731_v19, %v11278_v25  ;;  %v2660_v40 = vsel %vm11468_vm7, %v2508_v17, %v2604_v49  ;;  %v2568_v30 = vpack.i.b16 %v2456_v36, %v2456_v36  ;;  %v2608_v11 = vrot.slane %v9313_v56, %v11351_v59 }
 0x27d   : > { %v2760_v26 = vrot.slane %v2732_v27, %v11278_v25  ;;  %v2781_v32 = vcombine.low %v2659_v55, %v2660_v40  ;;  %v2802_v57 = vrot.slane %v2780_v10, %v11278_v25  ;;  %v2612_v16 = vrot.slane %v2566_v52, %v11351_v59  ;;  %v10602_v55 = vld [vmem:[%s14794_s7 + $0x10] sm:$0xff]   ;;  %v10604_v10 = vld [vmem:[%s14794_s7 + $0x8] sm:$0xff]   ;;  %v10608_v40 = vld [vmem:[%s14796_s9 + $0xf8] sm:$0xff]  }
 0x27e   : > { %v2616_v58 = vrot.slane %v9314_v6, %v11351_v59  ;;  %v2620_v4 = vrot.slane %v2568_v30, %v11351_v59  ;;  %v2661_v43 = vsel %vm11468_vm7, %v11706_v12, %v2608_v11  ;;  %v2444_v34 = vcombine.high %v2440_v51, %v2440_v51  ;;  %v10606_v6 = vld [vmem:[%s14794_s7] sm:$0xff]   ;;  %v10609_v30 = vld [vmem:[%s14796_s9 + $0x130] sm:$0xff]   ;;  %v10611_v11 = vld [vmem:[%s14796_s9 + $0x128] sm:$0xff]  }
 0x27f   : > { %v2762_v17 = vcombine.low %v2753_v29, %v2760_v26  ;;  %v2809_v38 = vrot.slane %v2781_v32, %v11278_v25  ;;  %v2662_v56 = vsel %vm11468_vm7, %v2516_v7, %v2612_v16  ;;  %v2458_v36 = vunpack.i.h.s16 %v11735_v28  ;;  %v10607_v29 = vld [vmem:[%s14796_s9 + $0x138] sm:$0xff]   ;;  %v2685_v32 = vld [vmem:[%s14793_s6] sm:$0x3] }
 0x280   : > { %v2663_v1 = vsel %vm11468_vm7, %v11719_v47, %v2616_v58  ;;  %v2664_v37 = vsel %vm11468_vm7, %v2524_v20, %v2620_v4  ;;  %v2829_v12 = vcombine.low %v2661_v43, %v2662_v56  ;;  %v2460_v51 = vunpack.i.h.s16 %v2444_v34  ;;  %10187 = vmatprep.subr.bf16.mxu1 %v10607_v29 }
 0x281   : > { %v2776_v39 = vrot.slane %v2762_v17, %v11278_v25  ;;  %v2811_v60 = vcombine.low %v2802_v57, %v2809_v38  ;;  %v2830_v61 = vcombine.low %v2663_v1, %v2664_v37  ;;  %v9315_v42 = vpack.i.b16 %v11735_v28, %v11735_v28 }
 0x282   : > { %v2851_v7 = vrot.slane %v2829_v12, %v11278_v25  ;;  %v2570_v62 = vpack.i.b16 %v2458_v36, %v2458_v36  ;;  %v9316_v22 = vpack.i.b16 %v2444_v34, %v2444_v34  ;;  %v2572_v63 = vpack.i.b16 %v2460_v51, %v2460_v51 }
 0x283   : > { %v2777_v47 = vcombine.low %v2769_v46, %v2776_v39  ;;  %v2825_v20 = vrot.slane %v2811_v60, %v11278_v25  ;;  %v2858_v0 = vrot.slane %v2830_v61, %v11278_v25  ;;  %v2624_v13 = vrot.slane %v9315_v42, %v11351_v59 }
 0x284   : > { %v2540_v54 = vrot.slane %v11697_v41, %v11351_v59  ;;  %v2628_v28 = vrot.slane %v2570_v62, %v11351_v59  ;;  %v2632_v35 = vrot.slane %v9316_v22, %v11351_v59  ;;  %v2636_v14 = vrot.slane %v2572_v63, %v11351_v59  ;;  %v10610_v62 = vld [vmem:[%s14796_s9 + $0xf0] sm:$0xff]  }
 0x285   : > { %3042 = vmatmul.mubr.bf16.vlgmr.msra.gmra.mxu1 %v2777_v47  ;;  %v2826_v33 = vcombine.low %v2818_v23, %v2825_v20  ;;  %v2860_v46 = vcombine.low %v2851_v7, %v2858_v0  ;;  %v2665_v15 = vsel %vm11468_vm7, %v11726_v53, %v2624_v13  ;;  %v2867_v23 = vrot.slane %v11577_v2, %v11278_v25  ;;  %v10601_v2 = vld [vmem:[%s14794_s7 + $0x50] sm:$0xff]  }
 0x286   : > { %3051 = vmatprep.mubr.bf16.mxu1 %v10699_v44  ;;  %v2666_v41 = vsel %vm11468_vm7, %v2532_v50, %v2628_v28  ;;  %v2667_v48 = vsel %vm11468_vm7, %v11731_v24, %v2632_v35  ;;  %v2668_v8 = vsel %vm11468_vm7, %v2540_v54, %v2636_v14  ;;  %v2916_v24 = vrot.slane %v11590_v21, %v11278_v25  ;;  %v10603_v21 = vld [vmem:[%s14794_s7 + $0x48] sm:$0xff]  }
 0x287   : > { %v2874_v53 = vrot.slane %v2860_v46, %v11278_v25  ;;  %v2878_v52 = vcombine.low %v2665_v15, %v2666_v41  ;;  %v2879_v18 = vcombine.low %v2667_v48, %v2668_v8  ;;  %9845 = vmatprep.subr.bf16.mxu0 %v10601_v2  ;;  %10188 = vmatpush3.bf16.msra.mxu1 %v10607_v29  ;;  %v2693_v26 = vsub.s32 1, %v11254_v5  ;;  %v10612_v28 = vld [vmem:[%s14796_s9 + $0xe8] sm:$0xff]  }
 0x288   : > { %9846 = vmatpush3.bf16.msra.mxu0 %v10602_v55  ;;  %10189 = vmatprep.subr.bf16.mxu1 %v10609_v30  ;;  %v2690_v58 = vrot.slane %v2685_v32, %v11351_v59 }
 0x289   : > { %v2875_v19 = vcombine.low %v2867_v23, %v2874_v53  ;;  %v2900_v9 = vrot.slane %v2878_v52, %v11278_v25  ;;  %v2907_v49 = vrot.slane %v2879_v18, %v11278_v25  ;;  %9847 = vmatprep.subr.bf16.mxu0 %v10603_v21  ;;  %v11859_v16 = vrot.slane %v2685_v32, %v2693_v26 }
 0x28b   : > { %v2909_v50 = vcombine.low %v2900_v9, %v2907_v49  ;;  %10190 = vmatpush3.bf16.msra.mxu1 %v10609_v30 }
 0x28c   : > { %9848 = vmatpush3.bf16.msra.mxu0 %v10604_v10  ;;  %10191 = vmatprep.subr.bf16.mxu1 %v10611_v11 }
 0x28d   : > { %3052 = vmatmul.mubr.bf16.gmra.mxu1 %v2826_v33  ;;  %v2923_v3 = vrot.slane %v2909_v50, %v11278_v25 }
 0x28e   : > { %3061 = vmatprep.mubr.bf16.mxu1 %v10699_v44 }
 0x28f   : > { %v2924_v27 = vcombine.low %v2916_v24, %v2923_v3  ;;  %10192 = vmatpush3.bf16.msra.mxu1 %v10611_v11 }
 0x295   : > { %3062 = vmatmul.mubr.bf16.gmra.mxu1 %v2875_v19 }
 0x296   : > { %3071 = vmatprep.mubr.bf16.mxu1 %v10699_v44  ;;  %v10605_v44 = vld [vmem:[%s14794_s7 + $0x40] sm:$0xff]  }
 0x297   : > { %9849 = vmatprep.subr.bf16.mxu0 %v10605_v44 }
 0x298   : > { %9850 = vmatpush3.bf16.msra.mxu0 %v10606_v6 }
 0x299   : > { %10211 = vmatprep.subr.bf16.mxu0 %v10608_v40 }
 0x29d   : > { %3072 = vmatmul.mubr.bf16.gmra.mxu1 %v2924_v27 }
 0x345   : > { %v3043_v57 = vpop.f32.mrf.mxu1 }
 0x346   : > { %v3044_v38 = vadd.f32 %v3043_v57, %v2690_v58 }
 0x347   : > { %v3045_v4 = vpop.f32.mrf.mxu1 }
 0x348   : > { %v3046_v34 = vadd.f32 %v3045_v4, %v11859_v16  ;;  %v3082_v39 = vmax.f32 %v3044_v38, 0.0  ;;  %v10613_v4 = vld [vmem:[%s14796_s9 + $0x120] sm:$0xff]   ;;  %v10619_v38 = vld [vmem:[%s14796_s9 + $0x108] sm:$0xff]  }
 0x349   : > { %v3047_v43 = vpop.f32.mrf.mxu1  ;;  %10193 = vmatprep.subr.bf16.mxu1 %v10613_v4 }
 0x34a   : > { %v3048_v17 = vadd.f32 %v3047_v43, %v2690_v58  ;;  %v3083_v12 = vmax.f32 %v3046_v34, 0.0  ;;  %10194 = vmatpush3.bf16.msra.mxu1 %v10613_v4  ;;  %v10616_v43 = vld [vmem:[%s14796_s9 + $0xd8] sm:$0xff]   ;;  %v10617_v34 = vld [vmem:[%s14796_s9 + $0x110] sm:$0xff]  }
 0x34b   : > { %v3049_v56 = vpop.f32.mrf.mxu1 }
 0x34c   : > { %v3050_v36 = vadd.f32 %v3049_v56, %v11859_v16  ;;  %v3084_v1 = vmax.f32 %v3048_v17, 0.0  ;;  %v10618_v17 = vld [vmem:[%s14796_s9 + $0xd0] sm:$0xff]   ;;  %v10620_v56 = vld [vmem:[%s14796_s9 + $0xc8] sm:$0xff]  }
 0x34d   : > { %v3053_v37 = vpop.f32.mrf.mxu1 }
 0x34e   : > { %v3085_v51 = vmax.f32 %v3050_v36, 0.0  ;;  %v3098_v42 = vpack.c.bf16 %v3084_v1, %v3082_v39  ;;  %v3054_v47 = vadd.f32 %v3053_v37, %v2690_v58  ;;  %v10621_v36 = vld [vmem:[%s14796_s9 + $0x100] sm:$0xff]   ;;  %v10623_v37 = vld [vmem:[%s14796_s9 + $0x178] sm:$0xff]  }
 0x34f   : > { %v3055_v60 = vpop.f32.mrf.mxu1  ;;  %v10622_v1 = vld [vmem:[%s14796_s9 + $0xc0] sm:$0xff]  }
 0x350   : > { %v3099_v61 = vpack.c.bf16 %v3085_v51, %v3083_v12  ;;  %v3056_v22 = vadd.f32 %v3055_v60, %v11859_v16  ;;  %v3086_v33 = vmax.f32 %v3054_v47, 0.0  ;;  %v10624_v12 = vld [vmem:[%s14796_s9 + $0x78] sm:$0xff]  }
 0x351   : > { %v3057_v7 = vpop.f32.mrf.mxu1 }
 0x352   : > { %v3058_v63 = vadd.f32 %v3057_v7, %v2690_v58  ;;  %3273 = vmatprep.mubr.bf16.mxu0 %v3099_v61  ;;  %v3087_v35 = vmax.f32 %v3056_v22, 0.0  ;;  %v9333_v61 = vld [vmem:[%s14795_s8] ss:$0 sm:$0xff] }
 0x353   : > { %v3059_v20 = vpop.f32.mrf.mxu1  ;;  %3274 = vmatmul.mubr.bf16.vlgmr.msra.gmra.mxu0 %v3098_v42 }
 0x354   : > { %v3060_v0 = vadd.f32 %v3059_v20, %v11859_v16  ;;  %10212 = vmatpush3.bf16.msra.mxu0 %v10608_v40  ;;  %v3088_v13 = vmax.f32 %v3058_v63, 0.0 }
 0x355   : > { %v3063_v54 = vpop.f32.mrf.mxu1  ;;  %10213 = vmatprep.subr.bf16.mxu0 %v10610_v62 }
 0x356   : > { %v3089_v14 = vmax.f32 %v3060_v0, 0.0  ;;  %v3100_v41 = vpack.c.bf16 %v3088_v13, %v3086_v33  ;;  %v3064_v53 = vadd.f32 %v3063_v54, %v2690_v58 }
 0x357   : > { %v3065_v46 = vpop.f32.mrf.mxu1 }
 0x358   : > { %v3101_v15 = vpack.c.bf16 %v3089_v14, %v3087_v35  ;;  %10214 = vmatpush3.bf16.msra.mxu0 %v10610_v62  ;;  %v3066_v8 = vadd.f32 %v3065_v46, %v11859_v16  ;;  %v3090_v24 = vmax.f32 %v3064_v53, 0.0 }
 0x359   : > { %v3067_v48 = vpop.f32.mrf.mxu1  ;;  %10215 = vmatprep.subr.bf16.mxu0 %v10612_v28 }
 0x35a   : > { %v3068_v23 = vadd.f32 %v3067_v48, %v2690_v58  ;;  %3281 = vmatprep.mubr.bf16.mxu0 %v3101_v15  ;;  %v3091_v49 = vmax.f32 %v3066_v8, 0.0 }
 0x35b   : > { %v3069_v52 = vpop.f32.mrf.mxu1  ;;  %3282 = vmatmul.mubr.bf16.gmra.mxu0 %v3100_v41 }
 0x35c   : > { %v3070_v18 = vadd.f32 %v3069_v52, %v11859_v16  ;;  %10216 = vmatpush3.bf16.msra.mxu0 %v10612_v28  ;;  %v3092_v19 = vmax.f32 %v3068_v23, 0.0 }
 0x35d   : > { %v3073_v9 = vpop.f32.mrf.mxu1 }
 0x35e   : > { %v3093_v50 = vmax.f32 %v3070_v18, 0.0  ;;  %v3102_v2 = vpack.c.bf16 %v3092_v19, %v3090_v24  ;;  %v3074_v44 = vadd.f32 %v3073_v9, %v2690_v58  ;;  %v10625_v19 = vld [vmem:[%s14796_s9 + $0x170] sm:$0xff]  }
 0x35f   : > { %v3075_v3 = vpop.f32.mrf.mxu1  ;;  %v10626_v9 = vld [vmem:[%s14796_s9 + $0x70] sm:$0xff]  }
 0x360   : > { %v3103_v27 = vpack.c.bf16 %v3093_v50, %v3091_v49  ;;  %v3076_v21 = vadd.f32 %v3075_v3, %v11859_v16  ;;  %v3094_v26 = vmax.f32 %v3074_v44, 0.0 }
 0x361   : > { %v3077_v55 = vpop.f32.mrf.mxu1 }
 0x362   : > { %v3078_v10 = vadd.f32 %v3077_v55, %v2690_v58  ;;  %3289 = vmatprep.mubr.bf16.mxu0 %v3103_v27  ;;  %v3095_v30 = vmax.f32 %v3076_v21, 0.0  ;;  %v10614_v58 = vld [vmem:[%s14796_s9 + $0xe0] sm:$0xff]   ;;  %v10628_v55 = vld [vmem:[%s14796_s9 + $0x68] sm:$0xff]  }
 0x363   : > { %v3079_v6 = vpop.f32.mrf.mxu1  ;;  %3290 = vmatmul.mubr.bf16.gmra.mxu0 %v3102_v2  ;;  %10217 = vmatprep.subr.bf16.mxu0 %v10614_v58  ;;  %v10627_v2 = vld [vmem:[%s14796_s9 + $0x168] sm:$0xff]  }
 0x364   : > { %v3080_v29 = vadd.f32 %v3079_v6, %v11859_v16  ;;  %v3096_v40 = vmax.f32 %v3078_v10, 0.0  ;;  %10218 = vmatpush3.bf16.msra.mxu0 %v10614_v58  ;;  %v10615_v16 = vld [vmem:[%s14796_s9 + $0x118] sm:$0xff]  }
 0x365   : > { %10195 = vmatprep.subr.bf16.mxu1 %v10615_v16  ;;  %10219 = vmatprep.subr.bf16.mxu0 %v10616_v43  ;;  %v10631_v58 = vld [vmem:[%s14796_s9 + $0x158] sm:$0xff]  }
 0x366   : > { %v3097_v11 = vmax.f32 %v3080_v29, 0.0  ;;  %v3104_v57 = vpack.c.bf16 %v3096_v40, %v3094_v26  ;;  %10196 = vmatpush3.bf16.msra.mxu1 %v10615_v16  ;;  %v10632_v16 = vld [vmem:[%s14796_s9 + $0x58] sm:$0xff]  }
 0x367   : > { %10197 = vmatprep.subr.bf16.mxu1 %v10617_v34 }
 0x368   : > { %v3105_v32 = vpack.c.bf16 %v3097_v11, %v3095_v30  ;;  %10220 = vmatpush3.bf16.msra.mxu0 %v10616_v43  ;;  %v10629_v30 = vld [vmem:[%s14796_s9 + $0x160] sm:$0xff]  }
 0x369   : > { %10221 = vmatprep.subr.bf16.mxu0 %v10618_v17  ;;  %v10630_v11 = vld [vmem:[%s14796_s9 + $0x60] sm:$0xff]  }
 0x36a   : > { %3297 = vmatprep.mubr.bf16.mxu0 %v3105_v32  ;;  %10198 = vmatpush3.bf16.msra.mxu1 %v10617_v34 }
 0x36b   : > { %3298 = vmatmul.mubr.bf16.gmra.mxu0 %v3104_v57  ;;  %10199 = vmatprep.subr.bf16.mxu1 %v10619_v38 }
 0x36c   : > { %10222 = vmatpush3.bf16.msra.mxu0 %v10618_v17 }
 0x36d   : > { %10223 = vmatprep.subr.bf16.mxu0 %v10620_v56 }
 0x36e   : > { %10200 = vmatpush3.bf16.msra.mxu1 %v10619_v38  ;;  %v10633_v38 = vld [vmem:[%s14796_s9 + $0x150] sm:$0xff]  }
 0x36f   : > { %10201 = vmatprep.subr.bf16.mxu1 %v10621_v36 }
 0x370   : > { %10224 = vmatpush3.bf16.msra.mxu0 %v10620_v56  ;;  %v10634_v56 = vld [vmem:[%s14796_s9 + $0x50] sm:$0xff]  }
 0x371   : > { %10225 = vmatprep.subr.bf16.mxu0 %v10622_v1 }
 0x372   : > { %10202 = vmatpush3.bf16.msra.mxu1 %v10621_v36  ;;  %v10635_v36 = vld [vmem:[%s14796_s9 + $0x148] sm:$0xff]  }
 0x373   : > { %10235 = vmatprep.subr.bf16.mxu1 %v10623_v37 }
 0x374   : > { %10226 = vmatpush3.bf16.msra.mxu0 %v10622_v1  ;;  %v10636_v1 = vld [vmem:[%s14796_s9 + $0x48] sm:$0xff]  }
 0x375   : > { %10259 = vmatprep.subr.bf16.mxu0 %v10624_v12 }
 0x413   : > { %v9851_v51 = vpop.f32.mrf.mxu0 }
 0x415   : > { %v9852_v39 = vpop.f32.mrf.mxu0 }
 0x416   : > { %v9853_v60 = vadd.f32 %v9852_v39, %v9851_v51  ;;  %v10639_v51 = vld [vmem:[%s14796_s9 + $0x1f8] sm:$0xff]  }
 0x417   : > { %v9854_v42 = vpop.f32.mrf.mxu0  ;;  %v10640_v39 = vld [vmem:[%s14796_s9 + $0x1b8] sm:$0xff]  }
 0x418   : > { %v3276_v62 = vadd.f32 %v9853_v60, %v9333_v61  ;;  %v10641_v60 = vld [vmem:[%s14796_s9 + $0x1f0] sm:$0xff]  }
 0x419   : > { %v9855_v7 = vpop.f32.mrf.mxu0 }
 0x41a   : > { %v9856_v22 = vadd.f32 %v9855_v7, %v9854_v42  ;;  %v3306_v0 = vmax.f32 %v3276_v62, 0.0  ;;  %v10643_v42 = vld [vmem:[%s14796_s9 + $0x1e8] sm:$0xff]   ;;  %v10645_v62 = vld [vmem:[%s14796_s9 + $0x1e0] sm:$0xff]  }
 0x41b   : > { %v9857_v63 = vpop.f32.mrf.mxu0  ;;  %v10644_v7 = vld [vmem:[%s14796_s9 + $0x1a8] sm:$0xff]  }
 0x41c   : > { %v3279_v47 = vadd.f32 %v9856_v22, %v9333_v61  ;;  %v10646_v22 = vld [vmem:[%s14796_s9 + $0x1a0] sm:$0xff]  }
 0x41d   : > { %v9858_v20 = vpop.f32.mrf.mxu0 }
 0x41e   : > { %v3307_v13 = vmax.f32 %v3279_v47, 0.0  ;;  %v9859_v54 = vadd.f32 %v9858_v20, %v9857_v63  ;;  %v10647_v63 = vld [vmem:[%s14796_s9 + $0x1d8] sm:$0xff]   ;;  %v10649_v20 = vld [vmem:[%s14796_s9 + $0x1d0] sm:$0xff]  }
 0x41f   : > { %v9860_v28 = vpop.f32.mrf.mxu0  ;;  %v10648_v47 = vld [vmem:[%s14796_s9 + $0x198] sm:$0xff]  }
 0x420   : > { %v11915_v35 = vpack.c.bf16 %v3307_v13, %v3306_v0  ;;  %v3284_v33 = vadd.f32 %v9859_v54, %v9333_v61  ;;  %v10650_v0 = vld [vmem:[%s14796_s9 + $0x190] sm:$0xff]   ;;  %v10651_v13 = vld [vmem:[%s14796_s9 + $0x1c8] sm:$0xff]  }
 0x421   : > { %v9861_v14 = vpop.f32.mrf.mxu0  ;;  %v10652_v54 = vld [vmem:[%s14796_s9 + $0x188] sm:$0xff]  }
 0x422   : > { %v9862_v46 = vadd.f32 %v9861_v14, %v9860_v28  ;;  %10203 = vmatprep.mubr.bf16.mxu1 %v11915_v35  ;;  %10227 = vmatprep.mubr.bf16.mxu0 %v11915_v35  ;;  %v3308_v8 = vmax.f32 %v3284_v33, 0.0  ;;  %v10653_v28 = vld [vmem:[%s14796_s9 + $0x1c0] sm:$0xff]   ;;  %v10655_v33 = vld [vmem:[%s14796_s9 + $0x238] sm:$0xff]  }
 0x423   : > { %v9863_v15 = vpop.f32.mrf.mxu0  ;;  %v10654_v14 = vld [vmem:[%s14796_s9 + $0x180] sm:$0xff]  }
 0x424   : > { %v3287_v41 = vadd.f32 %v9862_v46, %v9333_v61  ;;  %v10656_v46 = vld [vmem:[%s14796_s9 + $0xb8] sm:$0xff]  }
 0x425   : > { %v9864_v48 = vpop.f32.mrf.mxu0 }
 0x426   : > { %v3309_v23 = vmax.f32 %v3287_v41, 0.0  ;;  %v9865_v53 = vadd.f32 %v9864_v48, %v9863_v15  ;;  %v10657_v15 = vld [vmem:[%s14796_s9 + $0x230] sm:$0xff]   ;;  %v10659_v48 = vld [vmem:[%s14796_s9 + $0x228] sm:$0xff]  }
 0x427   : > { %v9866_v52 = vpop.f32.mrf.mxu0  ;;  %v10658_v41 = vld [vmem:[%s14796_s9 + $0xb0] sm:$0xff]  }
 0x428   : > { %v11919_v18 = vpack.c.bf16 %v3309_v23, %v3308_v8  ;;  %v3292_v50 = vadd.f32 %v9865_v53, %v9333_v61  ;;  %v10660_v8 = vld [vmem:[%s14796_s9 + $0xa8] sm:$0xff]   ;;  %v10661_v23 = vld [vmem:[%s14796_s9 + $0x220] sm:$0xff]  }
 0x429   : > { %v9867_v49 = vpop.f32.mrf.mxu0  ;;  %v10662_v53 = vld [vmem:[%s14796_s9 + $0xa0] sm:$0xff]  }
 0x42a   : > { %v9868_v24 = vadd.f32 %v9867_v49, %v9866_v52  ;;  %10204 = vmatmul.mubr.bf16.vlgmr.msra.gmra.mxu1 %v11919_v18  ;;  %10228 = vmatmul.mubr.bf16.vlgmr.msra.gmra.mxu0 %v11919_v18  ;;  %v3310_v10 = vmax.f32 %v3292_v50, 0.0  ;;  %v10663_v52 = vld [vmem:[%s14796_s9 + $0x218] sm:$0xff]   ;;  %v10666_v49 = vld [vmem:[%s14796_s9 + $0x90] sm:$0xff]   ;;  %v10667_v50 = vld [vmem:[%s14796_s9 + $0x208] sm:$0xff]  }
 0x42b   : > { %10236 = vmatpush3.bf16.msra.mxu1 %v10623_v37  ;;  %10260 = vmatpush3.bf16.msra.mxu0 %v10624_v12  ;;  %v9869_v3 = vpop.f32.mrf.mxu0  ;;  %v10637_v37 = vld [vmem:[%s14796_s9 + $0x140] sm:$0xff]  }
 0x42c   : > { %v3295_v27 = vadd.f32 %v9868_v24, %v9333_v61  ;;  %10237 = vmatprep.subr.bf16.mxu1 %v10625_v19  ;;  %10261 = vmatprep.subr.bf16.mxu0 %v10626_v9  ;;  %v10638_v12 = vld [vmem:[%s14796_s9 + $0x40] sm:$0xff]   ;;  %v10668_v24 = vld [vmem:[%s14796_s9 + $0x88] sm:$0xff]  }
 0x42d   : > { %v9870_v21 = vpop.f32.mrf.mxu0 }
 0x42e   : > { %v3311_v44 = vmax.f32 %v3295_v27, 0.0  ;;  %v9871_v6 = vadd.f32 %v9870_v21, %v9869_v3  ;;  %v10669_v3 = vld [vmem:[%s14796_s9 + $0x200] sm:$0xff]   ;;  %v10673_v21 = vld [vmem:[%s14796_s9 + $0x28] sm:$0xff]  }
 0x42f   : > { %10238 = vmatpush3.bf16.msra.mxu1 %v10625_v19  ;;  %10262 = vmatpush3.bf16.msra.mxu0 %v10626_v9  ;;  %v9872_v29 = vpop.f32.mrf.mxu0  ;;  %v10664_v19 = vld [vmem:[%s14796_s9 + $0x98] sm:$0xff]   ;;  %v10665_v9 = vld [vmem:[%s14796_s9 + $0x210] sm:$0xff]   ;;  %v10670_v27 = vld [vmem:[%s14796_s9 + $0x80] sm:$0xff]  }
 0x430   : > { %v11935_v40 = vpack.c.bf16 %v3311_v44, %v3310_v10  ;;  %10239 = vmatprep.subr.bf16.mxu1 %v10627_v2  ;;  %10263 = vmatprep.subr.bf16.mxu0 %v10628_v55  ;;  %v3300_v32 = vadd.f32 %v9871_v6, %v9333_v61  ;;  %v10674_v10 = vld [vmem:[%s14796_s9 + $0x20] sm:$0xff]   ;;  %v10675_v44 = vld [vmem:[%s14796_s9 + $0x18] sm:$0xff]   ;;  %v10676_v6 = vld [vmem:[%s14796_s9 + $0x10] sm:$0xff]  }
 0x431   : > { %v9873_v26 = vpop.f32.mrf.mxu0 }
 0x432   : > { %v9874_v57 = vadd.f32 %v9873_v26, %v9872_v29  ;;  %10207 = vmatprep.mubr.bf16.mxu1 %v11935_v40  ;;  %10231 = vmatprep.mubr.bf16.mxu0 %v11935_v40  ;;  %v3312_v43 = vmax.f32 %v3300_v32, 0.0  ;;  %v10677_v29 = vld [vmem:[%s14796_s9 + $0x8] sm:$0xff]  }
 0x433   : > { %10240 = vmatpush3.bf16.msra.mxu1 %v10627_v2  ;;  %10264 = vmatpush3.bf16.msra.mxu0 %v10628_v55  ;;  %v10671_v2 = vld [vmem:[%s14796_s9 + $0x38] sm:$0xff]   ;;  %v10672_v55 = vld [vmem:[%s14796_s9 + $0x30] sm:$0xff]  }
 0x434   : > { %v3303_v4 = vadd.f32 %v9874_v57, %v9333_v61  ;;  %10241 = vmatprep.subr.bf16.mxu1 %v10629_v30  ;;  %10265 = vmatprep.subr.bf16.mxu0 %v10630_v11  ;;  %v10642_v61 = vld [vmem:[%s14796_s9 + $0x1b0] sm:$0xff]  }
 0x436   : > { %v3313_v34 = vmax.f32 %v3303_v4, 0.0  ;;  %v3328_v4 = vand.u32 7, %v11254_v5 }
 0x437   : > { %10242 = vmatpush3.bf16.msra.mxu1 %v10629_v30  ;;  %10266 = vmatpush3.bf16.msra.mxu0 %v10630_v11  ;;  %v3318_v30 = vadd.s32 16, %v11254_v5  ;;  %v12125_v11 = vld [vmem:[%s14797_s10] ss:$0 sm:$0xff] }
 0x438   : > { %v11951_v17 = vpack.c.bf16 %v3313_v34, %v3312_v43  ;;  %10243 = vmatprep.subr.bf16.mxu1 %v10631_v58  ;;  %10267 = vmatprep.subr.bf16.mxu0 %v10632_v16  ;;  %vm12138_vm12 = vcmp.lt.s32.totalorder %v3328_v4, 7 }
 0x439   : > { %v3342_v57 = vand.u32 7, %v3318_v30 }
 0x43a   : > { %10208 = vmatmul.mubr.bf16.gmra.mxu1 %v11951_v17  ;;  %10232 = vmatmul.mubr.bf16.gmra.mxu0 %v11951_v17 }
 0x43b   : > { %10244 = vmatpush3.bf16.msra.mxu1 %v10631_v58  ;;  %10268 = vmatpush3.bf16.msra.mxu0 %v10632_v16  ;;  %vm12134_vm11 = vcmp.lt.s32.totalorder %v3342_v57, 7 }
 0x43c   : > { %10251 = vmatprep.mubr.bf16.mxu1 %v11915_v35  ;;  %10275 = vmatprep.mubr.bf16.mxu0 %v11915_v35 }
 0x43d   : > { %10245 = vmatprep.subr.bf16.mxu1 %v10633_v38  ;;  %10269 = vmatprep.subr.bf16.mxu0 %v10634_v56 }
 0x43f   : > { %10246 = vmatpush3.bf16.msra.mxu1 %v10633_v38  ;;  %10270 = vmatpush3.bf16.msra.mxu0 %v10634_v56  ;;  %v14948_v38 = vmov 0 }
 0x440   : > { %10247 = vmatprep.subr.bf16.mxu1 %v10635_v36  ;;  %10271 = vmatprep.subr.bf16.mxu0 %v10636_v1  ;;  %v14949_v38 = vsel %vm12138_vm12, 4294967295, %v14948_v38 }
 0x441   : > { %14950 = vst [vmem:[#allocation3_spill] sm:$0xff] %v14949_v38 }
 0x443   : > { %10248 = vmatpush3.bf16.msra.mxu1 %v10635_v36  ;;  %10272 = vmatpush3.bf16.msra.mxu0 %v10636_v1 }
 0x444   : > { %10249 = vmatprep.subr.bf16.mxu1 %v10637_v37  ;;  %10273 = vmatprep.subr.bf16.mxu0 %v10638_v12 }
 0x447   : > { %10250 = vmatpush3.bf16.msra.mxu1 %v10637_v37  ;;  %10274 = vmatpush3.bf16.msra.mxu0 %v10638_v12  ;;  %v3335_v37 = vand.u32 7, %v11289_v31 }
 0x448   : > { %10283 = vmatprep.subr.bf16.mxu1 %v10639_v51  ;;  %10307 = vmatprep.subr.bf16.mxu0 %v10640_v39 }
 0x449   : > { %vm12175_vm13 = vcmp.lt.s32.totalorder %v3335_v37, 7 }
 0x44a   : > { %10252 = vmatmul.mubr.bf16.vlgmr.msra.gmra.mxu1 %v11919_v18  ;;  %10276 = vmatmul.mubr.bf16.vlgmr.msra.gmra.mxu0 %v11919_v18 }
 0x44b   : > { %10255 = vmatprep.mubr.bf16.mxu1 %v11935_v40  ;;  %10279 = vmatprep.mubr.bf16.mxu0 %v11935_v40 }
 0x44c   : > { %10284 = vmatpush3.bf16.msra.mxu1 %v10639_v51  ;;  %10308 = vmatpush3.bf16.msra.mxu0 %v10640_v39 }
 0x44d   : > { %10285 = vmatprep.subr.bf16.mxu1 %v10641_v60  ;;  %10309 = vmatprep.subr.bf16.mxu0 %v10642_v61 }
 0x450   : > { %10286 = vmatpush3.bf16.msra.mxu1 %v10641_v60  ;;  %10310 = vmatpush3.bf16.msra.mxu0 %v10642_v61  ;;  %v12147_v61 = vadd.s32 24, %v11254_v5 }
 0x451   : > { %10287 = vmatprep.subr.bf16.mxu1 %v10643_v42  ;;  %10311 = vmatprep.subr.bf16.mxu0 %v10644_v7 }
 0x452   : > { %10256 = vmatmul.mubr.bf16.gmra.mxu1 %v11951_v17  ;;  %10280 = vmatmul.mubr.bf16.gmra.mxu0 %v11951_v17 }
 0x453   : > { %10299 = vmatprep.mubr.bf16.mxu1 %v11915_v35  ;;  %10323 = vmatprep.mubr.bf16.mxu0 %v11915_v35 }
 0x454   : > { %10288 = vmatpush3.bf16.msra.mxu1 %v10643_v42  ;;  %10312 = vmatpush3.bf16.msra.mxu0 %v10644_v7  ;;  %v12150_v42 = vadd.s32 48, %v11254_v5 }
 0x455   : > { %10289 = vmatprep.subr.bf16.mxu1 %v10645_v62  ;;  %10313 = vmatprep.subr.bf16.mxu0 %v10646_v22 }
 0x458   : > { %10290 = vmatpush3.bf16.msra.mxu1 %v10645_v62  ;;  %10314 = vmatpush3.bf16.msra.mxu0 %v10646_v22 }
 0x459   : > { %10291 = vmatprep.subr.bf16.mxu1 %v10647_v63  ;;  %10315 = vmatprep.subr.bf16.mxu0 %v10648_v47 }
 0x45c   : > { %10292 = vmatpush3.bf16.msra.mxu1 %v10647_v63  ;;  %10316 = vmatpush3.bf16.msra.mxu0 %v10648_v47  ;;  %v12160_v47 = vadd.s32 32, %v11254_v5 }
 0x45d   : > { %10293 = vmatprep.subr.bf16.mxu1 %v10649_v20  ;;  %10317 = vmatprep.subr.bf16.mxu0 %v10650_v0 }
 0x460   : > { %10294 = vmatpush3.bf16.msra.mxu1 %v10649_v20  ;;  %10318 = vmatpush3.bf16.msra.mxu0 %v10650_v0  ;;  %v12163_v20 = vadd.s32 56, %v11254_v5  ;;  %v12166_v0 = vadd.s32 40, %v11254_v5 }
 0x461   : > { %10295 = vmatprep.subr.bf16.mxu1 %v10651_v13  ;;  %10319 = vmatprep.subr.bf16.mxu0 %v10652_v54 }
 0x464   : > { %10296 = vmatpush3.bf16.msra.mxu1 %v10651_v13  ;;  %10320 = vmatpush3.bf16.msra.mxu0 %v10652_v54 }
 0x465   : > { %10297 = vmatprep.subr.bf16.mxu1 %v10653_v28  ;;  %10321 = vmatprep.subr.bf16.mxu0 %v10654_v14 }
 0x468   : > { %10298 = vmatpush3.bf16.msra.mxu1 %v10653_v28  ;;  %10322 = vmatpush3.bf16.msra.mxu0 %v10654_v14 }
 0x469   : > { %10331 = vmatprep.subr.bf16.mxu1 %v10655_v33  ;;  %10355 = vmatprep.subr.bf16.mxu0 %v10656_v46 }
 0x46b   : > { %10300 = vmatmul.mubr.bf16.vlgmr.msra.gmra.mxu1 %v11919_v18  ;;  %10324 = vmatmul.mubr.bf16.vlgmr.msra.gmra.mxu0 %v11919_v18 }
 0x46c   : > { %10303 = vmatprep.mubr.bf16.mxu1 %v11935_v40  ;;  %10327 = vmatprep.mubr.bf16.mxu0 %v11935_v40 }
 0x46d   : > { %10332 = vmatpush3.bf16.msra.mxu1 %v10655_v33  ;;  %10356 = vmatpush3.bf16.msra.mxu0 %v10656_v46  ;;  %v3349_v33 = vand.u32 7, %v12147_v61  ;;  %v14951_v46 = vmov 0 }
 0x46e   : > { %10333 = vmatprep.subr.bf16.mxu1 %v10657_v15  ;;  %10357 = vmatprep.subr.bf16.mxu0 %v10658_v41  ;;  %v14952_v46 = vsel %vm12175_vm13, 4294967295, %v14951_v46 }
 0x46f   : > { %14953 = vst [vmem:[#allocation4_spill] sm:$0xff] %v14952_v46  ;;  %vm12288_vm14 = vcmp.lt.s32.totalorder %v3349_v33, 7 }
 0x471   : > { %10334 = vmatpush3.bf16.msra.mxu1 %v10657_v15  ;;  %10358 = vmatpush3.bf16.msra.mxu0 %v10658_v41 }
 0x472   : > { %10335 = vmatprep.subr.bf16.mxu1 %v10659_v48  ;;  %10359 = vmatprep.subr.bf16.mxu0 %v10660_v8 }
 0x473   : > { %10304 = vmatmul.mubr.bf16.gmra.mxu1 %v11951_v17  ;;  %10328 = vmatmul.mubr.bf16.gmra.mxu0 %v11951_v17 }
 0x474   : > { %10347 = vmatprep.mubr.bf16.mxu1 %v11915_v35  ;;  %10371 = vmatprep.mubr.bf16.mxu0 %v11915_v35 }
 0x475   : > { %10336 = vmatpush3.bf16.msra.mxu1 %v10659_v48  ;;  %10360 = vmatpush3.bf16.msra.mxu0 %v10660_v8 }
 0x476   : > { %10337 = vmatprep.subr.bf16.mxu1 %v10661_v23  ;;  %10361 = vmatprep.subr.bf16.mxu0 %v10662_v53 }
 0x479   : > { %10338 = vmatpush3.bf16.msra.mxu1 %v10661_v23  ;;  %10362 = vmatpush3.bf16.msra.mxu0 %v10662_v53 }
 0x47a   : > { %10339 = vmatprep.subr.bf16.mxu1 %v10663_v52  ;;  %10363 = vmatprep.subr.bf16.mxu0 %v10664_v19 }
 0x47d   : > { %10340 = vmatpush3.bf16.msra.mxu1 %v10663_v52  ;;  %10364 = vmatpush3.bf16.msra.mxu0 %v10664_v19 }
 0x47e   : > { %10341 = vmatprep.subr.bf16.mxu1 %v10665_v9  ;;  %10365 = vmatprep.subr.bf16.mxu0 %v10666_v49 }
 0x481   : > { %10342 = vmatpush3.bf16.msra.mxu1 %v10665_v9  ;;  %10366 = vmatpush3.bf16.msra.mxu0 %v10666_v49 }
 0x482   : > { %10343 = vmatprep.subr.bf16.mxu1 %v10667_v50  ;;  %10367 = vmatprep.subr.bf16.mxu0 %v10668_v24 }
 0x485   : > { %10344 = vmatpush3.bf16.msra.mxu1 %v10667_v50  ;;  %10368 = vmatpush3.bf16.msra.mxu0 %v10668_v24 }
 0x486   : > { %10345 = vmatprep.subr.bf16.mxu1 %v10669_v3  ;;  %10369 = vmatprep.subr.bf16.mxu0 %v10670_v27 }
 0x489   : > { %10346 = vmatpush3.bf16.msra.mxu1 %v10669_v3  ;;  %10370 = vmatpush3.bf16.msra.mxu0 %v10670_v27 }
 0x48a   : > { %10379 = vmatprep.subr.bf16.mxu1 %v10671_v2 }
 0x48c   : > { %10348 = vmatmul.mubr.bf16.vlgmr.msra.gmra.mxu1 %v11919_v18  ;;  %10372 = vmatmul.mubr.bf16.vlgmr.msra.gmra.mxu0 %v11919_v18 }
 0x48d   : > { %10351 = vmatprep.mubr.bf16.mxu1 %v11935_v40  ;;  %10375 = vmatprep.mubr.bf16.mxu0 %v11935_v40 }
 0x48e   : > { %10380 = vmatpush3.bf16.msra.mxu1 %v10671_v2 }
 0x48f   : > { %10381 = vmatprep.subr.bf16.mxu1 %v10672_v55 }
 0x492   : > { %10382 = vmatpush3.bf16.msra.mxu1 %v10672_v55 }
 0x493   : > { %10383 = vmatprep.subr.bf16.mxu1 %v10673_v21 }
 0x494   : > { %10352 = vmatmul.mubr.bf16.gmra.mxu1 %v11951_v17  ;;  %10376 = vmatmul.mubr.bf16.gmra.mxu0 %v11951_v17 }
 0x495   : > { %10395 = vmatprep.mubr.bf16.mxu1 %v11915_v35  ;;  %v10678_v35 = vld [vmem:[%s14796_s9] sm:$0xff]  }
 0x496   : > { %10384 = vmatpush3.bf16.msra.mxu1 %v10673_v21 }
 0x497   : > { %10385 = vmatprep.subr.bf16.mxu1 %v10674_v10 }
 0x49a   : > { %10386 = vmatpush3.bf16.msra.mxu1 %v10674_v10 }
 0x49b   : > { %10387 = vmatprep.subr.bf16.mxu1 %v10675_v44 }
 0x49e   : > { %10388 = vmatpush3.bf16.msra.mxu1 %v10675_v44 }
 0x49f   : > { %10389 = vmatprep.subr.bf16.mxu1 %v10676_v6 }
 0x4a2   : > { %10390 = vmatpush3.bf16.msra.mxu1 %v10676_v6 }
 0x4a3   : > { %10391 = vmatprep.subr.bf16.mxu1 %v10677_v29 }
 0x4a6   : > { %10392 = vmatpush3.bf16.msra.mxu1 %v10677_v29 }
 0x4a7   : > { %10393 = vmatprep.subr.bf16.mxu1 %v10678_v35 }
 0x4aa   : > { %10394 = vmatpush3.bf16.msra.mxu1 %v10678_v35 }
 0x4ad   : > { %10396 = vmatmul.mubr.bf16.vlgmr.msra.gmra.mxu1 %v11919_v18 }
 0x4ae   : > { %10399 = vmatprep.mubr.bf16.mxu1 %v11935_v40 }
 0x4b5   : > { %10400 = vmatmul.mubr.bf16.gmra.mxu1 %v11951_v17 }
 0x4ea   : > { %v10205_v26 = vpop.f32.mrf.mxu1  ;;  %v10229_v32 = vpop.f32.mrf.mxu0 }
 0x4eb   : > { %v3551_v58 = vadd.f32 %v10205_v26, %v12125_v11  ;;  %v3722_v56 = vrot.slane %v10229_v32, 1 }
 0x4ec   : > { %v3542_v16 = vpop.f32.mrf.mxu1  ;;  %v12129_v18 = vpop.f32.mrf.mxu0 }
 0x4ed   : > { %v3543_v40 = vadd.f32 %v12125_v11, %v3542_v16  ;;  %v4798_v12 = vmax.f32 %v3551_v58, 0.0  ;;  %v14803_v51 = vrot.slane %v12129_v18, 1 }
 0x4ee   : > { %v10206_v43 = vpop.f32.mrf.mxu1  ;;  %v12132_v34 = vpop.f32.mrf.mxu0 }
 0x4ef   : > { %v3554_v36 = vadd.f32 %v10206_v43, %v12125_v11  ;;  %v14804_v1 = vrot.slane %v12132_v34, 1  ;;  %v4796_v63 = vmax.f32 %v3543_v40, 0.0 }
 0x4f0   : > { %v3545_v39 = vpop.f32.mrf.mxu1  ;;  %v3692_v60 = vpop.f32.mrf.mxu0 }
 0x4f1   : > { %v4799_v7 = vmax.f32 %v3554_v36, 0.0  ;;  %v3546_v62 = vadd.f32 %v12125_v11, %v3545_v39  ;;  %v3721_v22 = vrot.slane %v3692_v60, 1  ;;  %v12157_v31 = vsel %vm1195_vm1, %v3722_v56, %v14804_v1 }
 0x4f2   : > { %v14971_v1 = vmov 0 }
 0x4f3   : > { %v4805_v13 = vpack.c.bf16 %v4799_v7, %v4798_v12  ;;  %v9552_v54 = vpack.c.bf16 %v4799_v7, %v4799_v7  ;;  %v4797_v28 = vmax.f32 %v3546_v62, 0.0  ;;  %v12172_v14 = vsel %vm1195_vm1, %v14803_v51, %v3721_v22 }
 0x4f4   : > { %v12181_v15 = vsel %vm1195_vm1, %v3721_v22, %v3722_v56  ;;  %v14972_v1 = vsel %vm12288_vm14, 4294967295, %v14971_v1 }
 0x4f5   : > { %v4904_v48 = vrot.slane %v4805_v13, %v11278_v25  ;;  %v4911_v8 = vrot.slane %v9552_v54, %v11278_v25  ;;  %v4804_v23 = vpack.c.bf16 %v4797_v28, %v4796_v63  ;;  %v9551_v53 = vpack.c.bf16 %v4797_v28, %v4797_v28  ;;  %14973 = vst [vmem:[#allocation22_spill] sm:$0xff] %v14972_v1 }
 0x4f7   : > { %v4912_v50 = vcombine.high %v4904_v48, %v4904_v48  ;;  %v4913_v24 = vcombine.high %v4911_v8, %v4911_v8  ;;  %v4920_v3 = vrot.slane %v4904_v48, %v11278_v25  ;;  %v4927_v27 = vrot.slane %v4911_v8, %v11278_v25 }
 0x4f8   : > { %v4855_v2 = vrot.slane %v4804_v23, %v11278_v25  ;;  %v4862_v55 = vrot.slane %v9551_v53, %v11278_v25 }
 0x4f9   : > { %v4934_v44 = vrot.slane %v4912_v50, %v11278_v25  ;;  %v4941_v6 = vrot.slane %v4913_v24, %v11278_v25  ;;  %v4942_v29 = vcombine.high %v4920_v3, %v4920_v3  ;;  %v4943_v35 = vcombine.high %v4927_v27, %v4927_v27 }
 0x4fa   : > { %v5061_v30 = vunpack.i.h.s16 %v4920_v3  ;;  %v5069_v26 = vunpack.i.h.s16 %v4927_v27  ;;  %v9567_v32 = vpack.i.b16 %v4920_v3, %v4920_v3  ;;  %v9571_v57 = vpack.i.b16 %v4927_v27, %v4927_v27  ;;  %v10209_v12 = vpop.f32.mrf.mxu1  ;;  %v12210_v39 = vpop.f32.mrf.mxu0 }
 0x4fb   : > { %v12204_v4 = vcombine.high %v4934_v44, %v4934_v44  ;;  %v12206_v58 = vcombine.high %v4941_v6, %v4941_v6  ;;  %v5063_v16 = vunpack.i.h.s16 %v4934_v44  ;;  %v5065_v40 = vunpack.i.h.s16 %v4942_v29 }
 0x4fc   : > { %v5071_v43 = vunpack.i.h.s16 %v4941_v6  ;;  %v5073_v56 = vunpack.i.h.s16 %v4943_v35  ;;  %v12208_v36 = vpack.i.b16 %v5061_v30, %v5061_v30  ;;  %v9568_v37 = vpack.i.b16 %v4934_v44, %v4934_v44  ;;  %v3558_v44 = vpop.f32.mrf.mxu1 }
 0x4fd   : > { %14954 = vst [vmem:[#allocation5_spill] sm:$0xff] %v12204_v4  ;;  %14955 = vst [vmem:[#allocation6_spill] sm:$0xff] %v12206_v58  ;;  %v5067_v60 = vunpack.i.h.s16 %v12204_v4  ;;  %v5075_v7 = vunpack.i.h.s16 %v12206_v58  ;;  %v12214_v62 = vpack.i.b16 %v5063_v16, %v5063_v16  ;;  %v9569_v22 = vpack.i.b16 %v4942_v29, %v4942_v29 }
 0x4fe   : > { %14956 = vst [vmem:[#allocation7_spill] sm:$0xff] %v12208_v36  ;;  %v12216_v63 = vpack.i.b16 %v5065_v40, %v5065_v40  ;;  %v12220_v54 = vpack.i.b16 %v5069_v26, %v5069_v26  ;;  %v9572_v28 = vpack.i.b16 %v4941_v6, %v4941_v6  ;;  %v12224_v8 = vpack.i.b16 %v5071_v43, %v5071_v43  ;;  %v12237_v6 = vpop.f32.mrf.mxu0  ;;  %v10210_v50 = vpop.f32.mrf.mxu1 }
 0x4ff   : > { %14957 = vst [vmem:[#allocation8_spill] sm:$0xff] %v12214_v62  ;;  %v12222_v48 = vpack.i.b16 %v5067_v60, %v5067_v60  ;;  %v9573_v23 = vpack.i.b16 %v4943_v35, %v4943_v35  ;;  %v12226_v53 = vpack.i.b16 %v5073_v56, %v5073_v56  ;;  %v12230_v24 = vpack.i.b16 %v5075_v7, %v5075_v7 }
 0x500   : > { %14958 = vst [vmem:[#allocation9_spill] sm:$0xff] %v12216_v63  ;;  %14959 = vst [vmem:[#allocation10_spill] sm:$0xff] %v12220_v54  ;;  %v12233_v3 = vrot.slane %v9567_v32, %v11351_v59  ;;  %v12240_v29 = vrot.slane %v9568_v37, %v11351_v59  ;;  %v12245_v30 = vrot.slane %v9569_v22, %v11351_v59  ;;  %v12270_v26 = vpop.f32.mrf.mxu0  ;;  %v14989_v58 = vsel %vm12175_vm13, %v12181_v15, 0.0 }
 0x501   : > { %14960 = vst [vmem:[#allocation11_spill] sm:$0xff] %v12222_v48  ;;  %14961 = vst [vmem:[#allocation12_spill] sm:$0xff] %v12224_v8  ;;  %v12250_v32 = vrot.slane %v9571_v57, %v11351_v59  ;;  %v12255_v40 = vrot.slane %v9572_v28, %v11351_v59  ;;  %v12260_v56 = vrot.slane %v9573_v23, %v11351_v59 }
 0x502   : > { %14962 = vst [vmem:[#allocation13_spill] sm:$0xff] %v12226_v53  ;;  %14963 = vst [vmem:[#allocation14_spill] sm:$0xff] %v12230_v24  ;;  %v4863_v60 = vcombine.high %v4855_v2, %v4855_v2  ;;  %v4864_v7 = vcombine.high %v4862_v55, %v4862_v55  ;;  %v4871_v57 = vrot.slane %v4855_v2, %v11278_v25  ;;  %v14978_v24 = vand.u32 7, %v12150_v42 }
 0x503   : > { %14964 = vst [vmem:[#allocation15_spill] sm:$0xff] %v12233_v3  ;;  %14965 = vst [vmem:[#allocation16_spill] sm:$0xff] %v12240_v29  ;;  %v4878_v22 = vrot.slane %v4862_v55, %v11278_v25  ;;  %v12267_v16 = vadd.f32 %v10209_v12, %v12125_v11  ;;  %v12275_v37 = vadd.f32 %v12125_v11, %v3558_v44  ;;  %v12284_v44 = vpop.f32.mrf.mxu0 }
 0x504   : > { %14966 = vst [vmem:[#allocation17_spill] sm:$0xff] %v12245_v30  ;;  %14967 = vst [vmem:[#allocation18_spill] sm:$0xff] %v12250_v32  ;;  %v4885_v23 = vrot.slane %v4863_v60, %v11278_v25  ;;  %v4892_v43 = vrot.slane %v4864_v7, %v11278_v25  ;;  %v4893_v2 = vcombine.high %v4871_v57, %v4871_v57  ;;  %v5045_v55 = vunpack.i.h.s16 %v4871_v57  ;;  %v3561_v7 = vpop.f32.mrf.mxu1 }
 0x505   : > { %14968 = vst [vmem:[#allocation19_spill] sm:$0xff] %v12255_v40  ;;  %14969 = vst [vmem:[#allocation20_spill] sm:$0xff] %v12260_v56  ;;  %v4894_v27 = vcombine.high %v4878_v22, %v4878_v22  ;;  %v5053_v13 = vunpack.i.h.s16 %v4878_v22  ;;  %v9559_v60 = vpack.i.b16 %v4871_v57, %v4871_v57  ;;  %v9563_v56 = vpack.i.b16 %v4878_v22, %v4878_v22 }
 0x506   : > { %v12278_v12 = vcombine.high %v4885_v23, %v4885_v23  ;;  %v12280_v51 = vcombine.high %v4892_v43, %v4892_v43  ;;  %v5047_v49 = vunpack.i.h.s16 %v4885_v23  ;;  %v5055_v9 = vunpack.i.h.s16 %v4892_v43 }
 0x507   : > { %v5049_v19 = vunpack.i.h.s16 %v4893_v2  ;;  %v5057_v28 = vunpack.i.h.s16 %v4894_v27  ;;  %v12282_v10 = vpack.i.b16 %v5045_v55, %v5045_v55  ;;  %v9560_v52 = vpack.i.b16 %v4885_v23, %v4885_v23 }
 0x508   : > { %14970 = vst [vmem:[#allocation21_spill] sm:$0xff] %v12280_v51  ;;  %v5051_v35 = vunpack.i.h.s16 %v12278_v12  ;;  %v5059_v21 = vunpack.i.h.s16 %v12280_v51  ;;  %v12294_v41 = vpack.i.b16 %v5047_v49, %v5047_v49  ;;  %v9561_v53 = vpack.i.b16 %v4893_v2, %v4893_v2 }
 0x509   : > { %v12296_v57 = vpack.i.b16 %v5049_v19, %v5049_v19  ;;  %v12304_v40 = vpack.i.b16 %v5053_v13, %v5053_v13  ;;  %v9564_v54 = vpack.i.b16 %v4892_v43, %v4892_v43  ;;  %v12306_v32 = vpack.i.b16 %v5055_v9, %v5055_v9 }
 0x50a   : > { %v10253_v8 = vpop.f32.mrf.mxu1  ;;  %v12300_v61 = vpop.f32.mrf.mxu0  ;;  %v12302_v33 = vpack.i.b16 %v5051_v35, %v5051_v35  ;;  %v9565_v23 = vpack.i.b16 %v4894_v27, %v4894_v27  ;;  %v12308_v49 = vpack.i.b16 %v5057_v28, %v5057_v28  ;;  %v12312_v2 = vpack.i.b16 %v5059_v21, %v5059_v21 }
 0x50b   : > { %14974 = vst [vmem:[#allocation23_spill] sm:$0xff] %v12304_v40  ;;  %14975 = vst [vmem:[#allocation24_spill] sm:$0xff] %v12306_v32  ;;  %vm12316_vm15 = vcmp.lt.s32.totalorder %v14978_v24, 7  ;;  %v14979_v35 = vmov 0  ;;  %v12321_v13 = vrot.slane %v9559_v60, %v11351_v59  ;;  %v12326_v27 = vrot.slane %v9560_v52, %v11351_v59 }
 0x50c   : > { %14976 = vst [vmem:[#allocation25_spill] sm:$0xff] %v12308_v49  ;;  %14977 = vst [vmem:[#allocation26_spill] sm:$0xff] %v12312_v2  ;;  %v3842_v55 = vpop.f32.mrf.mxu1  ;;  %v3997_v22 = vpop.f32.mrf.mxu0  ;;  %v14980_v35 = vsel %vm12316_vm15, 4294967295, %v14979_v35  ;;  %v12331_v43 = vrot.slane %v9561_v53, %v11351_v59  ;;  %v12336_v24 = vrot.slane %v9563_v56, %v11351_v59  ;;  %v12346_v19 = vrot.slane %v9565_v23, %v11351_v59 }
 0x50d   : > { %14981 = vst [vmem:[#allocation27_spill] sm:$0xff] %v14980_v35  ;;  %v12341_v22 = vrot.slane %v9564_v54, %v11351_v59  ;;  %v4802_v42 = vmax.f32 %v12267_v16, 0.0  ;;  %v4800_v56 = vmax.f32 %v12275_v37, 0.0  ;;  %v3570_v21 = vadd.f32 %v10210_v50, %v12125_v11 }
 0x50e   : > { %14982 = vst [vmem:[#allocation28_spill] sm:$0xff] %v12336_v24  ;;  %v10254_v60 = vpop.f32.mrf.mxu1  ;;  %14984 = vst [vmem:[#allocation30_spill] sm:$0xff] %v12346_v19  ;;  %v3562_v54 = vadd.f32 %v12125_v11, %v3561_v7  ;;  %v14985_v23 = vsel %vm12134_vm11, %v12157_v31, 0.0  ;;  %v14986_v16 = vsel %vm12138_vm12, %v12172_v14, 0.0  ;;  %v14987_v50 = vrot.slane %v12237_v6, 1 }
 0x50f   : > { %14983 = vst [vmem:[#allocation29_spill] sm:$0xff] %v12341_v22  ;;  %v3851_v52 = vadd.f32 %v10253_v8, %v14985_v23  ;;  %v3843_v53 = vadd.f32 %v3842_v55, %v14986_v16  ;;  %v4803_v37 = vmax.f32 %v3570_v21, 0.0  ;;  %v14988_v28 = vrot.slane %v12132_v34, 1 }
 0x510   : > { %v3845_v9 = vpop.f32.mrf.mxu1  ;;  %v14990_v31 = vrot.slane %v12270_v26, 1  ;;  %v14991_v8 = vrot.slane %v12210_v39, 1  ;;  %v4801_v55 = vmax.f32 %v3562_v54, 0.0 }
 0x511   : > { %v3731_v7 = vsel %vm1195_vm1, %v14988_v28, %v14987_v50  ;;  %v3846_v63 = vadd.f32 %v3845_v9, %v14989_v58  ;;  %v12383_v21 = vadd.f32 %v12125_v11, %v3851_v52  ;;  %v12386_v34 = vadd.f32 %v12125_v11, %v3843_v53 }
 0x512   : > { %v12380_v14 = vsel %vm1195_vm1, %v14991_v8, %v14990_v31  ;;  %v3755_v28 = vsel %vm12288_vm14, %v3731_v7, 0.0  ;;  %v4807_v15 = vpack.c.bf16 %v4803_v37, %v4802_v42  ;;  %v9554_v58 = vpack.c.bf16 %v4803_v37, %v4803_v37  ;;  %v12443_v2 = vpop.f32.mrf.mxu1 }
 0x513   : > { %v3854_v9 = vadd.f32 %v10254_v60, %v3755_v28  ;;  %v3874_v23 = vadd.f32 %v12125_v11, %v3846_v63  ;;  %v4806_v16 = vpack.c.bf16 %v4801_v55, %v4800_v56  ;;  %v9553_v50 = vpack.c.bf16 %v4801_v55, %v4801_v55 }
 0x514   : > { %v5002_v52 = vrot.slane %v4807_v15, %v11278_v25  ;;  %v5009_v8 = vrot.slane %v9554_v58, %v11278_v25  ;;  %v14992_v56 = vrot.slane %v12284_v44, 1  ;;  %v14993_v37 = vrot.slane %v12237_v6, 1 }
 0x515   : > { %v12396_v53 = vadd.f32 %v12125_v11, %v3854_v9  ;;  %v12398_v30 = vmax.f32 %v3874_v23, 0.0  ;;  %v4953_v42 = vrot.slane %v4806_v16, %v11278_v25  ;;  %v4960_v60 = vrot.slane %v9553_v50, %v11278_v25  ;;  %v12415_v9 = vpop.f32.mrf.mxu0 }
 0x516   : > { %v12411_v7 = vsel %vm1195_vm1, %v14993_v37, %v14992_v56  ;;  %v5010_v55 = vcombine.high %v5002_v52, %v5002_v52  ;;  %v5011_v28 = vcombine.high %v5009_v8, %v5009_v8  ;;  %v5018_v15 = vrot.slane %v5002_v52, %v11278_v25 }
 0x517   : > { %v5025_v58 = vrot.slane %v5009_v8, %v11278_v25  ;;  %v4961_v23 = vcombine.high %v4953_v42, %v4953_v42  ;;  %v4962_v16 = vcombine.high %v4960_v60, %v4960_v60  ;;  %v12418_v50 = vrot.slane %v4953_v42, %v11278_v25  ;;  %v12429_v48 = vpop.f32.mrf.mxu0 }
 0x518   : > { %v12421_v31 = vrot.slane %v4960_v60, %v11278_v25  ;;  %v5032_v6 = vrot.slane %v5010_v55, %v11278_v25  ;;  %v5039_v56 = vrot.slane %v5011_v28, %v11278_v25  ;;  %v5040_v37 = vcombine.high %v5018_v15, %v5018_v15 }
 0x519   : > { %v5041_v63 = vcombine.high %v5025_v58, %v5025_v58  ;;  %v5093_v54 = vunpack.i.h.s16 %v5018_v15  ;;  %v5101_v52 = vunpack.i.h.s16 %v5025_v58  ;;  %v9583_v62 = vpack.i.b16 %v5018_v15, %v5018_v15 }
 0x51a   : > { %v9587_v8 = vpack.i.b16 %v5025_v58, %v5025_v58  ;;  %v12425_v29 = vcombine.high %v5032_v6, %v5032_v6  ;;  %v12427_v36 = vcombine.high %v5039_v56, %v5039_v56  ;;  %v5095_v3 = vunpack.i.h.s16 %v5032_v6 }
 0x51b   : > { %v5097_v42 = vunpack.i.h.s16 %v5040_v37  ;;  %v5103_v60 = vunpack.i.h.s16 %v5039_v56  ;;  %v5105_v4 = vunpack.i.h.s16 %v5041_v63  ;;  %v12431_v49 = vpack.i.b16 %v5093_v54, %v5093_v54 }
 0x51c   : > { %14994 = vst [vmem:[#allocation31_spill] sm:$0xff] %v12425_v29  ;;  %14995 = vst [vmem:[#allocation32_spill] sm:$0xff] %v12427_v36  ;;  %v9584_v55 = vpack.i.b16 %v5032_v6, %v5032_v6  ;;  %v5099_v28 = vunpack.i.h.s16 %v12425_v29  ;;  %v5107_v19 = vunpack.i.h.s16 %v12427_v36  ;;  %v12435_v32 = vpack.i.b16 %v5095_v3, %v5095_v3  ;;  %v12451_v3 = vpop.f32.mrf.mxu0 }
 0x51d   : > { %14996 = vst [vmem:[#allocation33_spill] sm:$0xff] %v12431_v49  ;;  %v9585_v15 = vpack.i.b16 %v5040_v37, %v5040_v37  ;;  %v12437_v58 = vpack.i.b16 %v5097_v42, %v5097_v42  ;;  %v12441_v40 = vpack.i.b16 %v5101_v52, %v5101_v52  ;;  %v9588_v24 = vpack.i.b16 %v5039_v56, %v5039_v56  ;;  %v12482_v56 = vpop.f32.mrf.mxu1 }
 0x51e   : > { %14997 = vst [vmem:[#allocation34_spill] sm:$0xff] %v12435_v32  ;;  %v12445_v54 = vpack.i.b16 %v5099_v28, %v5099_v28  ;;  %v12447_v6 = vpack.i.b16 %v5103_v60, %v5103_v60  ;;  %v9589_v51 = vpack.i.b16 %v5041_v63, %v5041_v63  ;;  %v12449_v46 = vpack.i.b16 %v5105_v4, %v5105_v4  ;;  %v12491_v22 = vpop.f32.mrf.mxu0 }
 0x51f   : > { %14998 = vst [vmem:[#allocation35_spill] sm:$0xff] %v12437_v58  ;;  %14999 = vst [vmem:[#allocation36_spill] sm:$0xff] %v12441_v40  ;;  %v12455_v42 = vpack.i.b16 %v5107_v19, %v5107_v19  ;;  %v12458_v52 = vrot.slane %v9583_v62, %v11351_v59  ;;  %v12463_v28 = vrot.slane %v9584_v55, %v11351_v59  ;;  %v5077_v62 = vunpack.i.h.s16 %v12418_v50 }
 0x520   : > { %15000 = vst [vmem:[#allocation37_spill] sm:$0xff] %v12445_v54  ;;  %15001 = vst [vmem:[#allocation38_spill] sm:$0xff] %v12447_v6  ;;  %v12468_v63 = vrot.slane %v9585_v15, %v11351_v59  ;;  %v12473_v19 = vrot.slane %v9587_v8, %v11351_v59  ;;  %v12478_v37 = vrot.slane %v9588_v24, %v11351_v59  ;;  %v15011_v60 = vmov 0 }
 0x521   : > { %15002 = vst [vmem:[#allocation39_spill] sm:$0xff] %v12449_v46  ;;  %15003 = vst [vmem:[#allocation40_spill] sm:$0xff] %v12455_v42  ;;  %v12485_v15 = vrot.slane %v9589_v51, %v11351_v59  ;;  %v4983_v8 = vrot.slane %v4961_v23, %v11278_v25  ;;  %v4990_v4 = vrot.slane %v4962_v16, %v11278_v25  ;;  %v5085_v51 = vunpack.i.h.s16 %v12421_v31 }
 0x522   : > { %15004 = vst [vmem:[#allocation41_spill] sm:$0xff] %v12458_v52  ;;  %15005 = vst [vmem:[#allocation42_spill] sm:$0xff] %v12463_v28  ;;  %v4991_v24 = vcombine.high %v12418_v50, %v12418_v50  ;;  %v4992_v55 = vcombine.high %v12421_v31, %v12421_v31  ;;  %v12511_v42 = vpack.i.b16 %v5077_v62, %v5077_v62  ;;  %v15017_v36 = vand.u32 7, %v12163_v20  ;;  %v12531_v20 = vpop.f32.mrf.mxu0 }
 0x523   : > { %15006 = vst [vmem:[#allocation43_spill] sm:$0xff] %v12468_v63  ;;  %15007 = vst [vmem:[#allocation44_spill] sm:$0xff] %v12473_v19  ;;  %v12505_v23 = vcombine.high %v4983_v8, %v4983_v8  ;;  %v12507_v16 = vcombine.high %v4990_v4, %v4990_v4  ;;  %v5079_v46 = vunpack.i.h.s16 %v4983_v8  ;;  %v5087_v6 = vunpack.i.h.s16 %v4990_v4 }
 0x524   : > { %15008 = vst [vmem:[#allocation45_spill] sm:$0xff] %v12478_v37  ;;  %15009 = vst [vmem:[#allocation46_spill] sm:$0xff] %v12485_v15  ;;  %v15010_v15 = vand.u32 7, %v12160_v47  ;;  %v5081_v37 = vunpack.i.h.s16 %v4991_v24  ;;  %v5089_v40 = vunpack.i.h.s16 %v4992_v55  ;;  %v9575_v19 = vpack.i.b16 %v12418_v50, %v12418_v50 }
 0x525   : > { %15014 = vst [vmem:[#allocation48_spill] sm:$0xff] %v12505_v23  ;;  %15015 = vst [vmem:[#allocation49_spill] sm:$0xff] %v12507_v16  ;;  %vm12515_vm2 = vcmp.lt.s32.totalorder %v15017_v36, 7  ;;  %v15018_v47 = vmov 0  ;;  %v15021_v58 = vand.u32 7, %v12166_v0  ;;  %v15022_v63 = vmov 0 }
 0x526   : > { %vm12501_vm0 = vcmp.lt.s32.totalorder %v15010_v15, 7  ;;  %15016 = vst [vmem:[#allocation50_spill] sm:$0xff] %v12511_v42  ;;  %v15019_v47 = vsel %vm12515_vm2, 4294967295, %v15018_v47  ;;  %v12519_v15 = vpop.f32.mrf.mxu1  ;;  %v5083_v32 = vunpack.i.h.s16 %v12505_v23  ;;  %v5091_v50 = vunpack.i.h.s16 %v12507_v16 }
 0x527   : > { %v15012_v60 = vsel %vm12501_vm0, 4294967295, %v15011_v60  ;;  %15020 = vst [vmem:[#allocation51_spill] sm:$0xff] %v15019_v47  ;;  %vm12523_vm3 = vcmp.lt.s32.totalorder %v15021_v58, 7  ;;  %v9576_v62 = vpack.i.b16 %v4983_v8, %v4983_v8  ;;  %v12529_v28 = vpack.i.b16 %v5079_v46, %v5079_v46 }
 0x528   : > { %15013 = vst [vmem:[#allocation47_spill] sm:$0xff] %v15012_v60  ;;  %v15023_v63 = vsel %vm12523_vm3, 4294967295, %v15022_v63  ;;  %v9577_v36 = vpack.i.b16 %v4991_v24, %v4991_v24  ;;  %v12533_v49 = vpack.i.b16 %v5081_v37, %v5081_v37  ;;  %v9579_v0 = vpack.i.b16 %v12421_v31, %v12421_v31  ;;  %v12551_v38 = vpop.f32.mrf.mxu1 }
 0x529   : > { %15024 = vst [vmem:[#allocation52_spill] sm:$0xff] %v15023_v63  ;;  %15025 = vst [vmem:[#allocation53_spill] sm:$0xff] %v12529_v28  ;;  %v12539_v58 = vpack.i.b16 %v5083_v32, %v5083_v32  ;;  %v12541_v54 = vpack.i.b16 %v5085_v51, %v5085_v51  ;;  %v9580_v29 = vpack.i.b16 %v4990_v4, %v4990_v4  ;;  %v15038_v32 = vmax.f32 %v12386_v34, 0.0 }
 0x52a   : > { %15026 = vst [vmem:[#allocation54_spill] sm:$0xff] %v12533_v49  ;;  %v12543_v1 = vpack.i.b16 %v5087_v6, %v5087_v6  ;;  %v9581_v46 = vpack.i.b16 %v4992_v55, %v4992_v55  ;;  %v12545_v8 = vpack.i.b16 %v5089_v40, %v5089_v40  ;;  %v12549_v24 = vpack.i.b16 %v5091_v50, %v5091_v50  ;;  %v12563_v6 = vpop.f32.mrf.mxu0 }
 0x52b   : > { %15027 = vst [vmem:[#allocation55_spill] sm:$0xff] %v12539_v58  ;;  %15028 = vst [vmem:[#allocation56_spill] sm:$0xff] %v12541_v54  ;;  %v12554_v52 = vrot.slane %v9575_v19, %v11351_v59  ;;  %v12559_v31 = vrot.slane %v9576_v62, %v11351_v59  ;;  %v12566_v4 = vrot.slane %v9577_v36, %v11351_v59  ;;  %v10301_v50 = vpop.f32.mrf.mxu1  ;;  %v15039_v37 = vsel %vm12316_vm15, %v12380_v14, 0.0 }
 0x52c   : > { %15029 = vst [vmem:[#allocation57_spill] sm:$0xff] %v12543_v1  ;;  %15030 = vst [vmem:[#allocation58_spill] sm:$0xff] %v12545_v8  ;;  %v12571_v19 = vrot.slane %v9579_v0, %v11351_v59  ;;  %v12576_v62 = vrot.slane %v9580_v29, %v11351_v59  ;;  %v12581_v40 = vrot.slane %v9581_v46, %v11351_v59  ;;  %v12585_v55 = vpop.f32.mrf.mxu0  ;;  %v4811_v0 = vmax.f32 %v12396_v53, 0.0 }
 0x52d   : > { %15031 = vst [vmem:[#allocation59_spill] sm:$0xff] %v12549_v24  ;;  %15032 = vst [vmem:[#allocation60_spill] sm:$0xff] %v12554_v52  ;;  %v4816_v51 = vpack.c.bf16 %v12398_v30, %v15038_v32  ;;  %v9555_v29 = vpack.c.bf16 %v12398_v30, %v12398_v30  ;;  %v3867_v46 = vadd.f32 %v12443_v2, %v15039_v37  ;;  %v3756_v36 = vsel %vm12501_vm0, %v12411_v7, 0.0  ;;  %v4134_v23 = vpop.f32.mrf.mxu1 }
 0x52e   : > { %15033 = vst [vmem:[#allocation61_spill] sm:$0xff] %v12559_v31  ;;  %15034 = vst [vmem:[#allocation62_spill] sm:$0xff] %v12566_v4  ;;  %v15040_v8 = vrot.slane %v12129_v18, 1  ;;  %v15041_v53 = vrot.slane %v12270_v26, 1  ;;  %v15042_v30 = vrot.slane %v12210_v39, 1  ;;  %v15043_v32 = vrot.slane %v12284_v44, 1 }
 0x52f   : > { %15035 = vst [vmem:[#allocation63_spill] sm:$0xff] %v12571_v19  ;;  %15036 = vst [vmem:[#allocation64_spill] sm:$0xff] %v12576_v62  ;;  %v12618_v2 = vadd.f32 %v10301_v50, %v12415_v9  ;;  %v15044_v7 = vmax.f32 %v12383_v21, 0.0  ;;  %v9556_v37 = vpack.c.bf16 %v4811_v0, %v4811_v0  ;;  %v5119_v26 = vrot.slane %v4816_v51, %v11278_v25  ;;  %v12634_v21 = vpop.f32.mrf.mxu0 }
 0x530   : > { %15037 = vst [vmem:[#allocation65_spill] sm:$0xff] %v12581_v40  ;;  %v12607_v34 = vsel %vm1195_vm1, %v15041_v53, %v15040_v8  ;;  %v12615_v14 = vsel %vm1195_vm1, %v15043_v32, %v15042_v30  ;;  %v5126_v8 = vrot.slane %v9555_v29, %v11278_v25  ;;  %v12625_v53 = vadd.f32 %v12125_v11, %v3867_v46 }
 0x531   : > { %v4817_v18 = vpack.c.bf16 %v4811_v0, %v15044_v7  ;;  %v3859_v39 = vadd.f32 %v12482_v56, %v3756_v36  ;;  %v5175_v51 = vrot.slane %v9556_v37, %v11278_v25  ;;  %v5127_v0 = vcombine.high %v5119_v26, %v5119_v26  ;;  %v12664_v36 = vpop.f32.mrf.mxu0 }
 0x532   : > { %v5128_v29 = vcombine.high %v5126_v8, %v5126_v8  ;;  %v12639_v46 = vrot.slane %v5119_v26, %v11278_v25  ;;  %v12642_v56 = vrot.slane %v5126_v8, %v11278_v25 }
 0x533   : > { %v5168_v50 = vrot.slane %v4817_v18, %v11278_v25  ;;  %v12646_v30 = vadd.f32 %v12125_v11, %v3859_v39  ;;  %v5177_v7 = vcombine.high %v5175_v51, %v5175_v51  ;;  %v5191_v18 = vrot.slane %v5175_v51, %v11278_v25 }
 0x534   : > { %v12651_v37 = vrot.slane %v5127_v0, %v11278_v25  ;;  %v12654_v26 = vrot.slane %v5128_v29, %v11278_v25  ;;  %v12658_v8 = vcombine.high %v12639_v46, %v12639_v46  ;;  %v12662_v39 = vcombine.high %v12642_v56, %v12642_v56 }
 0x535   : > { %v5176_v32 = vcombine.high %v5168_v50, %v5168_v50  ;;  %v5184_v9 = vrot.slane %v5168_v50, %v11278_v25  ;;  %v12670_v51 = vrot.slane %v5177_v7, %v11278_v25  ;;  %v12674_v29 = vcombine.high %v5191_v18, %v5191_v18 }
 0x536   : > { %15045 = vst [vmem:[#allocation66_spill] sm:$0xff] %v12654_v26  ;;  %15046 = vst [vmem:[#allocation67_spill] sm:$0xff] %v12662_v39  ;;  %v5333_v40 = vunpack.i.h.s16 %v5191_v18  ;;  %v9603_v62 = vpack.i.b16 %v5191_v18, %v5191_v18  ;;  %v12692_v18 = vpop.f32.mrf.mxu0  ;;  %v12737_v42 = vcombine.high %v12651_v37, %v12651_v37 }
 0x537   : > { %v12667_v50 = vrot.slane %v5176_v32, %v11278_v25  ;;  %15048 = vst [vmem:[#allocation69_spill] sm:$0xff] %v12670_v51  ;;  %v12672_v0 = vcombine.high %v5184_v9, %v5184_v9  ;;  %15050 = vst [vmem:[#allocation71_spill] sm:$0xff] %v12674_v29  ;;  %v5325_v44 = vunpack.i.h.s16 %v5184_v9  ;;  %v9599_v1 = vpack.i.b16 %v5184_v9, %v5184_v9 }
 0x538   : > { %v12682_v19 = vcombine.high %v12670_v51, %v12670_v51  ;;  %v5335_v24 = vunpack.i.h.s16 %v12670_v51  ;;  %v5337_v16 = vunpack.i.h.s16 %v12674_v29  ;;  %v12704_v58 = vpack.i.b16 %v5333_v40, %v5333_v40 }
 0x539   : > { %15047 = vst [vmem:[#allocation68_spill] sm:$0xff] %v12667_v50  ;;  %15049 = vst [vmem:[#allocation70_spill] sm:$0xff] %v12672_v0  ;;  %v12678_v54 = vcombine.high %v12667_v50, %v12667_v50  ;;  %v5327_v32 = vunpack.i.h.s16 %v12667_v50  ;;  %v5329_v7 = vunpack.i.h.s16 %v12672_v0  ;;  %v12688_v49 = vpack.i.b16 %v5325_v44, %v5325_v44 }
 0x53a   : > { %15052 = vst [vmem:[#allocation73_spill] sm:$0xff] %v12682_v19  ;;  %v5339_v28 = vunpack.i.h.s16 %v12682_v19  ;;  %15056 = vst [vmem:[#allocation77_spill] sm:$0xff] %v12704_v58  ;;  %v12710_v60 = vpack.i.b16 %v5335_v24, %v5335_v24  ;;  %v12724_v9 = vrot.slane %v9599_v1, %v11351_v59  ;;  %v5309_v1 = vunpack.i.h.s16 %v12639_v46 }
 0x53b   : > { %15051 = vst [vmem:[#allocation72_spill] sm:$0xff] %v12678_v54  ;;  %15053 = vst [vmem:[#allocation74_spill] sm:$0xff] %v12688_v49  ;;  %v5331_v4 = vunpack.i.h.s16 %v12678_v54  ;;  %v12696_v31 = vpack.i.b16 %v5327_v32, %v5327_v32  ;;  %v12700_v52 = vpack.i.b16 %v5329_v7, %v5329_v7  ;;  %v10679_v7 = vld [vmem:[%s14798_s11 + $0x38] sm:$0xff]   ;;  %v5311_v40 = vunpack.i.h.s16 %v12651_v37 }
 0x53c   : > { %15058 = vst [vmem:[#allocation79_spill] sm:$0xff] %v12710_v60  ;;  %v12721_v44 = vpack.i.b16 %v5339_v28, %v5339_v28  ;;  %15061 = vst [vmem:[#allocation82_spill] sm:$0xff] %v12724_v9  ;;  %v12741_v28 = vcombine.high %v12654_v26, %v12654_v26  ;;  %10403 = vmatprep.subr.bf16.mxu0 %v10679_v7  ;;  %v5313_v24 = vunpack.i.h.s16 %v12658_v8  ;;  %v5315_v32 = vunpack.i.h.s16 %v12737_v42 }
 0x53d   : > { %15054 = vst [vmem:[#allocation75_spill] sm:$0xff] %v12696_v31  ;;  %15055 = vst [vmem:[#allocation76_spill] sm:$0xff] %v12700_v52  ;;  %v12708_v50 = vpack.i.b16 %v5331_v4, %v5331_v4  ;;  %v12714_v31 = vpack.i.b16 %v5337_v16, %v5337_v16  ;;  %v12728_v4 = vpop.f32.mrf.mxu0  ;;  %v12731_v16 = vrot.slane %v9603_v62, %v11351_v59  ;;  %v5317_v62 = vunpack.i.h.s16 %v12642_v56 }
 0x53e   : > { %15060 = vst [vmem:[#allocation81_spill] sm:$0xff] %v12721_v44  ;;  %15062 = vst [vmem:[#allocation83_spill] sm:$0xff] %v12728_v4  ;;  %10404 = vmatpush3.bf16.msra.mxu0 %v10679_v7  ;;  %v5319_v58 = vunpack.i.h.s16 %v12654_v26  ;;  %v5321_v44 = vunpack.i.h.s16 %v12662_v39  ;;  %v5323_v19 = vunpack.i.h.s16 %v12741_v28  ;;  %v12753_v29 = vpack.i.b16 %v5309_v1, %v5309_v1 }
 0x53f   : > { %15057 = vst [vmem:[#allocation78_spill] sm:$0xff] %v12708_v50  ;;  %15059 = vst [vmem:[#allocation80_spill] sm:$0xff] %v12714_v31  ;;  %v9591_v31 = vpack.i.b16 %v12639_v46, %v12639_v46  ;;  %v12757_v51 = vpack.i.b16 %v5311_v40, %v5311_v40  ;;  %v12759_v49 = vpop.f32.mrf.mxu0  ;;  %v12763_v9 = vpack.i.b16 %v5313_v24, %v5313_v24 }
 0x540   : > { %15063 = vst [vmem:[#allocation84_spill] sm:$0xff] %v12731_v16  ;;  %15064 = vst [vmem:[#allocation85_spill] sm:$0xff] %v12741_v28  ;;  %v10302_v16 = vpop.f32.mrf.mxu1  ;;  %v12767_v54 = vpack.i.b16 %v5315_v32, %v5315_v32  ;;  %v9595_v46 = vpack.i.b16 %v12642_v56, %v12642_v56  ;;  %v12771_v1 = vpack.i.b16 %v5317_v62, %v5317_v62  ;;  %v15071_v32 = vsel %vm12523_vm3, %v12615_v14, 0.0 }
 0x541   : > { %v12775_v60 = vpack.i.b16 %v5319_v58, %v5319_v58  ;;  %v12779_v7 = vpack.i.b16 %v5321_v44, %v5321_v44  ;;  %v12783_v50 = vpack.i.b16 %v5323_v19, %v5323_v19  ;;  %v12786_v56 = vrot.slane %v9591_v31, %v11351_v59  ;;  %v12795_v24 = vpop.f32.mrf.mxu0 }
 0x542   : > { %15065 = vst [vmem:[#allocation86_spill] sm:$0xff] %v12771_v1  ;;  %v4137_v52 = vpop.f32.mrf.mxu1  ;;  %v12791_v58 = vrot.slane %v9595_v46, %v11351_v59  ;;  %v4812_v44 = vmax.f32 %v12646_v30, 0.0  ;;  %v15070_v19 = vsel %vm12515_vm2, %v12607_v34, 0.0  ;;  %v3862_v46 = vadd.f32 %v12551_v38, %v15071_v32  ;;  %v10681_v38 = vld [vmem:[%s14798_s11 + $0x28] sm:$0xff]  }
 0x543   : > { %15066 = vst [vmem:[#allocation87_spill] sm:$0xff] %v12775_v60  ;;  %15067 = vst [vmem:[#allocation88_spill] sm:$0xff] %v12779_v7  ;;  %v3870_v31 = vadd.f32 %v12519_v15, %v15070_v19  ;;  %v4167_v62 = vadd.f32 %v12125_v11, %v12618_v2  ;;  %v4135_v0 = vadd.f32 %v4134_v23, %v12429_v48  ;;  %v10680_v15 = vld [vmem:[%s14798_s11 + $0x30] sm:$0xff]   ;;  %v12827_v30 = vpop.f32.mrf.mxu0 }
 0x544   : > { %15068 = vst [vmem:[#allocation89_spill] sm:$0xff] %v12783_v50  ;;  %15069 = vst [vmem:[#allocation90_spill] sm:$0xff] %v12791_v58  ;;  %v4146_v1 = vadd.f32 %v10302_v16, %v12491_v22  ;;  %v10305_v34 = vpop.f32.mrf.mxu1  ;;  %v3878_v2 = vadd.f32 %v12125_v11, %v3862_v46  ;;  %v4138_v16 = vadd.f32 %v12300_v61, %v4137_v52  ;;  %10405 = vmatprep.subr.bf16.mxu0 %v10680_v15 }
 0x545   : > { %v3880_v14 = vadd.f32 %v12125_v11, %v3870_v31  ;;  %v4822_v32 = vmax.f32 %v4167_v62, 0.0  ;;  %v4165_v23 = vadd.f32 %v12125_v11, %v4135_v0  ;;  %v4159_v31 = vadd.f32 %v10305_v34, %v12531_v20  ;;  %10406 = vmatpush3.bf16.msra.mxu0 %v10680_v15  ;;  %v10682_v20 = vld [vmem:[%s14798_s11 + $0x20] sm:$0xff]  }
 0x546   : > { %v4168_v22 = vadd.f32 %v12125_v11, %v4146_v1  ;;  %v4813_v58 = vmax.f32 %v3878_v2, 0.0  ;;  %v4166_v0 = vadd.f32 %v12125_v11, %v4138_v16  ;;  %v15072_v61 = vpack.i.b16 %v12278_v12, %v12278_v12  ;;  %10407 = vmatprep.subr.bf16.mxu0 %v10681_v38 }
 0x547   : > { %v4815_v40 = vmax.f32 %v3880_v14, 0.0  ;;  %v4820_v62 = vmax.f32 %v4165_v23, 0.0  ;;  %v15074_v34 = vmax.f32 %v12625_v53, 0.0  ;;  %v12848_v12 = vadd.f32 %v12125_v11, %v4159_v31 }
 0x548   : > { %v4823_v48 = vmax.f32 %v4168_v22, 0.0  ;;  %v12836_v52 = vrot.slane %v15072_v61, %v11351_v59  ;;  %v4818_v2 = vpack.c.bf16 %v4813_v58, %v4812_v44  ;;  %v9557_v23 = vpack.c.bf16 %v4813_v58, %v4813_v58 }
 0x549   : > { %v4819_v15 = vpack.c.bf16 %v4815_v40, %v15074_v34  ;;  %v9558_v14 = vpack.c.bf16 %v4815_v40, %v4815_v40  ;;  %v12845_v46 = vmax.f32 %v4166_v0, 0.0  ;;  %10408 = vmatpush3.bf16.msra.mxu0 %v10681_v38 }
 0x54a   : > { %v4829_v22 = vpack.c.bf16 %v4823_v48, %v4822_v32  ;;  %v9624_v16 = vpack.c.bf16 %v4823_v48, %v4823_v48  ;;  %v5217_v28 = vrot.slane %v4818_v2, %v11278_v25  ;;  %v5224_v53 = vrot.slane %v9557_v23, %v11278_v25  ;;  %10409 = vmatprep.subr.bf16.mxu0 %v10682_v20  ;;  %v10683_v32 = vld [vmem:[%s14798_s11 + $0x18] sm:$0xff]  }
 0x54b   : > { %v5266_v19 = vrot.slane %v4819_v15, %v11278_v25  ;;  %v5273_v50 = vrot.slane %v9558_v14, %v11278_v25  ;;  %v12861_v44 = vpack.c.bf16 %v12845_v46, %v4820_v62 }
 0x54c   : > { %v12838_v1 = vpop.f32.mrf.mxu0  ;;  %v12855_v40 = vrot.slane %v4829_v22, %v11278_v25  ;;  %v12858_v58 = vrot.slane %v9624_v16, %v11278_v25  ;;  %v5225_v34 = vcombine.high %v5217_v28, %v5217_v28  ;;  %v5226_v15 = vcombine.high %v5224_v53, %v5224_v53 }
 0x54d   : > { %15073 = vst [vmem:[#allocation91_spill] sm:$0xff] %v12838_v1  ;;  %v5274_v48 = vcombine.high %v5266_v19, %v5266_v19  ;;  %v5275_v31 = vcombine.high %v5273_v50, %v5273_v50  ;;  %v5282_v38 = vrot.slane %v5266_v19, %v11278_v25  ;;  %v5289_v0 = vrot.slane %v5273_v50, %v11278_v25 }
 0x54e   : > { %v4556_v61 = vpop.f32.mrf.mxu0  ;;  %v12871_v14 = vrot.slane %v5217_v28, %v11278_v25  ;;  %v12874_v62 = vrot.slane %v5224_v53, %v11278_v25  ;;  %10410 = vmatpush3.bf16.msra.mxu0 %v10682_v20  ;;  %v10684_v28 = vld [vmem:[%s14798_s11 + $0x10] sm:$0xff]  }
 0x54f   : > { %v12877_v2 = vrot.slane %v5274_v48, %v11278_v25  ;;  %v12880_v23 = vrot.slane %v5275_v31, %v11278_v25  ;;  %v12882_v22 = vcombine.high %v5282_v38, %v5282_v38  ;;  %v12884_v16 = vcombine.high %v5289_v0, %v5289_v0  ;;  %10411 = vmatprep.subr.bf16.mxu0 %v10683_v32 }
 0x550   : > { %v5357_v50 = vunpack.i.h.s16 %v5282_v38  ;;  %v5365_v19 = vunpack.i.h.s16 %v5289_v0  ;;  %v9615_v61 = vpack.i.b16 %v5282_v38, %v5282_v38  ;;  %v9619_v11 = vpack.i.b16 %v5289_v0, %v5289_v0 }
 0x551   : > { %15075 = vst [vmem:[#allocation92_spill] sm:$0xff] %v12877_v2  ;;  %15076 = vst [vmem:[#allocation93_spill] sm:$0xff] %v12880_v23  ;;  %v12891_v53 = vcombine.high %v12877_v2, %v12877_v2  ;;  %v12895_v48 = vcombine.high %v12880_v23, %v12880_v23  ;;  %v5359_v31 = vunpack.i.h.s16 %v12877_v2  ;;  %v5361_v20 = vunpack.i.h.s16 %v12882_v22 }
 0x552   : > { %15077 = vst [vmem:[#allocation94_spill] sm:$0xff] %v12882_v22  ;;  %15078 = vst [vmem:[#allocation95_spill] sm:$0xff] %v12884_v16  ;;  %v5367_v38 = vunpack.i.h.s16 %v12880_v23  ;;  %v5369_v0 = vunpack.i.h.s16 %v12884_v16  ;;  %v12901_v7 = vpack.i.b16 %v5357_v50, %v5357_v50  ;;  %10412 = vmatpush3.bf16.msra.mxu0 %v10683_v32  ;;  %v12915_v50 = vpack.i.b16 %v5365_v19, %v5365_v19 }
 0x553   : > { %15079 = vst [vmem:[#allocation96_spill] sm:$0xff] %v12891_v53  ;;  %15080 = vst [vmem:[#allocation97_spill] sm:$0xff] %v12895_v48  ;;  %v5363_v60 = vunpack.i.h.s16 %v12891_v53  ;;  %v5371_v26 = vunpack.i.h.s16 %v12895_v48  ;;  %v12907_v63 = vpack.i.b16 %v5359_v31, %v5359_v31  ;;  %v12911_v1 = vpack.i.b16 %v5361_v20, %v5361_v20  ;;  %10413 = vmatprep.subr.bf16.mxu0 %v10684_v28  ;;  %v10685_v31 = vld [vmem:[%s14798_s11 + $0x8] sm:$0xff]  }
 0x554   : > { %15081 = vst [vmem:[#allocation98_spill] sm:$0xff] %v12901_v7  ;;  %15084 = vst [vmem:[#allocation101_spill] sm:$0xff] %v12915_v50  ;;  %v12924_v2 = vpack.i.b16 %v5367_v38, %v5367_v38  ;;  %v12928_v20 = vpack.i.b16 %v5369_v0, %v5369_v0  ;;  %v12935_v39 = vrot.slane %v9615_v61, %v11351_v59  ;;  %v5349_v19 = vunpack.i.h.s16 %v12874_v62  ;;  %v12973_v50 = vpop.f32.mrf.mxu1 }
 0x555   : > { %15082 = vst [vmem:[#allocation99_spill] sm:$0xff] %v12907_v63  ;;  %15083 = vst [vmem:[#allocation100_spill] sm:$0xff] %v12911_v1  ;;  %v12922_v63 = vpack.i.b16 %v5363_v60, %v5363_v60  ;;  %v12932_v35 = vpack.i.b16 %v5371_v26, %v5371_v26  ;;  %v12940_v60 = vrot.slane %v9619_v11, %v11351_v59  ;;  %v5341_v11 = vunpack.i.h.s16 %v12871_v14 }
 0x556   : > { %15086 = vst [vmem:[#allocation103_spill] sm:$0xff] %v12924_v2  ;;  %15087 = vst [vmem:[#allocation104_spill] sm:$0xff] %v12928_v20  ;;  %v12945_v0 = vrot.slane %v5225_v34, %v11278_v25  ;;  %v12948_v32 = vrot.slane %v5226_v15, %v11278_v25  ;;  %10414 = vmatpush3.bf16.msra.mxu0 %v10684_v28  ;;  %v12952_v26 = vcombine.high %v12871_v14, %v12871_v14  ;;  %v10686_v34 = vld [vmem:[%s14798_s11] sm:$0xff]   ;;  %v13003_v23 = vpop.f32.mrf.mxu1 }
 0x557   : > { %15085 = vst [vmem:[#allocation102_spill] sm:$0xff] %v12922_v63  ;;  %15088 = vst [vmem:[#allocation105_spill] sm:$0xff] %v12932_v35  ;;  %v12956_v61 = vcombine.high %v12874_v62, %v12874_v62  ;;  %10415 = vmatprep.subr.bf16.mxu0 %v10685_v31  ;;  %v9607_v48 = vpack.i.b16 %v12871_v14, %v12871_v14  ;;  %v12979_v20 = vpack.i.b16 %v5341_v11, %v5341_v11 }
 0x558   : > { %15089 = vst [vmem:[#allocation106_spill] sm:$0xff] %v12935_v39  ;;  %15090 = vst [vmem:[#allocation107_spill] sm:$0xff] %v12940_v60  ;;  %v12965_v15 = vcombine.high %v12945_v0, %v12945_v0  ;;  %v12969_v28 = vcombine.high %v12948_v32, %v12948_v32  ;;  %v5343_v38 = vunpack.i.h.s16 %v12945_v0  ;;  %v5351_v47 = vunpack.i.h.s16 %v12948_v32  ;;  %v13040_v22 = vpop.f32.mrf.mxu1 }
 0x559   : > { %15091 = vst [vmem:[#allocation108_spill] sm:$0xff] %v12945_v0  ;;  %15092 = vst [vmem:[#allocation109_spill] sm:$0xff] %v12948_v32  ;;  %v5345_v60 = vunpack.i.h.s16 %v12952_v26  ;;  %v5353_v35 = vunpack.i.h.s16 %v12956_v61  ;;  %v9611_v11 = vpack.i.b16 %v12874_v62, %v12874_v62  ;;  %v12997_v1 = vpack.i.b16 %v5349_v19, %v5349_v19 }
 0x55a   : > { %15093 = vst [vmem:[#allocation110_spill] sm:$0xff] %v12952_v26  ;;  %15094 = vst [vmem:[#allocation111_spill] sm:$0xff] %v12956_v61  ;;  %v5347_v16 = vunpack.i.h.s16 %v12965_v15  ;;  %v5355_v2 = vunpack.i.h.s16 %v12969_v28  ;;  %v12985_v7 = vpack.i.b16 %v5343_v38, %v5343_v38  ;;  %10416 = vmatpush3.bf16.msra.mxu0 %v10685_v31  ;;  %v13001_v31 = vpack.i.b16 %v5351_v47, %v5351_v47 }
 0x55b   : > { %15095 = vst [vmem:[#allocation112_spill] sm:$0xff] %v12965_v15  ;;  %15096 = vst [vmem:[#allocation113_spill] sm:$0xff] %v12969_v28  ;;  %v12989_v63 = vpack.i.b16 %v5345_v60, %v5345_v60  ;;  %10417 = vmatprep.subr.bf16.mxu0 %v10686_v34  ;;  %v13007_v39 = vpack.i.b16 %v5353_v35, %v5353_v35  ;;  %v13019_v47 = vrot.slane %v9611_v11, %v11351_v59  ;;  %v13052_v60 = vpop.f32.mrf.mxu1 }
 0x55c   : > { %15097 = vst [vmem:[#allocation114_spill] sm:$0xff] %v12979_v20  ;;  %15098 = vst [vmem:[#allocation115_spill] sm:$0xff] %v12985_v7  ;;  %v12995_v53 = vpack.i.b16 %v5347_v16, %v5347_v16  ;;  %v13011_v14 = vpack.i.b16 %v5355_v2, %v5355_v2  ;;  %v13014_v16 = vrot.slane %v9607_v48, %v11351_v59 }
 0x55d   : > { %15099 = vst [vmem:[#allocation116_spill] sm:$0xff] %v12989_v63  ;;  %15101 = vst [vmem:[#allocation118_spill] sm:$0xff] %v12997_v1  ;;  %v6272_v35 = vcombine.high %v12855_v40, %v12855_v40  ;;  %v6273_v2 = vcombine.high %v12858_v58, %v12858_v58  ;;  %v6280_v48 = vrot.slane %v12855_v40, %v11278_v25 }
 0x55e   : > { %15100 = vst [vmem:[#allocation117_spill] sm:$0xff] %v12995_v53  ;;  %15102 = vst [vmem:[#allocation119_spill] sm:$0xff] %v13001_v31  ;;  %10418 = vmatpush3.bf16.msra.mxu0 %v10686_v34  ;;  %v6287_v62 = vrot.slane %v12858_v58, %v11278_v25  ;;  %v6215_v11 = vrot.slane %v12861_v44, %v11278_v25  ;;  %v15107_v38 = vpack.c.bf16 %v12845_v46, %v12845_v46 }
 0x55f   : > { %15103 = vst [vmem:[#allocation120_spill] sm:$0xff] %v13007_v39  ;;  %15104 = vst [vmem:[#allocation121_spill] sm:$0xff] %v13011_v14  ;;  %v13043_v40 = vrot.slane %v6272_v35, %v11278_v25  ;;  %v13046_v58 = vrot.slane %v6273_v2, %v11278_v25  ;;  %v13048_v1 = vcombine.high %v6280_v48, %v6280_v48 }
 0x560   : > { %15105 = vst [vmem:[#allocation122_spill] sm:$0xff] %v13014_v16  ;;  %15106 = vst [vmem:[#allocation123_spill] sm:$0xff] %v13019_v47  ;;  %v6222_v34 = vrot.slane %v15107_v38, %v11278_v25  ;;  %v13050_v44 = vcombine.high %v6287_v62, %v6287_v62  ;;  %v6421_v47 = vunpack.i.h.s16 %v6280_v48  ;;  %v6429_v46 = vunpack.i.h.s16 %v6287_v62 }
 0x561   : > { %15108 = vst [vmem:[#allocation124_spill] sm:$0xff] %v13043_v40  ;;  %15109 = vst [vmem:[#allocation125_spill] sm:$0xff] %v13046_v58  ;;  %v9639_v38 = vpack.i.b16 %v6280_v48, %v6280_v48  ;;  %v9643_v14 = vpack.i.b16 %v6287_v62, %v6287_v62  ;;  %v13056_v19 = vcombine.high %v13043_v40, %v13043_v40  ;;  %v6423_v2 = vunpack.i.h.s16 %v13043_v40  ;;  %v13084_v62 = vpop.f32.mrf.mxu1 }
 0x562   : > { %15110 = vst [vmem:[#allocation126_spill] sm:$0xff] %v13048_v1  ;;  %15111 = vst [vmem:[#allocation127_spill] sm:$0xff] %v13050_v44  ;;  %v13060_v35 = vcombine.high %v13046_v58, %v13046_v58  ;;  %v6425_v28 = vunpack.i.h.s16 %v13048_v1  ;;  %v6431_v39 = vunpack.i.h.s16 %v13046_v58  ;;  %v6433_v61 = vunpack.i.h.s16 %v13050_v44 }
 0x563   : > { %15112 = vst [vmem:[#allocation128_spill] sm:$0xff] %v13056_v19  ;;  %v13066_v48 = vpack.i.b16 %v6421_v47, %v6421_v47  ;;  %v6427_v31 = vunpack.i.h.s16 %v13056_v19  ;;  %v13072_v20 = vpack.i.b16 %v6423_v2, %v6423_v2  ;;  %v13080_v63 = vpack.i.b16 %v6429_v46, %v6429_v46 }
 0x564   : > { %15113 = vst [vmem:[#allocation129_spill] sm:$0xff] %v13060_v35  ;;  %v6435_v32 = vunpack.i.h.s16 %v13060_v35  ;;  %v13076_v53 = vpack.i.b16 %v6425_v28, %v6425_v28  ;;  %v13088_v7 = vpack.i.b16 %v6431_v39, %v6431_v39  ;;  %v13092_v16 = vpack.i.b16 %v6433_v61, %v6433_v61 }
 0x565   : > { %15114 = vst [vmem:[#allocation130_spill] sm:$0xff] %v13066_v48  ;;  %15115 = vst [vmem:[#allocation131_spill] sm:$0xff] %v13072_v20  ;;  %v13086_v26 = vpack.i.b16 %v6427_v31, %v6427_v31  ;;  %v13099_v46 = vrot.slane %v9639_v38, %v11351_v59  ;;  %v13104_v31 = vrot.slane %v9643_v14, %v11351_v59 }
 0x566   : > { %15116 = vst [vmem:[#allocation132_spill] sm:$0xff] %v13076_v53  ;;  %15117 = vst [vmem:[#allocation133_spill] sm:$0xff] %v13080_v63  ;;  %v13096_v15 = vpack.i.b16 %v6435_v32, %v6435_v32  ;;  %v6223_v2 = vcombine.high %v6215_v11, %v6215_v11  ;;  %v6224_v61 = vcombine.high %v6222_v34, %v6222_v34 }
 0x567   : > { %15118 = vst [vmem:[#allocation134_spill] sm:$0xff] %v13086_v26  ;;  %15119 = vst [vmem:[#allocation135_spill] sm:$0xff] %v13088_v7  ;;  %v6231_v0 = vrot.slane %v6215_v11, %v11278_v25  ;;  %v6238_v28 = vrot.slane %v6222_v34, %v11278_v25  ;;  %v15124_v32 = vpack.i.b16 %v12651_v37, %v12651_v37 }
 0x568   : > { %15120 = vst [vmem:[#allocation136_spill] sm:$0xff] %v13092_v16  ;;  %15121 = vst [vmem:[#allocation137_spill] sm:$0xff] %v13096_v15  ;;  %v5835_v47 = vrot.slane %v12757_v51, %v11351_v59  ;;  %v13116_v15 = vpop.f32.mrf.mxu1  ;;  %v6245_v14 = vrot.slane %v6223_v2, %v11278_v25  ;;  %v13120_v39 = vrot.slane %v6224_v61, %v11278_v25 }
 0x569   : > { %15122 = vst [vmem:[#allocation138_spill] sm:$0xff] %v13099_v46  ;;  %15123 = vst [vmem:[#allocation139_spill] sm:$0xff] %v13104_v31  ;;  %v5831_v38 = vrot.slane %v15124_v32, %v11351_v59  ;;  %v15125_v11 = vpack.i.b16 %v12658_v8, %v12658_v8  ;;  %v5843_v63 = vrot.slane %v12763_v9, %v11351_v59  ;;  %v6405_v31 = vunpack.i.h.s16 %v6231_v0 }
 0x56a   : > { %v6253_v37 = vcombine.high %v6231_v0, %v6231_v0  ;;  %v13128_v32 = vcombine.high %v6238_v28, %v6238_v28  ;;  %v6413_v51 = vunpack.i.h.s16 %v6238_v28  ;;  %v6255_v35 = vcombine.high %v6245_v14, %v6245_v14  ;;  %v13138_v9 = vpop.f32.mrf.mxu1 }
 0x56b   : > { %v5839_v34 = vrot.slane %v15125_v11, %v11351_v59  ;;  %v13132_v2 = vcombine.high %v13120_v39, %v13120_v39  ;;  %v6407_v61 = vunpack.i.h.s16 %v6245_v14  ;;  %v6415_v16 = vunpack.i.h.s16 %v13120_v39  ;;  %15128 = vst [vmem:[#allocation142_spill] sm:$0xff] %v13138_v9 }
 0x56c   : > { %15126 = vst [vmem:[#allocation140_spill] sm:$0xff] %v13128_v32  ;;  %v6409_v44 = vunpack.i.h.s16 %v6253_v37  ;;  %v6417_v8 = vunpack.i.h.s16 %v13128_v32  ;;  %v9631_v11 = vpack.i.b16 %v6231_v0, %v6231_v0  ;;  %v13136_v7 = vpack.i.b16 %v6405_v31, %v6405_v31 }
 0x56d   : > { %15127 = vst [vmem:[#allocation141_spill] sm:$0xff] %v13132_v2  ;;  %v6411_v58 = vunpack.i.h.s16 %v6255_v35  ;;  %v6419_v48 = vunpack.i.h.s16 %v13132_v2  ;;  %v9632_v46 = vpack.i.b16 %v6245_v14, %v6245_v14  ;;  %v13141_v26 = vpack.i.b16 %v6407_v61, %v6407_v61 }
 0x56e   : > { %v9633_v19 = vpack.i.b16 %v6253_v37, %v6253_v37  ;;  %v13143_v53 = vpack.i.b16 %v6409_v44, %v6409_v44  ;;  %v9634_v1 = vpack.i.b16 %v6255_v35, %v6255_v35  ;;  %v9635_v20 = vpack.i.b16 %v6238_v28, %v6238_v28  ;;  %v13161_v35 = vpop.f32.mrf.mxu1 }
 0x56f   : > { %v13145_v40 = vpack.i.b16 %v6411_v58, %v6411_v58  ;;  %v13147_v4 = vpack.i.b16 %v6413_v51, %v6413_v51  ;;  %v13151_v31 = vpack.i.b16 %v6415_v16, %v6415_v16  ;;  %v13155_v14 = vpack.i.b16 %v6417_v8, %v6417_v8 }
 0x570   : > { %v13159_v37 = vpack.i.b16 %v6419_v48, %v6419_v48  ;;  %v13164_v58 = vrot.slane %v9631_v11, %v11351_v59  ;;  %v13169_v16 = vrot.slane %v9632_v46, %v11351_v59  ;;  %v13174_v61 = vrot.slane %v9633_v19, %v11351_v59 }
 0x571   : > { %15129 = vst [vmem:[#allocation143_spill] sm:$0xff] %v13147_v4  ;;  %15130 = vst [vmem:[#allocation144_spill] sm:$0xff] %v13151_v31  ;;  %v13179_v8 = vrot.slane %v9634_v1, %v11351_v59  ;;  %v13184_v44 = vrot.slane %v9635_v20, %v11351_v59  ;;  %v15134_v19 = vpack.i.b16 %v12737_v42, %v12737_v42 }
 0x572   : > { %15131 = vst [vmem:[#allocation145_spill] sm:$0xff] %v13155_v14  ;;  %15132 = vst [vmem:[#allocation146_spill] sm:$0xff] %v13159_v37  ;;  %v5851_v0 = vrot.slane %v12767_v54, %v11351_v59  ;;  %v6140_v1 = vsel %vm11468_vm7, %v12321_v13, %v12786_v56  ;;  %v15135_v20 = vrot.slane %v12753_v29, %v11351_v59  ;;  %v13214_v13 = vpop.f32.mrf.mxu1 }
 0x573   : > { %15133 = vst [vmem:[#allocation147_spill] sm:$0xff] %v13184_v44  ;;  %v5847_v9 = vrot.slane %v15134_v19, %v11351_v59  ;;  %v15136_v11 = vrot.slane %v12282_v10, %v11351_v59  ;;  %v6142_v42 = vsel %vm11468_vm7, %v12326_v27, %v5831_v38  ;;  %v15137_v54 = vrot.slane %v12294_v41, %v11351_v59 }
 0x574   : > { %v6144_v29 = vsel %vm11468_vm7, %v12331_v43, %v5839_v34  ;;  %v15138_v10 = vrot.slane %v12296_v57, %v11351_v59  ;;  %v15139_v41 = vrot.slane %v12302_v33, %v11351_v59  ;;  %v4151_v57 = vadd.f32 %v12973_v50, %v12563_v6  ;;  %v13247_v50 = vpop.f32.mrf.mxu1 }
 0x575   : > { %v6141_v46 = vsel %vm11468_vm7, %v15136_v11, %v15135_v20  ;;  %v6143_v19 = vsel %vm11468_vm7, %v15137_v54, %v5835_v47  ;;  %v6146_v27 = vsel %vm11468_vm7, %v12836_v52, %v5847_v9  ;;  %v14918_v34 = vrot.slane %v12759_v49, 1 }
 0x576   : > { %v6145_v56 = vsel %vm11468_vm7, %v15138_v10, %v5843_v63  ;;  %v6147_v47 = vsel %vm11468_vm7, %v15139_v41, %v5851_v0  ;;  %v7715_v38 = vcombine.low %v6140_v1, %v6141_v46  ;;  %v7716_v11 = vcombine.low %v6142_v42, %v6143_v19  ;;  %v13238_v63 = vld [vmem:[%s14797_s10] ss:$0 sm:$0xff] }
 0x577   : > { %v7717_v20 = vcombine.low %v6144_v29, %v6145_v56  ;;  %v7718_v43 = vcombine.low %v6146_v27, %v6147_v47  ;;  %v4172_v33 = vadd.f32 %v13238_v63, %v13003_v23  ;;  %v4169_v1 = vadd.f32 %v13238_v63, %v4151_v57 }
 0x578   : > { %v7725_v9 = vrot.slane %v7715_v38, %v11278_v25  ;;  %v7732_v0 = vrot.slane %v7716_v11, %v11278_v25  ;;  %v4154_v54 = vadd.f32 %v12451_v3, %v13040_v22  ;;  %v15140_v10 = vrot.slane %v12664_v36, 1 }
 0x579   : > { %v7739_v46 = vrot.slane %v7717_v20, %v11278_v25  ;;  %v7746_v6 = vrot.slane %v7718_v43, %v11278_v25  ;;  %v4827_v42 = vmax.f32 %v4172_v33, 0.0  ;;  %v15141_v56 = vrot.slane %v12585_v55, 1 }
 0x57a   : > { %v7747_v19 = vcombine.low %v7725_v9, %v7732_v0  ;;  %v15142_v41 = vrot.slane %v12692_v18, 1  ;;  %v15143_v47 = vrot.slane %v12634_v21, 1  ;;  %v4824_v11 = vmax.f32 %v4169_v1, 0.0 }
 0x57b   : > { %v7748_v29 = vcombine.low %v7739_v46, %v7746_v6  ;;  %v4332_v27 = vsel %vm1195_vm1, %v15141_v56, %v15140_v10  ;;  %v15144_v3 = vmax.f32 %v12848_v12, 0.0  ;;  %v9626_v20 = vpack.c.bf16 %v4827_v42, %v4827_v42  ;;  %v13274_v6 = vpop.f32.mrf.mxu1 }
 0x57c   : > { %v4334_v38 = vsel %vm1195_vm1, %v15143_v47, %v15142_v41  ;;  %v4170_v43 = vadd.f32 %v13238_v63, %v4154_v54  ;;  %v7755_v57 = vrot.slane %v7747_v19, %v11278_v25  ;;  %v4338_v9 = vsel %vm12134_vm11, %v4332_v27, 0.0  ;;  %v10374_v54 = vpop.f32.mrf.mxu0 }
 0x57d   : > { %v4831_v22 = vpack.c.bf16 %v4827_v42, %v15144_v3  ;;  %v7762_v33 = vrot.slane %v7748_v29, %v11278_v25  ;;  %v4336_v46 = vsel %vm12138_vm12, %v4334_v38, 0.0  ;;  %v6369_v12 = vrot.slane %v9626_v20, %v11278_v25  ;;  %v13300_v38 = vpop.f32.mrf.mxu1 }
 0x57e   : > { %v13278_v10 = vmax.f32 %v4170_v43, 0.0  ;;  %v4435_v42 = vadd.f32 %v13052_v60, %v4338_v9  ;;  %v13282_v29 = vadd.f32 %v13084_v62, %v4336_v46  ;;  %v15146_v56 = vrot.slane %v12664_v36, 1 }
 0x57f   : > { %v6362_v1 = vrot.slane %v4831_v22, %v11278_v25  ;;  %v7763_v19 = vcombine.low %v7755_v57, %v7762_v33  ;;  %v15147_v41 = vrot.slane %v12585_v55, 1  ;;  %v15148_v47 = vrot.slane %v12692_v18, 1 }
 0x580   : > { %v13290_v27 = vsel %vm1195_vm1, %v15146_v56, %v14918_v34  ;;  %v6371_v3 = vcombine.high %v6369_v12, %v6369_v12  ;;  %v6385_v36 = vrot.slane %v6369_v12, %v11278_v25  ;;  %v4830_v20 = vpack.c.bf16 %v13278_v10, %v4824_v11  ;;  %v13314_v11 = vpop.f32.mrf.mxu1 }
 0x581   : > { %v13298_v60 = vsel %vm1195_vm1, %v15148_v47, %v15147_v41  ;;  %v6370_v62 = vcombine.high %v6362_v1, %v6362_v1  ;;  %v6378_v22 = vrot.slane %v6362_v1, %v11278_v25  ;;  %10419 = vmatprep.mubr.bf16.mxu0 %v7763_v19  ;;  %v9625_v55 = vpack.c.bf16 %v13278_v10, %v13278_v10 }
 0x582   : > { %v4339_v43 = vsel %vm12288_vm14, %v13290_v27, 0.0  ;;  %v13310_v57 = vadd.f32 %v10374_v54, %v4435_v42  ;;  %v6399_v9 = vrot.slane %v6371_v3, %v11278_v25  ;;  %v6401_v1 = vcombine.high %v6385_v36, %v6385_v36  ;;  %v4559_v42 = vpop.f32.mrf.mxu0  ;;  %v13332_v37 = vpop.f32.mrf.mxu1 }
 0x583   : > { %v6392_v33 = vrot.slane %v6370_v62, %v11278_v25  ;;  %v6400_v46 = vcombine.high %v6378_v22, %v6378_v22  ;;  %v6453_v56 = vunpack.i.h.s16 %v6378_v22  ;;  %v6461_v12 = vunpack.i.h.s16 %v6385_v36 }
 0x584   : > { %v9655_v19 = vpack.i.b16 %v6378_v22, %v6378_v22  ;;  %v9659_v41 = vpack.i.b16 %v6385_v36, %v6385_v36  ;;  %v13318_v10 = vcombine.high %v6399_v9, %v6399_v9  ;;  %v6463_v54 = vunpack.i.h.s16 %v6399_v9 }
 0x585   : > { %v13316_v47 = vcombine.high %v6392_v33, %v6392_v33  ;;  %v6455_v48 = vunpack.i.h.s16 %v6392_v33  ;;  %v6457_v27 = vunpack.i.h.s16 %v6400_v46  ;;  %v6465_v51 = vunpack.i.h.s16 %v6401_v1 }
 0x586   : > { %15151 = vst [vmem:[#allocation22_spill] sm:$0xff] %v13318_v10  ;;  %v13320_v62 = vpack.i.b16 %v6453_v56, %v6453_v56  ;;  %v9656_v3 = vpack.i.b16 %v6392_v33, %v6392_v33  ;;  %v6467_v34 = vunpack.i.h.s16 %v13318_v10  ;;  %v9657_v36 = vpack.i.b16 %v6400_v46, %v6400_v46 }
 0x587   : > { %15150 = vst [vmem:[#allocation3_spill] sm:$0xff] %v13316_v47  ;;  %v6459_v28 = vunpack.i.h.s16 %v13316_v47  ;;  %v13324_v22 = vpack.i.b16 %v6455_v48, %v6455_v48  ;;  %v13326_v23 = vpack.i.b16 %v6457_v27, %v6457_v27  ;;  %v13330_v4 = vpack.i.b16 %v6461_v12, %v6461_v12  ;;  %v13340_v48 = vpop.f32.mrf.mxu0 }
 0x588   : > { %15152 = vst [vmem:[#allocation148_spill] sm:$0xff] %v13320_v62  ;;  %v9660_v44 = vpack.i.b16 %v6399_v9, %v6399_v9  ;;  %v13336_v33 = vpack.i.b16 %v6463_v54, %v6463_v54  ;;  %v9661_v2 = vpack.i.b16 %v6401_v1, %v6401_v1  ;;  %v13338_v14 = vpack.i.b16 %v6465_v51, %v6465_v51  ;;  %v13371_v9 = vpop.f32.mrf.mxu1 }
 0x589   : > { %15153 = vst [vmem:[#allocation149_spill] sm:$0xff] %v13324_v22  ;;  %15154 = vst [vmem:[#allocation150_spill] sm:$0xff] %v13326_v23  ;;  %v13334_v56 = vpack.i.b16 %v6459_v28, %v6459_v28  ;;  %v13344_v27 = vpack.i.b16 %v6467_v34, %v6467_v34  ;;  %v13347_v12 = vrot.slane %v9655_v19, %v11351_v59  ;;  %v4572_v52 = vpop.f32.mrf.mxu0 }
 0x58a   : > { %15155 = vst [vmem:[#allocation151_spill] sm:$0xff] %v13330_v4  ;;  %15157 = vst [vmem:[#allocation153_spill] sm:$0xff] %v13336_v33  ;;  %v13352_v28 = vrot.slane %v9656_v3, %v11351_v59  ;;  %v13357_v1 = vrot.slane %v9657_v36, %v11351_v59  ;;  %v13362_v34 = vrot.slane %v9659_v41, %v11351_v59 }
 0x58b   : > { %15156 = vst [vmem:[#allocation152_spill] sm:$0xff] %v13334_v56  ;;  %15158 = vst [vmem:[#allocation154_spill] sm:$0xff] %v13338_v14  ;;  %v13367_v46 = vrot.slane %v9660_v44, %v11351_v59  ;;  %v13374_v36 = vrot.slane %v9661_v2, %v11351_v59  ;;  %v6313_v41 = vrot.slane %v4830_v20, %v11278_v25  ;;  %v15167_v2 = vrot.slane %v12795_v24, 1 }
 0x58c   : > { %15159 = vst [vmem:[#allocation155_spill] sm:$0xff] %v13344_v27  ;;  %15160 = vst [vmem:[#allocation156_spill] sm:$0xff] %v13347_v12  ;;  %v6320_v51 = vrot.slane %v9625_v55, %v11278_v25  ;;  %v4438_v19 = vadd.f32 %v13116_v15, %v4339_v43  ;;  %v13385_v3 = vadd.f32 %v4559_v42, %v13282_v29  ;;  %v15170_v43 = vld [vmem:[#allocation142_spill] sm:$0xff]  ;;  %v15172_v29 = vrot.slane %v12827_v30, 1 }
 0x58d   : > { %15161 = vst [vmem:[#allocation157_spill] sm:$0xff] %v13352_v28  ;;  %15162 = vst [vmem:[#allocation158_spill] sm:$0xff] %v13357_v1  ;;  %v6321_v20 = vcombine.high %v6313_v41, %v6313_v41  ;;  %v6329_v55 = vrot.slane %v6313_v41, %v11278_v25  ;;  %v15173_v42 = vrot.slane %v12759_v49, 1 }
 0x58e   : > { %15163 = vst [vmem:[#allocation159_spill] sm:$0xff] %v13362_v34  ;;  %15164 = vst [vmem:[#allocation160_spill] sm:$0xff] %v13367_v46  ;;  %v4337_v46 = vsel %vm12175_vm13, %v13298_v60, 0.0  ;;  %v6322_v14 = vcombine.high %v6320_v51, %v6320_v51  ;;  %v6336_v15 = vrot.slane %v6320_v51, %v11278_v25  ;;  %v13404_v10 = vadd.f32 %v4572_v52, %v4438_v19 }
 0x58f   : > { %15165 = vst [vmem:[#allocation161_spill] sm:$0xff] %v13374_v36  ;;  %v15168_v36 = vld [vmem:[#allocation83_spill] sm:$0xff]  ;;  %v4430_v4 = vadd.f32 %v15170_v43, %v4337_v46  ;;  %v4330_v27 = vsel %vm1195_vm1, %v15173_v42, %v15172_v29  ;;  %v13409_v41 = vrot.slane %v6321_v20, %v11278_v25  ;;  %v13414_v46 = vcombine.high %v6329_v55, %v6329_v55 }
 0x590   : > { %v15169_v33 = vrot.slane %v15168_v36, 1  ;;  %v13412_v51 = vrot.slane %v6322_v14, %v11278_v25  ;;  %v6445_v43 = vunpack.i.h.s16 %v6336_v15  ;;  %v9647_v49 = vpack.i.b16 %v6329_v55, %v6329_v55 }
 0x591   : > { %15174 = vst [vmem:[#allocation4_spill] sm:$0xff] %v13409_v41  ;;  %v9651_v23 = vpack.i.b16 %v6336_v15, %v6336_v15  ;;  %v13420_v52 = vcombine.high %v13409_v41, %v13409_v41  ;;  %v6439_v20 = vunpack.i.h.s16 %v13409_v41  ;;  %v6441_v14 = vunpack.i.h.s16 %v13414_v46  ;;  %v10378_v41 = vpop.f32.mrf.mxu0 }
 0x592   : > { %v4328_v54 = vsel %vm1195_vm1, %v15169_v33, %v15167_v2  ;;  %v13406_v33 = vpop.f32.mrf.mxu1  ;;  %v6437_v2 = vunpack.i.h.s16 %v6329_v55  ;;  %v13424_v19 = vcombine.high %v13412_v51, %v13412_v51  ;;  %v6447_v29 = vunpack.i.h.s16 %v13412_v51 }
 0x593   : > { %v4342_v60 = vsel %vm12316_vm15, %v4328_v54, 0.0  ;;  %v13416_v54 = vcombine.high %v6336_v15, %v6336_v15  ;;  %v6443_v22 = vunpack.i.h.s16 %v13420_v52  ;;  %v13438_v62 = vpack.i.b16 %v6439_v20, %v6439_v20 }
 0x594   : > { %v13430_v1 = vpack.i.b16 %v6437_v2, %v6437_v2  ;;  %v13434_v15 = vpop.f32.mrf.mxu1  ;;  %v6451_v28 = vunpack.i.h.s16 %v13424_v19  ;;  %v13442_v56 = vpack.i.b16 %v6441_v14, %v6441_v14  ;;  %v13446_v47 = vpack.i.b16 %v6445_v43, %v6445_v43 }
 0x595   : > { %v6449_v42 = vunpack.i.h.s16 %v13416_v54  ;;  %15175 = vst [vmem:[#allocation83_spill] sm:$0xff] %v13438_v62  ;;  %v13450_v32 = vpack.i.b16 %v6443_v22, %v6443_v22  ;;  %v13452_v31 = vpack.i.b16 %v6447_v29, %v6447_v29  ;;  %v13463_v43 = vrot.slane %v9647_v49, %v11351_v59 }
 0x596   : > { %15176 = vst [vmem:[#allocation142_spill] sm:$0xff] %v13446_v47  ;;  %v13460_v12 = vpack.i.b16 %v6451_v28, %v6451_v28  ;;  %v10402_v22 = vpop.f32.mrf.mxu1  ;;  %v13468_v29 = vrot.slane %v9651_v23, %v11351_v59  ;;  %v4340_v28 = vsel %vm12501_vm0, %v4330_v27, 0.0  ;;  %v15182_v49 = vrot.slane %v12634_v21, 1 }
 0x597   : > { %v13456_v62 = vpack.i.b16 %v6449_v42, %v6449_v42  ;;  %v15180_v42 = vld [vmem:[#allocation91_spill] sm:$0xff]  ;;  %v15184_v23 = vrot.slane %v15168_v36, 1 }
 0x598   : > { %15178 = vst [vmem:[#allocation162_spill] sm:$0xff] %v13460_v12  ;;  %15179 = vst [vmem:[#allocation163_spill] sm:$0xff] %v13468_v29  ;;  %v4596_v2 = vadd.f32 %v15180_v42, %v4430_v4  ;;  %v15183_v12 = vrot.slane %v12795_v24, 1  ;;  %v15185_v29 = vrot.slane %v12827_v30, 1  ;;  %v4575_v4 = vpop.f32.mrf.mxu0  ;;  %v4740_v30 = vrot.slane %v13314_v11, 1 }
 0x599   : > { %15177 = vst [vmem:[#allocation27_spill] sm:$0xff] %v13456_v62  ;;  %v4451_v62 = vadd.f32 %v13161_v35, %v4342_v60  ;;  %v4742_v35 = vrot.slane %v13300_v38, 1  ;;  %v4443_v60 = vadd.f32 %v13214_v13, %v4340_v28  ;;  %v4741_v13 = vrot.slane %v13371_v9, 1 }
 0x59a   : > { %v4335_v55 = vsel %vm1195_vm1, %v15183_v12, %v15182_v49  ;;  %v4329_v20 = vsel %vm1195_vm1, %v15185_v29, %v15184_v23  ;;  %v4743_v29 = vrot.slane %v13332_v37, 1  ;;  %v4720_v49 = vpop.f32.mrf.mxu1  ;;  %v4746_v38 = vrot.slane %v13406_v33, 1 }
 0x59b   : > { %v4343_v21 = vsel %vm12515_vm2, %v4335_v55, 0.0  ;;  %v4601_v42 = vadd.f32 %v10378_v41, %v4451_v62  ;;  %v4341_v47 = vsel %vm12523_vm3, %v4329_v20, 0.0  ;;  %v13498_v23 = vadd.f32 %v4575_v4, %v4443_v60 }
 0x59c   : > { %v4454_v12 = vadd.f32 %v13247_v50, %v4343_v21  ;;  %v4446_v36 = vadd.f32 %v13274_v6, %v4341_v47  ;;  %v4744_v62 = vrot.slane %v13434_v15, 1  ;;  %v4752_v50 = vsel %vm1195_vm1, %v4742_v35, %v4743_v29 }
 0x59d   : > { %v4747_v6 = vrot.slane %v10402_v22, 1  ;;  %v4773_v37 = vsel %vm12175_vm13, %v4752_v50, 0.0  ;;  %v4753_v11 = vsel %vm1195_vm1, %v4741_v13, %v4742_v35  ;;  %v4745_v9 = vrot.slane %v4720_v49, 1 }
 0x59e   : > { %v4795_v41 = vadd.f32 %v13238_v63, %v4454_v12  ;;  %v4600_v55 = vadd.f32 %v13340_v48, %v4446_v36  ;;  %v4751_v47 = vsel %vm1195_vm1, %v4743_v29, %v4744_v62  ;;  %v4781_v15 = vadd.f32 %v4773_v37, %v4596_v2 }
 0x59f   : > { %v4772_v20 = vsel %vm12138_vm12, %v4753_v11, 0.0  ;;  %v4774_v48 = vsel %vm12134_vm11, %v4751_v47, 0.0  ;;  %v4748_v28 = vsel %vm1195_vm1, %v4746_v38, %v4747_v6  ;;  %v4755_v4 = vsel %vm1195_vm1, %v4747_v6, %v4740_v30 }
 0x5a0   : > { %v4839_v33 = vmax.f32 %v4795_v41, 0.0  ;;  %v4780_v22 = vadd.f32 %v4772_v20, %v13385_v3  ;;  %v4782_v44 = vadd.f32 %v4774_v48, %v13310_v57  ;;  %v4789_v60 = vadd.f32 %v13238_v63, %v4781_v15 }
 0x5a1   : > { %v4777_v0 = vsel %vm12523_vm3, %v4748_v28, 0.0  ;;  %v4778_v17 = vsel %vm12316_vm15, %v4755_v4, 0.0  ;;  %v4749_v36 = vsel %vm1195_vm1, %v4745_v9, %v4746_v38  ;;  %v4750_v24 = vsel %vm1195_vm1, %v4744_v62, %v4745_v9  ;;  %v15201_v28 = vld [vmem:[#allocation67_spill] sm:$0xff] }
 0x5a2   : > { %v9630_v35 = vpack.c.bf16 %v4839_v33, %v4839_v33  ;;  %v4788_v2 = vadd.f32 %v13238_v63, %v4780_v22  ;;  %v13530_v3 = vadd.f32 %v13238_v63, %v4782_v44  ;;  %v4785_v57 = vadd.f32 %v4777_v0, %v4600_v55 }
 0x5a3   : > { %v4786_v27 = vadd.f32 %v4778_v17, %v4601_v42  ;;  %v4833_v12 = vmax.f32 %v4789_v60, 0.0  ;;  %v4775_v55 = vsel %vm12288_vm14, %v4750_v24, 0.0  ;;  %v4776_v5 = vsel %vm12501_vm0, %v4749_v36, 0.0 }
 0x5a4   : > { %v6633_v21 = vrot.slane %v9630_v35, %v11278_v25  ;;  %v4832_v30 = vmax.f32 %v4788_v2, 0.0  ;;  %v4834_v34 = vmax.f32 %v13530_v3, 0.0  ;;  %v4793_v29 = vadd.f32 %v13238_v63, %v4785_v57 }
 0x5a5   : > { %v4794_v49 = vadd.f32 %v13238_v63, %v4786_v27  ;;  %v9627_v42 = vpack.c.bf16 %v4833_v12, %v4833_v12  ;;  %vm8946_vm1 = vcmask 7168  }
 0x5a6   : > { %v6635_v13 = vcombine.high %v6633_v21, %v6633_v21  ;;  %v6649_v41 = vrot.slane %v6633_v21, %v11278_v25  ;;  %v4840_v50 = vpack.c.bf16 %v4833_v12, %v4832_v30  ;;  %v13543_v6 = vmax.f32 %v4793_v29, 0.0 }
 0x5a7   : > { %v4838_v38 = vmax.f32 %v4794_v49, 0.0  ;;  %v6486_v9 = vrot.slane %v9627_v42, %v11278_v25  ;;  %v4784_v42 = vadd.f32 %v4776_v5, %v13498_v23 }
 0x5a8   : > { %v13548_v62 = vrot.slane %v6635_v13, %v11278_v25  ;;  %v13550_v37 = vcombine.high %v6649_v41, %v6649_v41  ;;  %v6725_v11 = vunpack.i.h.s16 %v6649_v41  ;;  %v9691_v47 = vpack.i.b16 %v6649_v41, %v6649_v41 }
 0x5a9   : > { %v6479_v15 = vrot.slane %v4840_v50, %v11278_v25  ;;  %v4843_v18 = vpack.c.bf16 %v4839_v33, %v4838_v38  ;;  %v9629_v20 = vpack.c.bf16 %v13543_v6, %v13543_v6  ;;  %v6488_v35 = vcombine.high %v6486_v9, %v6486_v9 }
 0x5aa   : > { %v13558_v48 = vcombine.high %v13548_v62, %v13548_v62  ;;  %v6727_v14 = vunpack.i.h.s16 %v13548_v62  ;;  %v6729_v22 = vunpack.i.h.s16 %v13550_v37  ;;  %v13562_v44 = vpack.i.b16 %v6725_v11, %v6725_v11 }
 0x5ab   : > { %v13569_v33 = vrot.slane %v9691_v47, %v11351_v59  ;;  %v13581_v27 = vrot.slane %v6486_v9, %v11278_v25  ;;  %v13584_v21 = vrot.slane %v6488_v35, %v11278_v25  ;;  %v6487_v12 = vcombine.high %v6479_v15, %v6479_v15 }
 0x5ac   : > { %15188 = vst [vmem:[#allocation91_spill] sm:$0xff] %v13562_v44  ;;  %v6731_v60 = vunpack.i.h.s16 %v13558_v48  ;;  %v13572_v0 = vpack.i.b16 %v6727_v14, %v6727_v14  ;;  %v13574_v17 = vpack.i.b16 %v6729_v22, %v6729_v22  ;;  %v6495_v24 = vrot.slane %v6479_v15, %v11278_v25  ;;  %v15213_v44 = vld [vmem:[#allocation29_spill] sm:$0xff] }
 0x5ad   : > { %15189 = vst [vmem:[#allocation47_spill] sm:$0xff] %v13569_v33  ;;  %v6584_v30 = vrot.slane %v9629_v20, %v11278_v25  ;;  %v6626_v29 = vrot.slane %v4843_v18, %v11278_v25  ;;  %v13593_v49 = vcombine.high %v13581_v27, %v13581_v27  ;;  %v6509_v13 = vrot.slane %v6487_v12, %v11278_v25 }
 0x5ae   : > { %v13586_v36 = vpack.i.b16 %v6731_v60, %v6731_v60  ;;  %v4783_v41 = vadd.f32 %v4775_v55, %v13404_v10  ;;  %v6517_v50 = vcombine.high %v6495_v24, %v6495_v24  ;;  %v6669_v38 = vunpack.i.h.s16 %v6495_v24 }
 0x5af   : > { %v9663_v11 = vpack.i.b16 %v6495_v24, %v6495_v24  ;;  %v6586_v47 = vcombine.high %v6584_v30, %v6584_v30  ;;  %v6519_v9 = vcombine.high %v6509_v13, %v6509_v13  ;;  %v6671_v15 = vunpack.i.h.s16 %v6509_v13 }
 0x5b0   : > { %15190 = vst [vmem:[#allocation51_spill] sm:$0xff] %v13586_v36  ;;  %v9664_v14 = vpack.i.b16 %v6509_v13, %v6509_v13  ;;  %v13599_v20 = vrot.slane %v6584_v30, %v11278_v25  ;;  %v6673_v18 = vunpack.i.h.s16 %v6517_v50  ;;  %v7117_v22 = vpack.i.b16 %v6669_v38, %v6669_v38  ;;  %v15217_v36 = vld [vmem:[#allocation25_spill] sm:$0xff] }
 0x5b1   : > { %v9665_v35 = vpack.i.b16 %v6517_v50, %v6517_v50  ;;  %v7183_v60 = vrot.slane %v9663_v11, %v11351_v59  ;;  %v6675_v12 = vunpack.i.h.s16 %v6519_v9  ;;  %v7119_v57 = vpack.i.b16 %v6671_v15, %v6671_v15 }
 0x5b2   : > { %v9666_v10 = vpack.i.b16 %v6519_v9, %v6519_v9  ;;  %v7191_v23 = vrot.slane %v9664_v14, %v11351_v59  ;;  %v7121_v55 = vpack.i.b16 %v6673_v18, %v6673_v18  ;;  %v7187_v5 = vrot.slane %v7117_v22, %v11351_v59 }
 0x5b3   : > { %v7199_v24 = vrot.slane %v9665_v35, %v11351_v59  ;;  %v13606_v13 = vrot.slane %v6586_v47, %v11278_v25  ;;  %v7123_v30 = vpack.i.b16 %v6675_v12, %v6675_v12  ;;  %v7195_v2 = vrot.slane %v7119_v57, %v11351_v59 }
 0x5b4   : > { %v13611_v50 = vcombine.high %v13599_v20, %v13599_v20  ;;  %v6634_v38 = vcombine.high %v6626_v29, %v6626_v29  ;;  %v7203_v11 = vrot.slane %v7121_v55, %v11351_v59  ;;  %v13615_v9 = vrot.slane %v6626_v29, %v11278_v25 }
 0x5b5   : > { %v4791_v15 = vadd.f32 %v13238_v63, %v4783_v41  ;;  %v4792_v14 = vadd.f32 %v13238_v63, %v4784_v42  ;;  %v7207_v18 = vrot.slane %v9666_v10, %v11351_v59  ;;  %v7211_v57 = vrot.slane %v7123_v30, %v11351_v59 }
 0x5b6   : > { %v13620_v47 = vrot.slane %v6634_v38, %v11278_v25  ;;  %v7500_v22 = vsel %vm11468_vm7, %v13164_v58, %v7183_v60  ;;  %v13629_v35 = vcombine.high %v13615_v9, %v13615_v9  ;;  %v15191_v63 = vrot.slane %v13136_v7, %v11351_v59 }
 0x5b7   : > { %v4835_v29 = vmax.f32 %v4791_v15, 0.0  ;;  %v4836_v12 = vmax.f32 %v4792_v14, 0.0  ;;  %v7502_v42 = vsel %vm11468_vm7, %v13169_v16, %v7191_v23  ;;  %v15192_v10 = vrot.slane %v13141_v26, %v11351_v59 }
 0x5b8   : > { %v7501_v41 = vsel %vm11468_vm7, %v15191_v63, %v7187_v5  ;;  %v7504_v60 = vsel %vm11468_vm7, %v13174_v61, %v7199_v24  ;;  %v15193_v7 = vrot.slane %v13143_v53, %v11351_v59  ;;  %v7506_v26 = vsel %vm11468_vm7, %v13179_v8, %v7207_v18 }
 0x5b9   : > { %v7503_v58 = vsel %vm11468_vm7, %v15192_v10, %v7195_v2  ;;  %v4841_v5 = vpack.c.bf16 %v4835_v29, %v4834_v34  ;;  %v4842_v16 = vpack.c.bf16 %v13543_v6, %v4836_v12  ;;  %v9628_v23 = vpack.c.bf16 %v4835_v29, %v4835_v29 }
 0x5ba   : > { %v7505_v55 = vsel %vm11468_vm7, %v15193_v7, %v7203_v11  ;;  %v15194_v2 = vrot.slane %v13145_v40, %v11351_v59  ;;  %v7764_v53 = vcombine.low %v7500_v22, %v7501_v41  ;;  %v7765_v24 = vcombine.low %v7502_v42, %v7503_v58  ;;  %v15195_v40 = vld [vmem:[#allocation21_spill] sm:$0xff] }
 0x5bb   : > { %v7766_v30 = vcombine.low %v7504_v60, %v7505_v55  ;;  %v6528_v38 = vrot.slane %v4841_v5, %v11278_v25  ;;  %v6535_v3 = vrot.slane %v9628_v23, %v11278_v25  ;;  %v6577_v34 = vrot.slane %v4842_v16, %v11278_v25 }
 0x5bc   : > { %v7507_v61 = vsel %vm11468_vm7, %v15194_v2, %v7211_v57  ;;  %v7774_v11 = vrot.slane %v7764_v53, %v11278_v25  ;;  %v7781_v8 = vrot.slane %v7765_v24, %v11278_v25  ;;  %v15196_v14 = vpack.i.b16 %v15195_v40, %v15195_v40  ;;  %v15198_v40 = vld [vmem:[#allocation66_spill] sm:$0xff] }
 0x5bd   : > { %v7767_v6 = vcombine.low %v7506_v26, %v7507_v61  ;;  %v7788_v15 = vrot.slane %v7766_v30, %v11278_v25  ;;  %v6536_v57 = vcombine.high %v6528_v38, %v6528_v38  ;;  %v6537_v22 = vcombine.high %v6535_v3, %v6535_v3  ;;  %v15207_v26 = vld [vmem:[#allocation90_spill] sm:$0xff] }
 0x5be   : > { %v5495_v18 = vrot.slane %v15196_v14, %v11351_v59  ;;  %v13674_v29 = vrot.slane %v6528_v38, %v11278_v25  ;;  %v13677_v12 = vrot.slane %v6535_v3, %v11278_v25  ;;  %v6585_v63 = vcombine.high %v6577_v34, %v6577_v34  ;;  %v15209_v24 = vld [vmem:[#allocation86_spill] sm:$0xff] }
 0x5bf   : > { %v13680_v41 = vrot.slane %v6577_v34, %v11278_v25  ;;  %v7795_v42 = vrot.slane %v7767_v6, %v11278_v25  ;;  %v7796_v10 = vcombine.low %v7774_v11, %v7781_v8  ;;  %v13684_v58 = vrot.slane %v6536_v57, %v11278_v25  ;;  %v15197_v11 = vld [vmem:[#allocation26_spill] sm:$0xff] }
 0x5c0   : > { %v13687_v60 = vrot.slane %v6537_v22, %v11278_v25  ;;  %v13691_v7 = vcombine.high %v13674_v29, %v13674_v29  ;;  %v13695_v55 = vcombine.high %v13677_v12, %v13677_v12  ;;  %v13698_v5 = vrot.slane %v6585_v63, %v11278_v25  ;;  %v15200_v22 = vld [vmem:[#allocation87_spill] sm:$0xff] }
 0x5c1   : > { %v13702_v16 = vcombine.high %v13680_v41, %v13680_v41  ;;  %v13708_v2 = vcombine.high %v13684_v58, %v13684_v58  ;;  %v7797_v34 = vcombine.low %v7788_v15, %v7795_v42  ;;  %v7804_v6 = vrot.slane %v7796_v10, %v11278_v25  ;;  %v15203_v42 = vld [vmem:[#allocation88_spill] sm:$0xff] }
 0x5c2   : > { %v13712_v61 = vcombine.high %v13687_v60, %v13687_v60  ;;  %v13719_v30 = vcombine.high %v13698_v5, %v13698_v5  ;;  %v5499_v8 = vrot.slane %v15197_v11, %v11351_v59  ;;  %v15199_v14 = vpack.i.b16 %v15198_v40, %v15198_v40  ;;  %v15204_v11 = vld [vmem:[#allocation85_spill] sm:$0xff] }
 0x5c3   : > { %v5867_v63 = vrot.slane %v15200_v22, %v11351_v59  ;;  %v7811_v4 = vrot.slane %v7797_v34, %v11278_v25  ;;  %v15202_v3 = vpack.i.b16 %v15201_v28, %v15201_v28  ;;  %v5875_v10 = vrot.slane %v15203_v42, %v11351_v59  ;;  %v15206_v40 = vld [vmem:[#allocation89_spill] sm:$0xff]  ;;  %v15208_v22 = vld [vmem:[#allocation28_spill] sm:$0xff] }
 0x5c4   : > { %v5863_v57 = vrot.slane %v15199_v14, %v11351_v59  ;;  %v15205_v53 = vpack.i.b16 %v15204_v11, %v15204_v11  ;;  %v5883_v14 = vrot.slane %v15206_v40, %v11351_v59  ;;  %v6148_v34 = vsel %vm11468_vm7, %v15208_v22, %v15207_v26  ;;  %v15214_v40 = vld [vmem:[#allocation24_spill] sm:$0xff]  ;;  %v15216_v22 = vld [vmem:[#allocation30_spill] sm:$0xff] }
 0x5c5   : > { %v5871_v15 = vrot.slane %v15202_v3, %v11351_v59  ;;  %v15210_v28 = vrot.slane %v15209_v24, %v11351_v59  ;;  %v15211_v3 = vld [vmem:[#allocation23_spill] sm:$0xff]  ;;  %v7812_v11 = vcombine.low %v7804_v6, %v7811_v4  ;;  %v15215_v33 = vrot.slane %v15214_v40, %v11351_v59 }
 0x5c6   : > { %v5879_v38 = vrot.slane %v15205_v53, %v11351_v59  ;;  %v15212_v23 = vrot.slane %v15211_v3, %v11351_v59  ;;  %v6150_v53 = vsel %vm11468_vm7, %v15213_v44, %v5863_v57  ;;  %v15218_v3 = vrot.slane %v15217_v36, %v11351_v59 }
 0x5c7   : > { %v6151_v26 = vsel %vm11468_vm7, %v15215_v33, %v5867_v63  ;;  %v6152_v24 = vsel %vm11468_vm7, %v15216_v22, %v5871_v15  ;;  %v6155_v4 = vsel %vm11468_vm7, %v5499_v8, %v5883_v14  ;;  %10420 = vmatmul.mubr.bf16.vlgmr.msra.gmra.mxu0 %v7812_v11  ;;  %v6520_v15 = vcombine.high %v13584_v21, %v13584_v21  ;;  %v15220_v11 = vld [vmem:[#allocation144_spill] sm:$0xff] }
 0x5c8   : > { %v6149_v42 = vsel %vm11468_vm7, %v15212_v23, %v15210_v28  ;;  %v6153_v23 = vsel %vm11468_vm7, %v15218_v3, %v5875_v10  ;;  %v6154_v44 = vsel %vm11468_vm7, %v5495_v18, %v5879_v38  ;;  %v7814_v57 = vcombine.low %v6150_v53, %v6151_v26  ;;  %v15221_v22 = vld [vmem:[#allocation140_spill] sm:$0xff] }
 0x5c9   : > { %v7813_v6 = vcombine.low %v6148_v34, %v6149_v42  ;;  %v7815_v33 = vcombine.low %v6152_v24, %v6153_v23  ;;  %v7816_v63 = vcombine.low %v6154_v44, %v6155_v4  ;;  %v6677_v28 = vunpack.i.h.s16 %v13581_v27  ;;  %v15223_v23 = vld [vmem:[#allocation145_spill] sm:$0xff] }
 0x5ca   : > { %v7830_v10 = vrot.slane %v7814_v57, %v11278_v25  ;;  %v6679_v40 = vunpack.i.h.s16 %v13584_v21  ;;  %v6681_v18 = vunpack.i.h.s16 %v13593_v49  ;;  %v6683_v14 = vunpack.i.h.s16 %v6520_v15 }
 0x5cb   : > { %v7823_v36 = vrot.slane %v7813_v6, %v11278_v25  ;;  %v7837_v38 = vrot.slane %v7815_v33, %v11278_v25  ;;  %v7844_v8 = vrot.slane %v7816_v63, %v11278_v25  ;;  %v15219_v34 = vpack.i.b16 %v13120_v39, %v13120_v39  ;;  %v15224_v6 = vld [vmem:[#allocation141_spill] sm:$0xff]  ;;  %v15226_v39 = vld [vmem:[#allocation146_spill] sm:$0xff] }
 0x5cc   : > { %v6843_v26 = vrot.slane %v15220_v11, %v11351_v59  ;;  %v15222_v24 = vpack.i.b16 %v15221_v22, %v15221_v22  ;;  %v6851_v44 = vrot.slane %v15223_v23, %v11351_v59  ;;  %v15225_v57 = vpack.i.b16 %v15224_v6, %v15224_v6 }
 0x5cd   : > { %v6839_v42 = vrot.slane %v15219_v34, %v11351_v59  ;;  %v7845_v53 = vcombine.low %v7823_v36, %v7830_v10  ;;  %v7846_v4 = vcombine.low %v7837_v38, %v7844_v8  ;;  %v6859_v63 = vrot.slane %v15226_v39, %v11351_v59 }
 0x5ce   : > { %v6847_v3 = vrot.slane %v15222_v24, %v11351_v59  ;;  %v6855_v33 = vrot.slane %v15225_v57, %v11351_v59  ;;  %v9667_v36 = vpack.i.b16 %v13581_v27, %v13581_v27  ;;  %v7125_v34 = vpack.i.b16 %v6677_v28, %v6677_v28 }
 0x5cf   : > { %v7853_v10 = vrot.slane %v7845_v53, %v11278_v25  ;;  %v9668_v11 = vpack.i.b16 %v13584_v21, %v13584_v21  ;;  %v7127_v22 = vpack.i.b16 %v6679_v40, %v6679_v40  ;;  %v7860_v38 = vrot.slane %v7846_v4, %v11278_v25 }
 0x5d0   : > { %v9669_v8 = vpack.i.b16 %v13593_v49, %v13593_v49  ;;  %v7129_v24 = vpack.i.b16 %v6681_v18, %v6681_v18  ;;  %v9670_v23 = vpack.i.b16 %v6520_v15, %v6520_v15  ;;  %v7131_v6 = vpack.i.b16 %v6683_v14, %v6683_v14  ;;  %v15227_v18 = vld [vmem:[#allocation147_spill] sm:$0xff] }
 0x5d1   : > { %v7215_v57 = vrot.slane %v9667_v36, %v11351_v59  ;;  %v7219_v39 = vrot.slane %v7125_v34, %v11351_v59  ;;  %v7223_v27 = vrot.slane %v9668_v11, %v11351_v59  ;;  %v7861_v53 = vcombine.low %v7853_v10, %v7860_v38  ;;  %v15228_v14 = vld [vmem:[#allocation143_spill] sm:$0xff] }
 0x5d2   : > { %v7227_v28 = vrot.slane %v7127_v22, %v11351_v59  ;;  %v7231_v21 = vrot.slane %v9669_v8, %v11351_v59  ;;  %v7235_v40 = vrot.slane %v7129_v24, %v11351_v59  ;;  %v7239_v4 = vrot.slane %v9670_v23, %v11351_v59 }
 0x5d3   : > { %v7243_v49 = vrot.slane %v7131_v6, %v11351_v59  ;;  %v7508_v15 = vsel %vm11468_vm7, %v15227_v18, %v7215_v57  ;;  %v15229_v36 = vrot.slane %v15228_v14, %v11351_v59  ;;  %10423 = vmatprep.mubr.bf16.mxu0 %v7861_v53  ;;  %v7510_v34 = vsel %vm11468_vm7, %v6839_v42, %v7223_v27  ;;  %v15230_v42 = vld [vmem:[#allocation5_spill] sm:$0xff] }
 0x5d4   : > { %v7511_v11 = vsel %vm11468_vm7, %v6843_v26, %v7227_v28  ;;  %v7512_v22 = vsel %vm11468_vm7, %v6847_v3, %v7231_v21  ;;  %v7513_v38 = vsel %vm11468_vm7, %v6851_v44, %v7235_v40  ;;  %v7514_v8 = vsel %vm11468_vm7, %v6855_v33, %v7239_v4  ;;  %v15232_v3 = vld [vmem:[#allocation11_spill] sm:$0xff]  ;;  %v15233_v33 = vld [vmem:[#allocation68_spill] sm:$0xff] }
 0x5d5   : > { %v7509_v10 = vsel %vm11468_vm7, %v15229_v36, %v7219_v39  ;;  %v7515_v24 = vsel %vm11468_vm7, %v6859_v63, %v7243_v49  ;;  %v7863_v6 = vcombine.low %v7510_v34, %v7511_v11  ;;  %v7864_v57 = vcombine.low %v7512_v22, %v7513_v38  ;;  %v15235_v40 = vld [vmem:[#allocation75_spill] sm:$0xff]  ;;  %v15239_v22 = vld [vmem:[#allocation72_spill] sm:$0xff] }
 0x5d6   : > { %v7862_v23 = vcombine.low %v7508_v15, %v7509_v10  ;;  %v7865_v39 = vcombine.low %v7514_v8, %v7515_v24  ;;  %v15231_v26 = vpack.i.b16 %v15230_v42, %v15230_v42  ;;  %v5531_v53 = vrot.slane %v15232_v3, %v11351_v59  ;;  %v15236_v15 = vld [vmem:[#allocation70_spill] sm:$0xff]  ;;  %v15238_v10 = vld [vmem:[#allocation76_spill] sm:$0xff] }
 0x5d7   : > { %v7879_v28 = vrot.slane %v7863_v6, %v11278_v25  ;;  %v15234_v63 = vpack.i.b16 %v15233_v33, %v15233_v33  ;;  %v5899_v4 = vrot.slane %v15235_v40, %v11351_v59  ;;  %v7886_v49 = vrot.slane %v7864_v57, %v11278_v25  ;;  %v15241_v24 = vld [vmem:[#allocation78_spill] sm:$0xff]  ;;  %v15243_v57 = vld [vmem:[#allocation15_spill] sm:$0xff] }
 0x5d8   : > { %v5527_v27 = vrot.slane %v15231_v26, %v11351_v59  ;;  %v7872_v44 = vrot.slane %v7862_v23, %v11278_v25  ;;  %v7893_v18 = vrot.slane %v7865_v39, %v11278_v25  ;;  %v15237_v14 = vpack.i.b16 %v15236_v15, %v15236_v15  ;;  %v15242_v6 = vld [vmem:[#allocation82_spill] sm:$0xff]  ;;  %v15246_v33 = vld [vmem:[#allocation7_spill] sm:$0xff]  ;;  %v15249_v15 = vld [vmem:[#allocation8_spill] sm:$0xff] }
 0x5d9   : > { %v5895_v21 = vrot.slane %v15234_v63, %v11351_v59  ;;  %v5907_v34 = vrot.slane %v15238_v10, %v11351_v59  ;;  %v15240_v38 = vpack.i.b16 %v15239_v22, %v15239_v22  ;;  %v5915_v23 = vrot.slane %v15241_v24, %v11351_v59  ;;  %v15244_v26 = vld [vmem:[#allocation74_spill] sm:$0xff]  ;;  %v15248_v63 = vld [vmem:[#allocation16_spill] sm:$0xff] }
 0x5da   : > { %v5903_v36 = vrot.slane %v15237_v14, %v11351_v59  ;;  %v7894_v11 = vcombine.low %v7872_v44, %v7879_v28  ;;  %v6156_v39 = vsel %vm11468_vm7, %v15243_v57, %v15242_v6  ;;  %v7895_v42 = vcombine.low %v7886_v49, %v7893_v18  ;;  %v15251_v18 = vld [vmem:[#allocation17_spill] sm:$0xff] }
 0x5db   : > { %v5911_v8 = vrot.slane %v15240_v38, %v11351_v59  ;;  %v15245_v3 = vrot.slane %v15244_v26, %v11351_v59  ;;  %v15247_v44 = vrot.slane %v15246_v33, %v11351_v59  ;;  %v6158_v40 = vsel %vm11468_vm7, %v15248_v63, %v5895_v21  ;;  %v15252_v38 = vld [vmem:[#allocation9_spill] sm:$0xff] }
 0x5dc   : > { %v15250_v14 = vrot.slane %v15249_v15, %v11351_v59  ;;  %v7902_v49 = vrot.slane %v7894_v11, %v11278_v25  ;;  %v6160_v22 = vsel %vm11468_vm7, %v15251_v18, %v5903_v36  ;;  %v15253_v24 = vrot.slane %v15252_v38, %v11351_v59 }
 0x5dd   : > { %v6157_v28 = vsel %vm11468_vm7, %v15247_v44, %v15245_v3  ;;  %v6162_v21 = vsel %vm11468_vm7, %v5527_v27, %v5911_v8  ;;  %v7909_v57 = vrot.slane %v7895_v42, %v11278_v25  ;;  %v6687_v36 = vunpack.i.h.s16 %v13684_v58 }
 0x5de   : > { %v6159_v10 = vsel %vm11468_vm7, %v15250_v14, %v5899_v4  ;;  %v6161_v6 = vsel %vm11468_vm7, %v15253_v24, %v5907_v34  ;;  %v6163_v4 = vsel %vm11468_vm7, %v5531_v53, %v5915_v23  ;;  %v7911_v26 = vcombine.low %v6156_v39, %v6157_v28  ;;  %v15254_v53 = vld [vmem:[#allocation124_spill] sm:$0xff]  ;;  %v15256_v28 = vld [vmem:[#allocation131_spill] sm:$0xff] }
 0x5df   : > { %v7912_v11 = vcombine.low %v6158_v40, %v6159_v10  ;;  %v7913_v3 = vcombine.low %v6160_v22, %v6161_v6  ;;  %v7914_v33 = vcombine.low %v6162_v21, %v6163_v4  ;;  %v6689_v44 = vunpack.i.h.s16 %v13691_v7  ;;  %v15257_v10 = vld [vmem:[#allocation126_spill] sm:$0xff]  ;;  %v15259_v22 = vld [vmem:[#allocation132_spill] sm:$0xff] }
 0x5e0   : > { %v7910_v63 = vcombine.low %v7902_v49, %v7909_v57  ;;  %v7921_v15 = vrot.slane %v7911_v26, %v11278_v25  ;;  %v6691_v27 = vunpack.i.h.s16 %v13708_v2  ;;  %v15255_v23 = vpack.i.b16 %v15254_v53, %v15254_v53  ;;  %v15260_v24 = vld [vmem:[#allocation128_spill] sm:$0xff]  ;;  %v15262_v4 = vld [vmem:[#allocation134_spill] sm:$0xff] }
 0x5e1   : > { %v7928_v34 = vrot.slane %v7912_v11, %v11278_v25  ;;  %v7935_v8 = vrot.slane %v7913_v3, %v11278_v25  ;;  %v7942_v42 = vrot.slane %v7914_v33, %v11278_v25  ;;  %v6875_v40 = vrot.slane %v15256_v28, %v11351_v59 }
 0x5e2   : > { %v6871_v39 = vrot.slane %v15255_v23, %v11351_v59  ;;  %10424 = vmatmul.mubr.bf16.gmra.mxu0 %v7910_v63  ;;  %v15258_v49 = vpack.i.b16 %v15257_v10, %v15257_v10  ;;  %v6883_v38 = vrot.slane %v15259_v22, %v11351_v59  ;;  %v15261_v6 = vpack.i.b16 %v15260_v24, %v15260_v24  ;;  %v15266_v24 = vld [vmem:[#allocation130_spill] sm:$0xff] }
 0x5e3   : > { %v7943_v14 = vcombine.low %v7921_v15, %v7928_v34  ;;  %v7944_v57 = vcombine.low %v7935_v8, %v7942_v42  ;;  %v6891_v26 = vrot.slane %v15262_v4, %v11351_v59  ;;  %v15263_v11 = vunpack.i.h.s16 %v13674_v29 }
 0x5e4   : > { %v6879_v18 = vrot.slane %v15258_v49, %v11351_v59  ;;  %v6887_v21 = vrot.slane %v15261_v6, %v11351_v59  ;;  %v9672_v33 = vpack.i.b16 %v13684_v58, %v13684_v58  ;;  %v7135_v15 = vpack.i.b16 %v6687_v36, %v6687_v36 }
 0x5e5   : > { %v7133_v3 = vpack.i.b16 %v15263_v11, %v15263_v11  ;;  %v7951_v63 = vrot.slane %v7943_v14, %v11278_v25  ;;  %v9673_v34 = vpack.i.b16 %v13691_v7, %v13691_v7  ;;  %v7137_v53 = vpack.i.b16 %v6689_v44, %v6689_v44 }
 0x5e6   : > { %v7958_v23 = vrot.slane %v7944_v57, %v11278_v25  ;;  %v9674_v8 = vpack.i.b16 %v13708_v2, %v13708_v2  ;;  %v7139_v42 = vpack.i.b16 %v6691_v27, %v6691_v27  ;;  %v15264_v28 = vpack.i.b16 %v13674_v29, %v13674_v29  ;;  %v15265_v27 = vld [vmem:[#allocation138_spill] sm:$0xff] }
 0x5e7   : > { %v7251_v58 = vrot.slane %v7133_v3, %v11351_v59  ;;  %v7255_v14 = vrot.slane %v9672_v33, %v11351_v59  ;;  %v7259_v36 = vrot.slane %v7135_v15, %v11351_v59  ;;  %v7263_v7 = vrot.slane %v9673_v34, %v11351_v59 }
 0x5e8   : > { %v7247_v10 = vrot.slane %v15264_v28, %v11351_v59  ;;  %v7959_v44 = vcombine.low %v7951_v63, %v7958_v23  ;;  %v7267_v49 = vrot.slane %v7137_v53, %v11351_v59  ;;  %v7271_v22 = vrot.slane %v9674_v8, %v11351_v59  ;;  %v15268_v8 = vld [vmem:[#allocation6_spill] sm:$0xff] }
 0x5e9   : > { %v7275_v2 = vrot.slane %v7139_v42, %v11351_v59  ;;  %v15267_v6 = vrot.slane %v15266_v24, %v11351_v59  ;;  %v7518_v4 = vsel %vm11468_vm7, %v6871_v39, %v7255_v14  ;;  %v7519_v11 = vsel %vm11468_vm7, %v6875_v40, %v7259_v36  ;;  %v15277_v24 = vld [vmem:[#allocation73_spill] sm:$0xff] }
 0x5ea   : > { %v7516_v29 = vsel %vm11468_vm7, %v15265_v27, %v7247_v10  ;;  %10427 = vmatprep.mubr.bf16.mxu0 %v7959_v44  ;;  %v7520_v3 = vsel %vm11468_vm7, %v6879_v18, %v7263_v7  ;;  %v7521_v33 = vsel %vm11468_vm7, %v6883_v38, %v7267_v49  ;;  %v7522_v63 = vsel %vm11468_vm7, %v6887_v21, %v7271_v22  ;;  %v15270_v18 = vld [vmem:[#allocation14_spill] sm:$0xff]  ;;  %v15271_v38 = vld [vmem:[#allocation69_spill] sm:$0xff]  ;;  %v15274_v49 = vld [vmem:[#allocation71_spill] sm:$0xff] }
 0x5eb   : > { %v7517_v57 = vsel %vm11468_vm7, %v15267_v6, %v7251_v58  ;;  %v7523_v15 = vsel %vm11468_vm7, %v6891_v26, %v7275_v2  ;;  %v7961_v53 = vcombine.low %v7518_v4, %v7519_v11  ;;  %v7962_v23 = vcombine.low %v7520_v3, %v7521_v33  ;;  %v15273_v58 = vld [vmem:[#allocation79_spill] sm:$0xff]  ;;  %v15276_v27 = vld [vmem:[#allocation80_spill] sm:$0xff]  ;;  %v15279_v4 = vld [vmem:[#allocation81_spill] sm:$0xff] }
 0x5ec   : > { %v7960_v34 = vcombine.low %v7516_v29, %v7517_v57  ;;  %v7963_v39 = vcombine.low %v7522_v63, %v7523_v15  ;;  %v15269_v40 = vpack.i.b16 %v15268_v8, %v15268_v8  ;;  %v5563_v28 = vrot.slane %v15270_v18, %v11351_v59  ;;  %v15280_v63 = vld [vmem:[#allocation84_spill] sm:$0xff]  ;;  %v15281_v15 = vld [vmem:[#allocation18_spill] sm:$0xff]  ;;  %v15286_v18 = vld [vmem:[#allocation19_spill] sm:$0xff] }
 0x5ed   : > { %v15272_v10 = vpack.i.b16 %v15271_v38, %v15271_v38  ;;  %v5931_v26 = vrot.slane %v15273_v58, %v11351_v59  ;;  %v7977_v36 = vrot.slane %v7961_v53, %v11278_v25  ;;  %v7984_v7 = vrot.slane %v7962_v23, %v11278_v25  ;;  %v15282_v53 = vld [vmem:[#allocation77_spill] sm:$0xff] }
 0x5ee   : > { %v5559_v42 = vrot.slane %v15269_v40, %v11351_v59  ;;  %v7970_v14 = vrot.slane %v7960_v34, %v11278_v25  ;;  %v7991_v44 = vrot.slane %v7963_v39, %v11278_v25  ;;  %v15275_v22 = vpack.i.b16 %v15274_v49, %v15274_v49  ;;  %v15284_v39 = vld [vmem:[#allocation10_spill] sm:$0xff] }
 0x5ef   : > { %v5927_v21 = vrot.slane %v15272_v10, %v11351_v59  ;;  %v5939_v29 = vrot.slane %v15276_v27, %v11351_v59  ;;  %v15278_v6 = vpack.i.b16 %v15277_v24, %v15277_v24  ;;  %v5947_v11 = vrot.slane %v15279_v4, %v11351_v59  ;;  %v15287_v10 = vld [vmem:[#allocation12_spill] sm:$0xff] }
 0x5f0   : > { %v5935_v2 = vrot.slane %v15275_v22, %v11351_v59  ;;  %v7992_v3 = vcombine.low %v7970_v14, %v7977_v36  ;;  %v7993_v33 = vcombine.low %v7984_v7, %v7991_v44  ;;  %v6164_v34 = vsel %vm11468_vm7, %v15281_v15, %v15280_v63  ;;  %v15289_v36 = vld [vmem:[#allocation20_spill] sm:$0xff]  ;;  %v15290_v44 = vld [vmem:[#allocation13_spill] sm:$0xff] }
 0x5f1   : > { %v5943_v57 = vrot.slane %v15278_v6, %v11351_v59  ;;  %v15283_v23 = vrot.slane %v15282_v53, %v11351_v59  ;;  %v15285_v8 = vrot.slane %v15284_v39, %v11351_v59  ;;  %v6166_v38 = vsel %vm11468_vm7, %v15286_v18, %v5927_v21  ;;  %v15294_v39 = vld [vmem:[#allocation135_spill] sm:$0xff] }
 0x5f2   : > { %v15288_v58 = vrot.slane %v15287_v10, %v11351_v59  ;;  %v6168_v7 = vsel %vm11468_vm7, %v15289_v36, %v5935_v2  ;;  %v15291_v49 = vrot.slane %v15290_v44, %v11351_v59  ;;  %v8000_v27 = vrot.slane %v7992_v3, %v11278_v25  ;;  %v15297_v10 = vld [vmem:[#allocation136_spill] sm:$0xff] }
 0x5f3   : > { %v6165_v40 = vsel %vm11468_vm7, %v15285_v8, %v15283_v23  ;;  %v8007_v21 = vrot.slane %v7993_v33, %v11278_v25  ;;  %v6170_v24 = vsel %vm11468_vm7, %v5559_v42, %v5943_v57  ;;  %v6695_v53 = vunpack.i.h.s16 %v13687_v60 }
 0x5f4   : > { %v6167_v14 = vsel %vm11468_vm7, %v15288_v58, %v5931_v26  ;;  %v6169_v22 = vsel %vm11468_vm7, %v15291_v49, %v5939_v29  ;;  %v6171_v26 = vsel %vm11468_vm7, %v5563_v28, %v5947_v11  ;;  %v8009_v6 = vcombine.low %v6164_v34, %v6165_v40  ;;  %v15292_v28 = vld [vmem:[#allocation125_spill] sm:$0xff]  ;;  %v15295_v40 = vld [vmem:[#allocation127_spill] sm:$0xff] }
 0x5f5   : > { %v8010_v4 = vcombine.low %v6166_v38, %v6167_v14  ;;  %v8011_v63 = vcombine.low %v6168_v7, %v6169_v22  ;;  %v8012_v2 = vcombine.low %v6170_v24, %v6171_v26  ;;  %v8008_v15 = vcombine.low %v8000_v27, %v8007_v21  ;;  %v15298_v7 = vld [vmem:[#allocation129_spill] sm:$0xff] }
 0x5f6   : > { %v6697_v23 = vunpack.i.h.s16 %v13695_v55  ;;  %v6699_v29 = vunpack.i.h.s16 %v13712_v61  ;;  %v8019_v3 = vrot.slane %v8009_v6, %v11278_v25  ;;  %v15293_v11 = vpack.i.b16 %v15292_v28, %v15292_v28  ;;  %v15300_v22 = vld [vmem:[#allocation137_spill] sm:$0xff] }
 0x5f7   : > { %v8026_v33 = vrot.slane %v8010_v4, %v11278_v25  ;;  %v8033_v42 = vrot.slane %v8011_v63, %v11278_v25  ;;  %v8040_v57 = vrot.slane %v8012_v2, %v11278_v25  ;;  %10428 = vmatmul.mubr.bf16.gmra.mxu0 %v8008_v15  ;;  %v6907_v8 = vrot.slane %v15294_v39, %v11351_v59 }
 0x5f8   : > { %v6903_v34 = vrot.slane %v15293_v11, %v11351_v59  ;;  %v15296_v18 = vpack.i.b16 %v15295_v40, %v15295_v40  ;;  %v6915_v58 = vrot.slane %v15297_v10, %v11351_v59  ;;  %v15299_v44 = vpack.i.b16 %v15298_v7, %v15298_v7  ;;  %v15304_v40 = vld [vmem:[#allocation133_spill] sm:$0xff] }
 0x5f9   : > { %v8041_v14 = vcombine.low %v8019_v3, %v8026_v33  ;;  %v8042_v36 = vcombine.low %v8033_v42, %v8040_v57  ;;  %v6923_v27 = vrot.slane %v15300_v22, %v11351_v59  ;;  %v15301_v21 = vunpack.i.h.s16 %v13677_v12 }
 0x5fa   : > { %v6911_v38 = vrot.slane %v15296_v18, %v11351_v59  ;;  %v6919_v49 = vrot.slane %v15299_v44, %v11351_v59  ;;  %v9676_v26 = vpack.i.b16 %v13687_v60, %v13687_v60  ;;  %v7143_v6 = vpack.i.b16 %v6695_v53, %v6695_v53 }
 0x5fb   : > { %v7141_v24 = vpack.i.b16 %v15301_v21, %v15301_v21  ;;  %v9677_v4 = vpack.i.b16 %v13695_v55, %v13695_v55  ;;  %v8049_v63 = vrot.slane %v8041_v14, %v11278_v25  ;;  %v8056_v2 = vrot.slane %v8042_v36, %v11278_v25 }
 0x5fc   : > { %v7145_v15 = vpack.i.b16 %v6697_v23, %v6697_v23  ;;  %v9678_v3 = vpack.i.b16 %v13712_v61, %v13712_v61  ;;  %v7147_v33 = vpack.i.b16 %v6699_v29, %v6699_v29  ;;  %v15302_v42 = vpack.i.b16 %v13677_v12, %v13677_v12  ;;  %v15303_v29 = vld [vmem:[#allocation139_spill] sm:$0xff] }
 0x5fd   : > { %v7283_v60 = vrot.slane %v7141_v24, %v11351_v59  ;;  %v7287_v53 = vrot.slane %v9676_v26, %v11351_v59  ;;  %v8057_v28 = vcombine.low %v8049_v63, %v8056_v2  ;;  %v7291_v55 = vrot.slane %v7143_v6, %v11351_v59 }
 0x5fe   : > { %v7279_v57 = vrot.slane %v15302_v42, %v11351_v59  ;;  %v7295_v11 = vrot.slane %v9677_v4, %v11351_v59  ;;  %v7299_v23 = vrot.slane %v7145_v15, %v11351_v59  ;;  %v7303_v39 = vrot.slane %v9678_v3, %v11351_v59 }
 0x5ff   : > { %v7307_v61 = vrot.slane %v7147_v33, %v11351_v59  ;;  %v15305_v18 = vrot.slane %v15304_v40, %v11351_v59  ;;  %10431 = vmatprep.mubr.bf16.mxu0 %v8057_v28  ;;  %v7526_v14 = vsel %vm11468_vm7, %v6903_v34, %v7287_v53  ;;  %v7527_v36 = vsel %vm11468_vm7, %v6907_v8, %v7291_v55  ;;  %v15306_v34 = vld [vmem:[#allocation48_spill] sm:$0xff]  ;;  %v15311_v33 = vld [vmem:[#allocation115_spill] sm:$0xff]  ;;  %v15312_v53 = vld [vmem:[#allocation110_spill] sm:$0xff] }
 0x600   : > { %v7524_v12 = vsel %vm11468_vm7, %v15303_v29, %v7279_v57  ;;  %v7528_v7 = vsel %vm11468_vm7, %v6911_v38, %v7295_v11  ;;  %v7529_v44 = vsel %vm11468_vm7, %v6915_v58, %v7299_v23  ;;  %v7530_v22 = vsel %vm11468_vm7, %v6919_v49, %v7303_v39  ;;  %v15308_v38 = vld [vmem:[#allocation55_spill] sm:$0xff]  ;;  %v15309_v49 = vld [vmem:[#allocation108_spill] sm:$0xff]  ;;  %v15317_v40 = vld [vmem:[#allocation117_spill] sm:$0xff] }
 0x601   : > { %v7525_v10 = vsel %vm11468_vm7, %v15305_v18, %v7283_v60  ;;  %v7531_v21 = vsel %vm11468_vm7, %v6923_v27, %v7307_v61  ;;  %v8059_v26 = vcombine.low %v7526_v14, %v7527_v36  ;;  %v8060_v6 = vcombine.low %v7528_v7, %v7529_v44  ;;  %v15314_v11 = vld [vmem:[#allocation116_spill] sm:$0xff]  ;;  %v15320_v44 = vld [vmem:[#allocation114_spill] sm:$0xff] }
 0x602   : > { %v8058_v24 = vcombine.low %v7524_v12, %v7525_v10  ;;  %v8061_v4 = vcombine.low %v7530_v22, %v7531_v21  ;;  %v15307_v8 = vpack.i.b16 %v15306_v34, %v15306_v34  ;;  %v5595_v2 = vrot.slane %v15308_v38, %v11351_v59  ;;  %v15315_v61 = vld [vmem:[#allocation112_spill] sm:$0xff]  ;;  %v15318_v10 = vld [vmem:[#allocation122_spill] sm:$0xff]  ;;  %v15325_v34 = vld [vmem:[#allocation53_spill] sm:$0xff] }
 0x603   : > { %v8075_v15 = vrot.slane %v8059_v26, %v11278_v25  ;;  %v15310_v27 = vpack.i.b16 %v15309_v49, %v15309_v49  ;;  %v5963_v42 = vrot.slane %v15311_v33, %v11351_v59  ;;  %v8082_v57 = vrot.slane %v8060_v6, %v11278_v25  ;;  %v15319_v14 = vld [vmem:[#allocation60_spill] sm:$0xff]  ;;  %v15322_v21 = vld [vmem:[#allocation50_spill] sm:$0xff]  ;;  %v15324_v6 = vld [vmem:[#allocation61_spill] sm:$0xff] }
 0x604   : > { %v5591_v63 = vrot.slane %v15307_v8, %v11351_v59  ;;  %v8068_v58 = vrot.slane %v8058_v24, %v11278_v25  ;;  %v8089_v60 = vrot.slane %v8061_v4, %v11278_v25  ;;  %v15313_v28 = vpack.i.b16 %v15312_v53, %v15312_v53 }
 0x605   : > { %v5959_v3 = vrot.slane %v15310_v27, %v11351_v59  ;;  %v5971_v23 = vrot.slane %v15314_v11, %v11351_v59  ;;  %v15316_v29 = vpack.i.b16 %v15315_v61, %v15315_v61  ;;  %v5979_v18 = vrot.slane %v15317_v40, %v11351_v59  ;;  %v15328_v27 = vld [vmem:[#allocation54_spill] sm:$0xff] }
 0x606   : > { %v5967_v55 = vrot.slane %v15313_v28, %v11351_v59  ;;  %v8090_v39 = vcombine.low %v8068_v58, %v8075_v15  ;;  %v6172_v36 = vsel %vm11468_vm7, %v15319_v14, %v15318_v10  ;;  %v8091_v7 = vcombine.low %v8082_v57, %v8089_v60  ;;  %v15327_v15 = vld [vmem:[#allocation62_spill] sm:$0xff] }
 0x607   : > { %v5975_v12 = vrot.slane %v15316_v29, %v11351_v59  ;;  %v15321_v22 = vrot.slane %v15320_v44, %v11351_v59  ;;  %v15323_v24 = vrot.slane %v15322_v21, %v11351_v59  ;;  %v6174_v4 = vsel %vm11468_vm7, %v15324_v6, %v5959_v3 }
 0x608   : > { %v15326_v8 = vrot.slane %v15325_v34, %v11351_v59  ;;  %v8098_v58 = vrot.slane %v8090_v39, %v11278_v25  ;;  %v6176_v49 = vsel %vm11468_vm7, %v15327_v15, %v5967_v55  ;;  %v15329_v33 = vrot.slane %v15328_v27, %v11351_v59 }
 0x609   : > { %v6173_v26 = vsel %vm11468_vm7, %v15323_v24, %v15321_v22  ;;  %v6178_v3 = vsel %vm11468_vm7, %v5591_v63, %v5975_v12  ;;  %v8105_v60 = vrot.slane %v8091_v7, %v11278_v25  ;;  %v6703_v55 = vunpack.i.h.s16 %v13698_v5 }
 0x60a   : > { %v6175_v38 = vsel %vm11468_vm7, %v15326_v8, %v5963_v42  ;;  %v6177_v57 = vsel %vm11468_vm7, %v15329_v33, %v5971_v23  ;;  %v6179_v42 = vsel %vm11468_vm7, %v5595_v2, %v5979_v18  ;;  %v8107_v53 = vcombine.low %v6172_v36, %v6173_v26  ;;  %v15330_v2 = vld [vmem:[#allocation4_spill] sm:$0xff]  ;;  %v15332_v36 = vld [vmem:[#allocation83_spill] sm:$0xff] }
 0x60b   : > { %v8108_v28 = vcombine.low %v6174_v4, %v6175_v38  ;;  %v8109_v11 = vcombine.low %v6176_v49, %v6177_v57  ;;  %v8110_v39 = vcombine.low %v6178_v3, %v6179_v42  ;;  %v6705_v61 = vunpack.i.h.s16 %v13702_v16 }
 0x60c   : > { %v8106_v29 = vcombine.low %v8098_v58, %v8105_v60  ;;  %v8117_v40 = vrot.slane %v8107_v53, %v11278_v25  ;;  %v6707_v63 = vunpack.i.h.s16 %v13719_v30  ;;  %v15331_v18 = vpack.i.b16 %v15330_v2, %v15330_v2  ;;  %v15338_v2 = vld [vmem:[#allocation49_spill] sm:$0xff] }
 0x60d   : > { %v8124_v23 = vrot.slane %v8108_v28, %v11278_v25  ;;  %v8131_v12 = vrot.slane %v8109_v11, %v11278_v25  ;;  %v8138_v10 = vrot.slane %v8110_v39, %v11278_v25  ;;  %v6939_v7 = vrot.slane %v15332_v36, %v11351_v59  ;;  %v15340_v36 = vld [vmem:[#allocation59_spill] sm:$0xff] }
 0x60e   : > { %v6935_v14 = vrot.slane %v15331_v18, %v11351_v59  ;;  %10432 = vmatmul.mubr.bf16.gmra.mxu0 %v8106_v29  ;;  %v15333_v22 = vpack.i.b16 %v13414_v46, %v13414_v46  ;;  %v6947_v24 = vrot.slane %v13442_v56, %v11351_v59  ;;  %v15334_v26 = vpack.i.b16 %v13420_v52, %v13420_v52 }
 0x60f   : > { %v8139_v44 = vcombine.low %v8117_v40, %v8124_v23  ;;  %v8140_v4 = vcombine.low %v8131_v12, %v8138_v10  ;;  %v6955_v34 = vrot.slane %v13450_v32, %v11351_v59  ;;  %v15335_v8 = vunpack.i.h.s16 %v13680_v41 }
 0x610   : > { %v6943_v21 = vrot.slane %v15333_v22, %v11351_v59  ;;  %v6951_v6 = vrot.slane %v15334_v26, %v11351_v59  ;;  %v9680_v46 = vpack.i.b16 %v13698_v5, %v13698_v5  ;;  %v7151_v15 = vpack.i.b16 %v6703_v55, %v6703_v55 }
 0x611   : > { %v7149_v38 = vpack.i.b16 %v15335_v8, %v15335_v8  ;;  %v8147_v58 = vrot.slane %v8139_v44, %v11278_v25  ;;  %v9681_v56 = vpack.i.b16 %v13702_v16, %v13702_v16  ;;  %v7153_v49 = vpack.i.b16 %v6705_v61, %v6705_v61  ;;  %v15341_v44 = vld [vmem:[#allocation109_spill] sm:$0xff] }
 0x612   : > { %v8154_v52 = vrot.slane %v8140_v4, %v11278_v25  ;;  %v9682_v27 = vpack.i.b16 %v13719_v30, %v13719_v30  ;;  %v7155_v32 = vpack.i.b16 %v6707_v63, %v6707_v63  ;;  %v15336_v33 = vpack.i.b16 %v13680_v41, %v13680_v41 }
 0x613   : > { %v7315_v5 = vrot.slane %v7149_v38, %v11351_v59  ;;  %v7319_v3 = vrot.slane %v9680_v46, %v11351_v59  ;;  %v7323_v60 = vrot.slane %v7151_v15, %v11351_v59  ;;  %v7327_v16 = vrot.slane %v9681_v56, %v11351_v59  ;;  %v15344_v38 = vld [vmem:[#allocation111_spill] sm:$0xff]  ;;  %v15346_v15 = vld [vmem:[#allocation120_spill] sm:$0xff] }
 0x614   : > { %v7311_v57 = vrot.slane %v15336_v33, %v11351_v59  ;;  %v8155_v42 = vcombine.low %v8147_v58, %v8154_v52  ;;  %v7331_v53 = vrot.slane %v7153_v49, %v11351_v59  ;;  %v7335_v28 = vrot.slane %v9682_v27, %v11351_v59  ;;  %v15347_v49 = vld [vmem:[#allocation113_spill] sm:$0xff] }
 0x615   : > { %v7339_v30 = vrot.slane %v7155_v32, %v11351_v59  ;;  %v15337_v11 = vrot.slane %v13430_v1, %v11351_v59  ;;  %v7534_v55 = vsel %vm11468_vm7, %v6935_v14, %v7319_v3  ;;  %v7535_v61 = vsel %vm11468_vm7, %v6939_v7, %v7323_v60  ;;  %v15349_v32 = vld [vmem:[#allocation121_spill] sm:$0xff]  ;;  %v15350_v3 = vld [vmem:[#allocation123_spill] sm:$0xff] }
 0x616   : > { %v7532_v41 = vsel %vm11468_vm7, %v13463_v43, %v7311_v57  ;;  %10435 = vmatprep.mubr.bf16.mxu0 %v8155_v42  ;;  %v7536_v29 = vsel %vm11468_vm7, %v6943_v21, %v7327_v16  ;;  %v7537_v40 = vsel %vm11468_vm7, %v6947_v24, %v7331_v53  ;;  %v7538_v43 = vsel %vm11468_vm7, %v6951_v6, %v7335_v28  ;;  %v15343_v24 = vld [vmem:[#allocation119_spill] sm:$0xff]  ;;  %v15352_v42 = vld [vmem:[#allocation118_spill] sm:$0xff]  ;;  %v15354_v28 = vld [vmem:[#allocation56_spill] sm:$0xff] }
 0x617   : > { %v7533_v39 = vsel %vm11468_vm7, %v15337_v11, %v7315_v5  ;;  %v7539_v1 = vsel %vm11468_vm7, %v6955_v34, %v7339_v30  ;;  %v8157_v63 = vcombine.low %v7534_v55, %v7535_v61  ;;  %v8158_v12 = vcombine.low %v7536_v29, %v7537_v40  ;;  %v15351_v60 = vld [vmem:[#allocation63_spill] sm:$0xff]  ;;  %v15356_v11 = vld [vmem:[#allocation64_spill] sm:$0xff]  ;;  %v15357_v55 = vld [vmem:[#allocation57_spill] sm:$0xff] }
 0x618   : > { %v8156_v23 = vcombine.low %v7532_v41, %v7533_v39  ;;  %v8159_v10 = vcombine.low %v7538_v43, %v7539_v1  ;;  %v15339_v18 = vpack.i.b16 %v15338_v2, %v15338_v2  ;;  %v5627_v7 = vrot.slane %v15340_v36, %v11351_v59  ;;  %v15359_v40 = vld [vmem:[#allocation65_spill] sm:$0xff]  ;;  %v15360_v1 = vld [vmem:[#allocation58_spill] sm:$0xff] }
 0x619   : > { %v15342_v22 = vpack.i.b16 %v15341_v44, %v15341_v44  ;;  %v5995_v26 = vrot.slane %v15343_v24, %v11351_v59  ;;  %v8173_v4 = vrot.slane %v8157_v63, %v11278_v25  ;;  %v8180_v34 = vrot.slane %v8158_v12, %v11278_v25 }
 0x61a   : > { %v5623_v14 = vrot.slane %v15339_v18, %v11351_v59  ;;  %v8166_v6 = vrot.slane %v8156_v23, %v11278_v25  ;;  %v8187_v8 = vrot.slane %v8159_v10, %v11278_v25  ;;  %v15345_v46 = vpack.i.b16 %v15344_v38, %v15344_v38 }
 0x61b   : > { %v5991_v21 = vrot.slane %v15342_v22, %v11351_v59  ;;  %v6003_v56 = vrot.slane %v15346_v15, %v11351_v59  ;;  %v15348_v52 = vpack.i.b16 %v15347_v49, %v15347_v49  ;;  %v6011_v33 = vrot.slane %v15349_v32, %v11351_v59 }
 0x61c   : > { %v5999_v58 = vrot.slane %v15345_v46, %v11351_v59  ;;  %v8188_v57 = vcombine.low %v8166_v6, %v8173_v4  ;;  %v8189_v5 = vcombine.low %v8180_v34, %v8187_v8  ;;  %v6180_v16 = vsel %vm11468_vm7, %v15351_v60, %v15350_v3 }
 0x61d   : > { %v6007_v27 = vrot.slane %v15348_v52, %v11351_v59  ;;  %v15353_v53 = vrot.slane %v15352_v42, %v11351_v59  ;;  %v15355_v30 = vrot.slane %v15354_v28, %v11351_v59  ;;  %v6182_v39 = vsel %vm11468_vm7, %v15356_v11, %v5991_v21 }
 0x61e   : > { %v15358_v61 = vrot.slane %v15357_v55, %v11351_v59  ;;  %v6184_v43 = vsel %vm11468_vm7, %v15359_v40, %v5999_v58  ;;  %v15361_v23 = vrot.slane %v15360_v1, %v11351_v59  ;;  %v8196_v12 = vrot.slane %v8188_v57, %v11278_v25  ;;  %v15367_v1 = vld [vmem:[#allocation163_spill] sm:$0xff] }
 0x61f   : > { %v6181_v41 = vsel %vm11468_vm7, %v15355_v30, %v15353_v53  ;;  %v8203_v10 = vrot.slane %v8189_v5, %v11278_v25  ;;  %v6186_v2 = vsel %vm11468_vm7, %v5623_v14, %v6007_v27  ;;  %v6187_v18 = vsel %vm11468_vm7, %v5627_v7, %v6011_v33  ;;  %v15364_v33 = vld [vmem:[#allocation27_spill] sm:$0xff] }
 0x620   : > { %v6183_v29 = vsel %vm11468_vm7, %v15358_v61, %v5995_v26  ;;  %v6185_v63 = vsel %vm11468_vm7, %v15361_v23, %v6003_v56  ;;  %v8205_v36 = vcombine.low %v6180_v16, %v6181_v41  ;;  %v8208_v21 = vcombine.low %v6186_v2, %v6187_v18 }
 0x621   : > { %v8206_v44 = vcombine.low %v6182_v39, %v6183_v29  ;;  %v8207_v22 = vcombine.low %v6184_v43, %v6185_v63  ;;  %v8204_v24 = vcombine.low %v8196_v12, %v8203_v10  ;;  %v6618_v26 = vcombine.high %v13606_v13, %v13606_v13  ;;  %v15368_v63 = vld [vmem:[#allocation142_spill] sm:$0xff] }
 0x622   : > { %v6709_v6 = vunpack.i.h.s16 %v13599_v20  ;;  %v6711_v4 = vunpack.i.h.s16 %v13606_v13  ;;  %v8215_v34 = vrot.slane %v8205_v36, %v11278_v25  ;;  %v8236_v7 = vrot.slane %v8208_v21, %v11278_v25 }
 0x623   : > { %v8222_v8 = vrot.slane %v8206_v44, %v11278_v25  ;;  %v8229_v14 = vrot.slane %v8207_v22, %v11278_v25  ;;  %10436 = vmatmul.mubr.bf16.gmra.mxu0 %v8204_v24  ;;  %v6713_v38 = vunpack.i.h.s16 %v13611_v50  ;;  %v6715_v46 = vunpack.i.h.s16 %v6618_v26 }
 0x624   : > { %v15362_v58 = vpack.i.b16 %v13412_v51, %v13412_v51  ;;  %v6971_v56 = vrot.slane %v13452_v31, %v11351_v59  ;;  %v15363_v27 = vpack.i.b16 %v13416_v54, %v13416_v54  ;;  %v6979_v57 = vrot.slane %v15364_v33, %v11351_v59  ;;  %v15366_v51 = vld [vmem:[#allocation162_spill] sm:$0xff] }
 0x625   : > { %v8237_v49 = vcombine.low %v8215_v34, %v8222_v8  ;;  %v8238_v52 = vcombine.low %v8229_v14, %v8236_v7  ;;  %v15365_v5 = vpack.i.b16 %v13424_v19, %v13424_v19  ;;  %v6987_v60 = vrot.slane %v15366_v51, %v11351_v59  ;;  %v15370_v34 = vld [vmem:[#allocation31_spill] sm:$0xff]  ;;  %v15372_v7 = vld [vmem:[#allocation37_spill] sm:$0xff]  ;;  %v15378_v51 = vld [vmem:[#allocation100_spill] sm:$0xff] }
 0x626   : > { %v6967_v15 = vrot.slane %v15362_v58, %v11351_v59  ;;  %v6975_v32 = vrot.slane %v15363_v27, %v11351_v59  ;;  %v9683_v31 = vpack.i.b16 %v13599_v20, %v13599_v20  ;;  %v7157_v16 = vpack.i.b16 %v6709_v6, %v6709_v6  ;;  %v15375_v27 = vld [vmem:[#allocation99_spill] sm:$0xff] }
 0x627   : > { %v6983_v3 = vrot.slane %v15365_v5, %v11351_v59  ;;  %v8245_v42 = vrot.slane %v8237_v49, %v11278_v25  ;;  %v8252_v54 = vrot.slane %v8238_v52, %v11278_v25  ;;  %v9684_v53 = vpack.i.b16 %v13606_v13, %v13606_v13 }
 0x628   : > { %v7159_v28 = vpack.i.b16 %v6711_v4, %v6711_v4  ;;  %v9685_v30 = vpack.i.b16 %v13611_v50, %v13611_v50  ;;  %v7161_v19 = vpack.i.b16 %v6713_v38, %v6713_v38  ;;  %v9686_v41 = vpack.i.b16 %v6618_v26, %v6618_v26 }
 0x629   : > { %v7163_v11 = vpack.i.b16 %v6715_v46, %v6715_v46  ;;  %v8253_v39 = vcombine.low %v8245_v42, %v8252_v54  ;;  %v7343_v55 = vrot.slane %v9683_v31, %v11351_v59  ;;  %v7347_v20 = vrot.slane %v7157_v16, %v11351_v59  ;;  %v15373_v46 = vld [vmem:[#allocation92_spill] sm:$0xff] }
 0x62a   : > { %v7351_v61 = vrot.slane %v9684_v53, %v11351_v59  ;;  %v7355_v29 = vrot.slane %v7159_v28, %v11351_v59  ;;  %v7359_v40 = vrot.slane %v9685_v30, %v11351_v59  ;;  %v7363_v13 = vrot.slane %v7161_v19, %v11351_v59  ;;  %v15379_v31 = vld [vmem:[#allocation96_spill] sm:$0xff]  ;;  %v15381_v53 = vld [vmem:[#allocation102_spill] sm:$0xff]  ;;  %v15383_v19 = vld [vmem:[#allocation41_spill] sm:$0xff] }
 0x62b   : > { %v7367_v43 = vrot.slane %v9686_v41, %v11351_v59  ;;  %10439 = vmatprep.mubr.bf16.mxu0 %v8253_v39  ;;  %v7371_v50 = vrot.slane %v7163_v11, %v11351_v59  ;;  %v7540_v23 = vsel %vm11468_vm7, %v15367_v1, %v7343_v55  ;;  %v15369_v12 = vrot.slane %v15368_v63, %v11351_v59  ;;  %v15382_v30 = vld [vmem:[#allocation106_spill] sm:$0xff]  ;;  %v15386_v55 = vld [vmem:[#allocation33_spill] sm:$0xff] }
 0x62c   : > { %v7542_v2 = vsel %vm11468_vm7, %v6967_v15, %v7351_v61  ;;  %v7543_v18 = vsel %vm11468_vm7, %v6971_v56, %v7355_v29  ;;  %v7544_v36 = vsel %vm11468_vm7, %v6975_v32, %v7359_v40  ;;  %v7545_v44 = vsel %vm11468_vm7, %v6979_v57, %v7363_v13  ;;  %v15376_v57 = vld [vmem:[#allocation94_spill] sm:$0xff] }
 0x62d   : > { %v7541_v10 = vsel %vm11468_vm7, %v15369_v12, %v7347_v20  ;;  %v7546_v22 = vsel %vm11468_vm7, %v6983_v3, %v7367_v43  ;;  %v7547_v21 = vsel %vm11468_vm7, %v6987_v60, %v7371_v50  ;;  %v8255_v26 = vcombine.low %v7542_v2, %v7543_v18  ;;  %v15384_v11 = vld [vmem:[#allocation98_spill] sm:$0xff] }
 0x62e   : > { %v8254_v24 = vcombine.low %v7540_v23, %v7541_v10  ;;  %v8256_v6 = vcombine.low %v7544_v36, %v7545_v44  ;;  %v8257_v4 = vcombine.low %v7546_v22, %v7547_v21  ;;  %v15371_v8 = vpack.i.b16 %v15370_v34, %v15370_v34  ;;  %v15388_v40 = vld [vmem:[#allocation42_spill] sm:$0xff]  ;;  %v15391_v23 = vld [vmem:[#allocation43_spill] sm:$0xff] }
 0x62f   : > { %v5659_v38 = vrot.slane %v15372_v7, %v11351_v59  ;;  %v15374_v58 = vpack.i.b16 %v15373_v46, %v15373_v46  ;;  %v8271_v49 = vrot.slane %v8255_v26, %v11278_v25  ;;  %v6027_v32 = vrot.slane %v15375_v27, %v11351_v59  ;;  %v15389_v43 = vld [vmem:[#allocation34_spill] sm:$0xff]  ;;  %v15392_v10 = vld [vmem:[#allocation35_spill] sm:$0xff] }
 0x630   : > { %v5655_v14 = vrot.slane %v15371_v8, %v11351_v59  ;;  %v8264_v56 = vrot.slane %v8254_v24, %v11278_v25  ;;  %v8278_v52 = vrot.slane %v8256_v6, %v11278_v25  ;;  %v8285_v33 = vrot.slane %v8257_v4, %v11278_v25 }
 0x631   : > { %v6023_v15 = vrot.slane %v15374_v58, %v11351_v59  ;;  %v15377_v5 = vpack.i.b16 %v15376_v57, %v15376_v57  ;;  %v6035_v60 = vrot.slane %v15378_v51, %v11351_v59  ;;  %v15380_v16 = vpack.i.b16 %v15379_v31, %v15379_v31 }
 0x632   : > { %v8286_v54 = vcombine.low %v8264_v56, %v8271_v49  ;;  %v6043_v28 = vrot.slane %v15381_v53, %v11351_v59  ;;  %v6188_v41 = vsel %vm11468_vm7, %v15383_v19, %v15382_v30  ;;  %v15385_v39 = vrot.slane %v15384_v11, %v11351_v59  ;;  %v15394_v49 = vld [vmem:[#allocation3_spill] sm:$0xff] }
 0x633   : > { %v6031_v3 = vrot.slane %v15377_v5, %v11351_v59  ;;  %v6039_v42 = vrot.slane %v15380_v16, %v11351_v59  ;;  %v15387_v20 = vrot.slane %v15386_v55, %v11351_v59  ;;  %v8287_v29 = vcombine.low %v8278_v52, %v8285_v33  ;;  %v15396_v33 = vld [vmem:[#allocation152_spill] sm:$0xff] }
 0x634   : > { %v6190_v13 = vsel %vm11468_vm7, %v15388_v40, %v6023_v15  ;;  %v15390_v50 = vrot.slane %v15389_v43, %v11351_v59  ;;  %v8294_v12 = vrot.slane %v8286_v54, %v11278_v25  ;;  %v15393_v2 = vrot.slane %v15392_v10, %v11351_v59  ;;  %v15398_v40 = vld [vmem:[#allocation148_spill] sm:$0xff]  ;;  %v15403_v10 = vld [vmem:[#allocation158_spill] sm:$0xff] }
 0x635   : > { %v6189_v61 = vsel %vm11468_vm7, %v15387_v20, %v15385_v39  ;;  %v6192_v63 = vsel %vm11468_vm7, %v15391_v23, %v6031_v3  ;;  %v6194_v36 = vsel %vm11468_vm7, %v5655_v14, %v6039_v42  ;;  %v6195_v44 = vsel %vm11468_vm7, %v5659_v38, %v6043_v28  ;;  %v15401_v23 = vld [vmem:[#allocation149_spill] sm:$0xff] }
 0x636   : > { %v6191_v1 = vsel %vm11468_vm7, %v15390_v50, %v6027_v32  ;;  %v6193_v18 = vsel %vm11468_vm7, %v15393_v2, %v6035_v60  ;;  %v8301_v22 = vrot.slane %v8287_v29, %v11278_v25  ;;  %v8303_v21 = vcombine.low %v6188_v41, %v6189_v61  ;;  %v15397_v61 = vld [vmem:[#allocation156_spill] sm:$0xff]  ;;  %v15400_v50 = vld [vmem:[#allocation157_spill] sm:$0xff] }
 0x637   : > { %v8304_v24 = vcombine.low %v6190_v13, %v6191_v1  ;;  %v8305_v26 = vcombine.low %v6192_v63, %v6193_v18  ;;  %v8306_v6 = vcombine.low %v6194_v36, %v6195_v44  ;;  %v6666_v4 = vcombine.high %v13620_v47, %v13620_v47  ;;  %v15404_v18 = vld [vmem:[#allocation150_spill] sm:$0xff] }
 0x638   : > { %v6717_v34 = vunpack.i.h.s16 %v13615_v9  ;;  %v6719_v8 = vunpack.i.h.s16 %v13620_v47  ;;  %v8302_v7 = vcombine.low %v8294_v12, %v8301_v22  ;;  %v8313_v46 = vrot.slane %v8303_v21, %v11278_v25 }
 0x639   : > { %v8320_v14 = vrot.slane %v8304_v24, %v11278_v25  ;;  %v8327_v38 = vrot.slane %v8305_v26, %v11278_v25  ;;  %v8334_v58 = vrot.slane %v8306_v6, %v11278_v25  ;;  %v6721_v15 = vunpack.i.h.s16 %v13629_v35 }
 0x63a   : > { %v6723_v56 = vunpack.i.h.s16 %v6666_v4  ;;  %v15395_v52 = vpack.i.b16 %v15394_v49, %v15394_v49  ;;  %10440 = vmatmul.mubr.bf16.gmra.mxu0 %v8302_v7  ;;  %v7019_v57 = vrot.slane %v15396_v33, %v11351_v59  ;;  %v9687_v5 = vpack.i.b16 %v13615_v9, %v13615_v9 }
 0x63b   : > { %v8335_v32 = vcombine.low %v8313_v46, %v8320_v14  ;;  %v7165_v3 = vpack.i.b16 %v6717_v34, %v6717_v34  ;;  %v8336_v51 = vcombine.low %v8327_v38, %v8334_v58  ;;  %v9688_v60 = vpack.i.b16 %v13620_v47, %v13620_v47  ;;  %v15406_v34 = vld [vmem:[#allocation32_spill] sm:$0xff] }
 0x63c   : > { %v7015_v27 = vrot.slane %v15395_v52, %v11351_v59  ;;  %v7167_v31 = vpack.i.b16 %v6719_v8, %v6719_v8  ;;  %v9689_v16 = vpack.i.b16 %v13629_v35, %v13629_v35  ;;  %v7169_v54 = vpack.i.b16 %v6721_v15, %v6721_v15  ;;  %v15408_v46 = vld [vmem:[#allocation40_spill] sm:$0xff]  ;;  %v15409_v15 = vld [vmem:[#allocation93_spill] sm:$0xff]  ;;  %v15411_v52 = vld [vmem:[#allocation103_spill] sm:$0xff] }
 0x63d   : > { %v8343_v42 = vrot.slane %v8335_v32, %v11278_v25  ;;  %v9690_v53 = vpack.i.b16 %v6666_v4, %v6666_v4  ;;  %v7171_v28 = vpack.i.b16 %v6723_v56, %v6723_v56  ;;  %v8350_v30 = vrot.slane %v8336_v51, %v11278_v25  ;;  %v15414_v51 = vld [vmem:[#allocation104_spill] sm:$0xff] }
 0x63e   : > { %v7375_v19 = vrot.slane %v9687_v5, %v11351_v59  ;;  %v7379_v9 = vrot.slane %v7165_v3, %v11351_v59  ;;  %v7383_v41 = vrot.slane %v9688_v60, %v11351_v59  ;;  %v7387_v11 = vrot.slane %v7167_v31, %v11351_v59 }
 0x63f   : > { %v7391_v47 = vrot.slane %v9689_v16, %v11351_v59  ;;  %v7395_v39 = vrot.slane %v7169_v54, %v11351_v59  ;;  %v7399_v35 = vrot.slane %v9690_v53, %v11351_v59  ;;  %v8351_v55 = vcombine.low %v8343_v42, %v8350_v30  ;;  %v15415_v16 = vld [vmem:[#allocation97_spill] sm:$0xff]  ;;  %v15418_v30 = vld [vmem:[#allocation107_spill] sm:$0xff] }
 0x640   : > { %v7403_v20 = vrot.slane %v7171_v28, %v11351_v59  ;;  %v7548_v29 = vsel %vm11468_vm7, %v15397_v61, %v7375_v19  ;;  %v15399_v13 = vrot.slane %v15398_v40, %v11351_v59  ;;  %v7550_v1 = vsel %vm11468_vm7, %v15400_v50, %v7383_v41  ;;  %v15417_v53 = vld [vmem:[#allocation105_spill] sm:$0xff]  ;;  %v15419_v19 = vld [vmem:[#allocation44_spill] sm:$0xff]  ;;  %v15427_v50 = vld [vmem:[#allocation46_spill] sm:$0xff] }
 0x641   : > { %v15402_v63 = vrot.slane %v15401_v23, %v11351_v59  ;;  %v7552_v2 = vsel %vm11468_vm7, %v15403_v10, %v7391_v47  ;;  %v15405_v36 = vrot.slane %v15404_v18, %v11351_v59  ;;  %10443 = vmatprep.mubr.bf16.mxu0 %v8351_v55  ;;  %v7554_v22 = vsel %vm11468_vm7, %v7015_v27, %v7399_v35  ;;  %v15428_v23 = vld [vmem:[#allocation39_spill] sm:$0xff] }
 0x642   : > { %v7549_v43 = vsel %vm11468_vm7, %v15399_v13, %v7379_v9  ;;  %v7555_v21 = vsel %vm11468_vm7, %v7019_v57, %v7403_v20  ;;  %v15407_v8 = vpack.i.b16 %v15406_v34, %v15406_v34  ;;  %v5691_v14 = vrot.slane %v15408_v46, %v11351_v59  ;;  %v15412_v57 = vld [vmem:[#allocation95_spill] sm:$0xff]  ;;  %v15424_v20 = vld [vmem:[#allocation45_spill] sm:$0xff] }
 0x643   : > { %v7551_v12 = vsel %vm11468_vm7, %v15402_v63, %v7387_v11  ;;  %v7553_v44 = vsel %vm11468_vm7, %v15405_v36, %v7395_v39  ;;  %v8352_v24 = vcombine.low %v7548_v29, %v7549_v43  ;;  %v8355_v4 = vcombine.low %v7554_v22, %v7555_v21  ;;  %v15420_v11 = vld [vmem:[#allocation101_spill] sm:$0xff]  ;;  %v15422_v39 = vld [vmem:[#allocation36_spill] sm:$0xff]  ;;  %v15425_v29 = vld [vmem:[#allocation38_spill] sm:$0xff] }
 0x644   : > { %v8353_v26 = vcombine.low %v7550_v1, %v7551_v12  ;;  %v8354_v6 = vcombine.low %v7552_v2, %v7553_v44  ;;  %v5687_v7 = vrot.slane %v15407_v8, %v11351_v59  ;;  %v15410_v56 = vpack.i.b16 %v15409_v15, %v15409_v15 }
 0x645   : > { %v8362_v38 = vrot.slane %v8352_v24, %v11278_v25  ;;  %v6059_v27 = vrot.slane %v15411_v52, %v11351_v59  ;;  %v8383_v33 = vrot.slane %v8355_v4, %v11278_v25  ;;  %v15413_v5 = vpack.i.b16 %v15412_v57, %v15412_v57  ;;  %v15430_v24 = vld [vmem:[#allocation22_spill] sm:$0xff]  ;;  %v15432_v4 = vld [vmem:[#allocation155_spill] sm:$0xff] }
 0x646   : > { %v8369_v58 = vrot.slane %v8353_v26, %v11278_v25  ;;  %v6055_v49 = vrot.slane %v15410_v56, %v11351_v59  ;;  %v8376_v32 = vrot.slane %v8354_v6, %v11278_v25  ;;  %v6067_v60 = vrot.slane %v15414_v51, %v11351_v59  ;;  %v15436_v57 = vld [vmem:[#allocation51_spill] sm:$0xff] }
 0x647   : > { %v6063_v3 = vrot.slane %v15413_v5, %v11351_v59  ;;  %v15416_v42 = vpack.i.b16 %v15415_v16, %v15415_v16  ;;  %v6075_v28 = vrot.slane %v15417_v53, %v11351_v59  ;;  %v6196_v9 = vsel %vm11468_vm7, %v15419_v19, %v15418_v30  ;;  %v15438_v51 = vld [vmem:[#allocation159_spill] sm:$0xff] }
 0x648   : > { %v8384_v31 = vcombine.low %v8362_v38, %v8369_v58  ;;  %v8385_v41 = vcombine.low %v8376_v32, %v8383_v33  ;;  %v15421_v47 = vrot.slane %v15420_v11, %v11351_v59  ;;  %v15423_v35 = vrot.slane %v15422_v39, %v11351_v59  ;;  %v15441_v16 = vld [vmem:[#allocation151_spill] sm:$0xff]  ;;  %v15447_v11 = vld [vmem:[#allocation154_spill] sm:$0xff] }
 0x649   : > { %v6071_v54 = vrot.slane %v15416_v42, %v11351_v59  ;;  %v6198_v61 = vsel %vm11468_vm7, %v15424_v20, %v6055_v49  ;;  %v15426_v40 = vrot.slane %v15425_v29, %v11351_v59  ;;  %v6200_v1 = vsel %vm11468_vm7, %v15427_v50, %v6063_v3 }
 0x64a   : > { %v6197_v55 = vsel %vm11468_vm7, %v15423_v35, %v15421_v47  ;;  %v8392_v43 = vrot.slane %v8384_v31, %v11278_v25  ;;  %v15429_v63 = vrot.slane %v15428_v23, %v11351_v59  ;;  %v8399_v2 = vrot.slane %v8385_v41, %v11278_v25 }
 0x64b   : > { %v6199_v13 = vsel %vm11468_vm7, %v15426_v40, %v6059_v27  ;;  %v6202_v10 = vsel %vm11468_vm7, %v5687_v7, %v6071_v54  ;;  %v6203_v18 = vsel %vm11468_vm7, %v5691_v14, %v6075_v28  ;;  %v8401_v36 = vcombine.low %v6196_v9, %v6197_v55  ;;  %v15444_v28 = vld [vmem:[#allocation153_spill] sm:$0xff] }
 0x64c   : > { %v6201_v12 = vsel %vm11468_vm7, %v15429_v63, %v6067_v60  ;;  %v8402_v44 = vcombine.low %v6198_v61, %v6199_v13  ;;  %v8404_v21 = vcombine.low %v6202_v10, %v6203_v18  ;;  %v15431_v26 = vpack.i.b16 %v15430_v24, %v15430_v24  ;;  %v15439_v60 = vld [vmem:[#allocation91_spill] sm:$0xff]  ;;  %v15446_v9 = vld [vmem:[#allocation161_spill] sm:$0xff] }
 0x64d   : > { %v8403_v22 = vcombine.low %v6200_v1, %v6201_v12  ;;  %v7051_v34 = vrot.slane %v15432_v4, %v11351_v59  ;;  %v8400_v8 = vcombine.low %v8392_v43, %v8399_v2  ;;  %v8411_v7 = vrot.slane %v8401_v36, %v11278_v25  ;;  %v14608_v36 = vld [vmem:[%s14799_s12] ss:$0 sm:$0xff] }
 0x64e   : > { %v7047_v6 = vrot.slane %v15431_v26, %v11351_v59  ;;  %v8418_v46 = vrot.slane %v8402_v44, %v11278_v25  ;;  %v15433_v14 = vpack.i.b16 %v13548_v62, %v13548_v62  ;;  %v8432_v15 = vrot.slane %v8404_v21, %v11278_v25 }
 0x64f   : > { %v8425_v58 = vrot.slane %v8403_v22, %v11278_v25  ;;  %v7419_v56 = vrot.slane %v13572_v0, %v11351_v59  ;;  %v15434_v49 = vpack.i.b16 %v13550_v37, %v13550_v37  ;;  %10444 = vmatmul.mubr.bf16.gmra.mxu0 %v8400_v8  ;;  %v7427_v32 = vrot.slane %v13574_v17, %v11351_v59  ;;  %v15437_v0 = vld [vmem:[#allocation47_spill] sm:$0xff] }
 0x650   : > { %v7415_v38 = vrot.slane %v15433_v14, %v11351_v59  ;;  %v8433_v27 = vcombine.low %v8411_v7, %v8418_v46  ;;  %v15435_v62 = vpack.i.b16 %v13558_v48, %v13558_v48  ;;  %v7435_v5 = vrot.slane %v15436_v57, %v11351_v59  ;;  %v15443_v48 = vld [vmem:[#allocation160_spill] sm:$0xff]  ;;  %v14617_v14 = vld [vmem:[%s14800_s13] ss:$0 sm:$0xff] }
 0x651   : > { %v7423_v52 = vrot.slane %v15434_v49, %v11351_v59  ;;  %v8434_v3 = vcombine.low %v8425_v58, %v8432_v15  ;;  %v7556_v37 = vsel %vm11468_vm7, %v15438_v51, %v15437_v0  ;;  %v15440_v31 = vrot.slane %v15439_v60, %v11351_v59 }
 0x652   : > { %v7431_v33 = vrot.slane %v15435_v62, %v11351_v59  ;;  %v15442_v17 = vrot.slane %v15441_v16, %v11351_v59  ;;  %v7558_v54 = vsel %vm11468_vm7, %v15443_v48, %v7415_v38  ;;  %v8441_v53 = vrot.slane %v8433_v27, %v11278_v25 }
 0x653   : > { %v15445_v30 = vrot.slane %v15444_v28, %v11351_v59  ;;  %v7560_v41 = vsel %vm11468_vm7, %v15446_v9, %v7423_v52  ;;  %v15448_v47 = vrot.slane %v15447_v11, %v11351_v59  ;;  %v8448_v35 = vrot.slane %v8434_v3, %v11278_v25 }
 0x654   : > { %v7557_v42 = vsel %vm11468_vm7, %v15442_v17, %v15440_v31  ;;  %v7562_v55 = vsel %vm11468_vm7, %v7047_v6, %v7431_v33  ;;  %v7563_v20 = vsel %vm11468_vm7, %v7051_v34, %v7435_v5 }
 0x655   : > { %v7559_v19 = vsel %vm11468_vm7, %v15445_v30, %v7419_v56  ;;  %v7561_v39 = vsel %vm11468_vm7, %v15448_v47, %v7427_v32  ;;  %v8450_v61 = vcombine.low %v7556_v37, %v7557_v42  ;;  %v8453_v13 = vcombine.low %v7562_v55, %v7563_v20 }
 0x656   : > { %v8451_v29 = vcombine.low %v7558_v54, %v7559_v19  ;;  %v8452_v40 = vcombine.low %v7560_v41, %v7561_v39  ;;  %v8449_v43 = vcombine.low %v8441_v53, %v8448_v35 }
 0x657   : > { %v8460_v50 = vrot.slane %v8450_v61, %v11278_v25  ;;  %v8481_v23 = vrot.slane %v8453_v13, %v11278_v25 }
 0x658   : > { %v8467_v59 = vrot.slane %v8451_v29, %v11278_v25  ;;  %v8474_v1 = vrot.slane %v8452_v40, %v11278_v25  ;;  %10447 = vmatprep.mubr.bf16.mxu0 %v8449_v43 }
 0x65a   : > { %v8482_v63 = vcombine.low %v8460_v50, %v8467_v59  ;;  %v8483_v12 = vcombine.low %v8474_v1, %v8481_v23 }
 0x65c   : > { %v8490_v10 = vrot.slane %v8482_v63, %v11278_v25  ;;  %v8497_v45 = vrot.slane %v8483_v12, %v11278_v25 }
 0x65e   : > { %v8498_v2 = vcombine.low %v8490_v10, %v8497_v45 }
 0x660   : > { %10448 = vmatmul.mubr.bf16.gmra.mxu0 %v8498_v2 }
 0x687   : > { %v10421_v18 = vpop.f32.mrf.mxu0 }
 0x688   : > { %v8606_v22 = vadd.f32 %v10421_v18, %v14608_v36 }
 0x689   : > { %v8597_v44 = vpop.f32.mrf.mxu0 }
 0x68a   : > { %v8598_v24 = vadd.f32 %v14608_v36, %v8597_v44  ;;  %v8726_v4 = vmax.f32 %v8606_v22, 0.0 }
 0x68b   : > { %v10422_v21 = vpop.f32.mrf.mxu0 }
 0x68c   : > { %v8609_v26 = vadd.f32 %v10422_v21, %v14608_v36  ;;  %v8724_v8 = vmax.f32 %v8598_v24, 0.0 }
 0x68d   : > { %v8600_v6 = vpop.f32.mrf.mxu0 }
 0x68e   : > { %v8727_v34 = vmax.f32 %v8609_v26, 0.0  ;;  %v8601_v25 = vadd.f32 %v14608_v36, %v8600_v6 }
 0x690   : > { %v8757_v7 = vpack.c.bf16 %v8727_v34, %v8726_v4  ;;  %v8725_v46 = vmax.f32 %v8601_v25, 0.0 }
 0x692   : > { %v8756_v38 = vpack.c.bf16 %v8725_v46, %v8724_v8  ;;  %v8774_v58 = vunpack.c.l.bf16 %v8757_v7  ;;  %v8775_v49 = vunpack.c.h.bf16 %v8757_v7 }
 0x694   : > { %v8813_v15 = vmul.f32 %v14617_v14, %v8774_v58  ;;  %v8772_v56 = vunpack.c.l.bf16 %v8756_v38  ;;  %v8773_v27 = vunpack.c.h.bf16 %v8756_v38  ;;  %v8814_v32 = vmul.f32 %v14617_v14, %v8775_v49 }
 0x696   : > { %8847 = vadd.xlane.f32.xlu1 %v8813_v15  ;;  %v8811_v52 = vmul.f32 %v14617_v14, %v8772_v56  ;;  %v8812_v62 = vmul.f32 %v14617_v14, %v8773_v27 }
 0x698   : > { %8843 = vadd.xlane.f32.xlu0 %v8811_v52 }
 0x69a   : > { %8849 = vadd.xlane.f32.xlu1 %v8814_v32 }
 0x69c   : > { %8845 = vadd.xlane.f32.xlu0 %v8812_v62 }
 0x6a2   : > { %v10425_v33 = vpop.f32.mrf.mxu0 }
 0x6a3   : > { %v8622_v5 = vadd.f32 %v10425_v33, %v14608_v36 }
 0x6a4   : > { %v8613_v57 = vpop.f32.mrf.mxu0 }
 0x6a5   : > { %v8614_v0 = vadd.f32 %v14608_v36, %v8613_v57  ;;  %v8730_v60 = vmax.f32 %v8622_v5, 0.0 }
 0x6a6   : > { %v10426_v3 = vpop.f32.mrf.mxu0 }
 0x6a7   : > { %v8625_v51 = vadd.f32 %v10426_v3, %v14608_v36  ;;  %v8728_v17 = vmax.f32 %v8614_v0, 0.0 }
 0x6a8   : > { %v8616_v37 = vpop.f32.mrf.mxu0 }
 0x6a9   : > { %v8731_v31 = vmax.f32 %v8625_v51, 0.0  ;;  %v8617_v16 = vadd.f32 %v14608_v36, %v8616_v37 }
 0x6ab   : > { %v8759_v42 = vpack.c.bf16 %v8731_v31, %v8730_v60  ;;  %v8729_v48 = vmax.f32 %v8617_v16, 0.0 }
 0x6ad   : > { %v8758_v54 = vpack.c.bf16 %v8729_v48, %v8728_v17  ;;  %v8779_v53 = vunpack.c.h.bf16 %v8759_v42  ;;  %v8778_v28 = vunpack.c.l.bf16 %v8759_v42 }
 0x6af   : > { %v8818_v30 = vmul.f32 %v14617_v14, %v8779_v53  ;;  %v8817_v19 = vmul.f32 %v14617_v14, %v8778_v28  ;;  %v8777_v9 = vunpack.c.h.bf16 %v8758_v54  ;;  %v8776_v41 = vunpack.c.l.bf16 %v8758_v54 }
 0x6b1   : > { %8857 = vadd.xlane.f32.xlu1 %v8818_v30  ;;  %8855 = vadd.xlane.f32.xlu0 %v8817_v19  ;;  %v8816_v11 = vmul.f32 %v14617_v14, %v8777_v9  ;;  %v8815_v47 = vmul.f32 %v14617_v14, %v8776_v41 }
 0x6b5   : > { %8853 = vadd.xlane.f32.xlu1 %v8816_v11  ;;  %8851 = vadd.xlane.f32.xlu0 %v8815_v47 }
 0x6b7   : > { %v10429_v39 = vpop.f32.mrf.mxu0 }
 0x6b8   : > { %v8638_v55 = vadd.f32 %v10429_v39, %v14608_v36 }
 0x6b9   : > { %v8629_v35 = vpop.f32.mrf.mxu0 }
 0x6ba   : > { %v8630_v61 = vadd.f32 %v14608_v36, %v8629_v35  ;;  %v8734_v13 = vmax.f32 %v8638_v55, 0.0 }
 0x6bb   : > { %v10430_v20 = vpop.f32.mrf.mxu0 }
 0x6bc   : > { %v8641_v29 = vadd.f32 %v10430_v20, %v14608_v36  ;;  %v8732_v59 = vmax.f32 %v8630_v61, 0.0 }
 0x6bd   : > { %v8632_v40 = vpop.f32.mrf.mxu0 }
 0x6be   : > { %v8735_v43 = vmax.f32 %v8641_v29, 0.0  ;;  %v8633_v50 = vadd.f32 %v14608_v36, %v8632_v40 }
 0x6c0   : > { %v8761_v1 = vpack.c.bf16 %v8735_v43, %v8734_v13  ;;  %v8733_v23 = vmax.f32 %v8633_v50, 0.0 }
 0x6c2   : > { %v8760_v63 = vpack.c.bf16 %v8733_v23, %v8732_v59  ;;  %v8783_v12 = vunpack.c.h.bf16 %v8761_v1  ;;  %v8782_v10 = vunpack.c.l.bf16 %v8761_v1 }
 0x6c4   : > { %v8822_v45 = vmul.f32 %v14617_v14, %v8783_v12  ;;  %v8821_v2 = vmul.f32 %v14617_v14, %v8782_v10  ;;  %v8781_v18 = vunpack.c.h.bf16 %v8760_v63  ;;  %v8780_v44 = vunpack.c.l.bf16 %v8760_v63 }
 0x6c6   : > { %8865 = vadd.xlane.f32.xlu1 %v8822_v45  ;;  %8863 = vadd.xlane.f32.xlu0 %v8821_v2  ;;  %v8820_v22 = vmul.f32 %v14617_v14, %v8781_v18  ;;  %v8819_v21 = vmul.f32 %v14617_v14, %v8780_v44 }
 0x6ca   : > { %8861 = vadd.xlane.f32.xlu1 %v8820_v22  ;;  %8859 = vadd.xlane.f32.xlu0 %v8819_v21 }
 0x6ce   : > { %v10433_v24 = vpop.f32.mrf.mxu0 }
 0x6cf   : > { %v8654_v6 = vadd.f32 %v10433_v24, %v14608_v36 }
 0x6d0   : > { %v8645_v26 = vpop.f32.mrf.mxu0 }
 0x6d1   : > { %v8646_v34 = vadd.f32 %v14608_v36, %v8645_v26  ;;  %v8738_v7 = vmax.f32 %v8654_v6, 0.0 }
 0x6d2   : > { %v10434_v4 = vpop.f32.mrf.mxu0 }
 0x6d3   : > { %v8657_v25 = vadd.f32 %v10434_v4, %v14608_v36  ;;  %v8736_v58 = vmax.f32 %v8646_v34, 0.0 }
 0x6d4   : > { %v8648_v8 = vpop.f32.mrf.mxu0 }
 0x6d5   : > { %v8739_v46 = vmax.f32 %v8657_v25, 0.0  ;;  %v8649_v38 = vadd.f32 %v14608_v36, %v8648_v8 }
 0x6d7   : > { %v8763_v15 = vpack.c.bf16 %v8739_v46, %v8738_v7  ;;  %v8737_v56 = vmax.f32 %v8649_v38, 0.0 }
 0x6d9   : > { %v8762_v49 = vpack.c.bf16 %v8737_v56, %v8736_v58  ;;  %v8787_v52 = vunpack.c.h.bf16 %v8763_v15  ;;  %v8786_v27 = vunpack.c.l.bf16 %v8763_v15 }
 0x6db   : > { %v8826_v32 = vmul.f32 %v14617_v14, %v8787_v52  ;;  %v8825_v62 = vmul.f32 %v14617_v14, %v8786_v27  ;;  %v8785_v33 = vunpack.c.h.bf16 %v8762_v49  ;;  %v8784_v57 = vunpack.c.l.bf16 %v8762_v49 }
 0x6dd   : > { %8873 = vadd.xlane.f32.xlu1 %v8826_v32  ;;  %8871 = vadd.xlane.f32.xlu0 %v8825_v62  ;;  %v8824_v5 = vmul.f32 %v14617_v14, %v8785_v33  ;;  %v8823_v3 = vmul.f32 %v14617_v14, %v8784_v57 }
 0x6e1   : > { %8869 = vadd.xlane.f32.xlu1 %v8824_v5  ;;  %8867 = vadd.xlane.f32.xlu0 %v8823_v3 }
 0x6e3   : > { %v10437_v0 = vpop.f32.mrf.mxu0 }
 0x6e4   : > { %v8670_v37 = vadd.f32 %v10437_v0, %v14608_v36 }
 0x6e5   : > { %v8661_v51 = vpop.f32.mrf.mxu0 }
 0x6e6   : > { %v8662_v31 = vadd.f32 %v14608_v36, %v8661_v51  ;;  %v8742_v42 = vmax.f32 %v8670_v37, 0.0 }
 0x6e7   : > { %v10438_v60 = vpop.f32.mrf.mxu0 }
 0x6e8   : > { %v8673_v16 = vadd.f32 %v10438_v60, %v14608_v36  ;;  %v8740_v53 = vmax.f32 %v8662_v31, 0.0 }
 0x6e9   : > { %v8664_v17 = vpop.f32.mrf.mxu0 }
 0x6ea   : > { %v8743_v48 = vmax.f32 %v8673_v16, 0.0  ;;  %v8665_v54 = vadd.f32 %v14608_v36, %v8664_v17 }
 0x6ec   : > { %v8765_v28 = vpack.c.bf16 %v8743_v48, %v8742_v42  ;;  %v8741_v30 = vmax.f32 %v8665_v54, 0.0 }
 0x6ee   : > { %v8764_v19 = vpack.c.bf16 %v8741_v30, %v8740_v53  ;;  %v8791_v9 = vunpack.c.h.bf16 %v8765_v28  ;;  %v8790_v41 = vunpack.c.l.bf16 %v8765_v28 }
 0x6f0   : > { %v8830_v11 = vmul.f32 %v14617_v14, %v8791_v9  ;;  %v8829_v47 = vmul.f32 %v14617_v14, %v8790_v41  ;;  %v8789_v39 = vunpack.c.h.bf16 %v8764_v19  ;;  %v8788_v35 = vunpack.c.l.bf16 %v8764_v19 }
 0x6f2   : > { %8881 = vadd.xlane.f32.xlu1 %v8830_v11  ;;  %8879 = vadd.xlane.f32.xlu0 %v8829_v47  ;;  %v8828_v55 = vmul.f32 %v14617_v14, %v8789_v39  ;;  %v8827_v20 = vmul.f32 %v14617_v14, %v8788_v35 }
 0x6f6   : > { %8877 = vadd.xlane.f32.xlu1 %v8828_v55  ;;  %8875 = vadd.xlane.f32.xlu0 %v8827_v20 }
 0x6fa   : > { %v10441_v61 = vpop.f32.mrf.mxu0 }
 0x6fb   : > { %v8686_v40 = vadd.f32 %v10441_v61, %v14608_v36 }
 0x6fc   : > { %v8677_v29 = vpop.f32.mrf.mxu0 }
 0x6fd   : > { %v8678_v43 = vadd.f32 %v14608_v36, %v8677_v29  ;;  %v8746_v1 = vmax.f32 %v8686_v40, 0.0 }
 0x6fe   : > { %v10442_v13 = vpop.f32.mrf.mxu0 }
 0x6ff   : > { %v8689_v50 = vadd.f32 %v10442_v13, %v14608_v36  ;;  %v8744_v12 = vmax.f32 %v8678_v43, 0.0  ;;  %v14679_v13 = vld [vmem:[#allocation2] ss:$0 sm:$0xff] }
 0x700   : > { %v8680_v59 = vpop.f32.mrf.mxu0 }
 0x701   : > { %v8747_v23 = vmax.f32 %v8689_v50, 0.0  ;;  %v8681_v63 = vadd.f32 %v14608_v36, %v8680_v59 }
 0x703   : > { %v8767_v10 = vpack.c.bf16 %v8747_v23, %v8746_v1  ;;  %v8745_v45 = vmax.f32 %v8681_v63, 0.0 }
 0x705   : > { %v8766_v2 = vpack.c.bf16 %v8745_v45, %v8744_v12  ;;  %v8795_v18 = vunpack.c.h.bf16 %v8767_v10  ;;  %v8794_v44 = vunpack.c.l.bf16 %v8767_v10 }
 0x707   : > { %v8834_v22 = vmul.f32 %v14617_v14, %v8795_v18  ;;  %v8833_v21 = vmul.f32 %v14617_v14, %v8794_v44  ;;  %v8793_v24 = vunpack.c.h.bf16 %v8766_v2  ;;  %v8792_v26 = vunpack.c.l.bf16 %v8766_v2 }
 0x709   : > { %8889 = vadd.xlane.f32.xlu1 %v8834_v22  ;;  %8887 = vadd.xlane.f32.xlu0 %v8833_v21  ;;  %v8832_v6 = vmul.f32 %v14617_v14, %v8793_v24  ;;  %v8831_v4 = vmul.f32 %v14617_v14, %v8792_v26 }
 0x70d   : > { %8885 = vadd.xlane.f32.xlu1 %v8832_v6  ;;  %8883 = vadd.xlane.f32.xlu0 %v8831_v4 }
 0x70f   : > { %v10445_v34 = vpop.f32.mrf.mxu0 }
 0x710   : > { %v8702_v8 = vadd.f32 %v10445_v34, %v14608_v36 }
 0x711   : > { %v8693_v25 = vpop.f32.mrf.mxu0 }
 0x712   : > { %v8694_v46 = vadd.f32 %v14608_v36, %v8693_v25  ;;  %v8750_v15 = vmax.f32 %v8702_v8, 0.0 }
 0x713   : > { %v10446_v7 = vpop.f32.mrf.mxu0 }
 0x714   : > { %v8705_v38 = vadd.f32 %v10446_v7, %v14608_v36  ;;  %v8748_v52 = vmax.f32 %v8694_v46, 0.0 }
 0x715   : > { %v8696_v58 = vpop.f32.mrf.mxu0 }
 0x716   : > { %v8751_v56 = vmax.f32 %v8705_v38, 0.0  ;;  %v8697_v49 = vadd.f32 %v14608_v36, %v8696_v58 }
 0x718   : > { %v8769_v27 = vpack.c.bf16 %v8751_v56, %v8750_v15  ;;  %v8749_v32 = vmax.f32 %v8697_v49, 0.0 }
 0x71a   : > { %v8768_v62 = vpack.c.bf16 %v8749_v32, %v8748_v52  ;;  %v8799_v33 = vunpack.c.h.bf16 %v8769_v27  ;;  %v8798_v57 = vunpack.c.l.bf16 %v8769_v27 }
 0x71c   : > { %v8838_v5 = vmul.f32 %v14617_v14, %v8799_v33  ;;  %v8837_v3 = vmul.f32 %v14617_v14, %v8798_v57  ;;  %v8797_v0 = vunpack.c.h.bf16 %v8768_v62  ;;  %v8796_v51 = vunpack.c.l.bf16 %v8768_v62 }
 0x71e   : > { %8897 = vadd.xlane.f32.xlu1 %v8838_v5  ;;  %8895 = vadd.xlane.f32.xlu0 %v8837_v3  ;;  %v8836_v31 = vmul.f32 %v14617_v14, %v8797_v0  ;;  %v8835_v16 = vmul.f32 %v14617_v14, %v8796_v51 }
 0x71f   : > { %v8848_v43 = vpop.xlane.xlu1 %8847 }
 0x720   : > { %v10449_v37 = vpop.f32.mrf.mxu0  ;;  %v8916_v50 = vadd.f32 %v14679_v13, %v8848_v43 }
 0x721   : > { %v8718_v42 = vadd.f32 %v10449_v37, %v14608_v36 }
 0x722   : > { %v8709_v60 = vpop.f32.mrf.mxu0  ;;  %8893 = vadd.xlane.f32.xlu1 %v8836_v31  ;;  %8891 = vadd.xlane.f32.xlu0 %v8835_v16  ;;  %8949 = vst.msk [vmem:[%s14686_s19 + $0x10] sm:$0xff] %vm8946_vm1, %v8916_v50 }
 0x723   : > { %v8710_v48 = vadd.f32 %v14608_v36, %v8709_v60  ;;  %v8754_v19 = vmax.f32 %v8718_v42, 0.0  ;;  %v8850_v1 = vpop.xlane.xlu1 %8849 }
 0x724   : > { %v10450_v17 = vpop.f32.mrf.mxu0  ;;  %v8917_v23 = vadd.f32 %v14679_v13, %v8850_v1 }
 0x725   : > { %v8721_v54 = vadd.f32 %v10450_v17, %v14608_v36  ;;  %v8752_v9 = vmax.f32 %v8710_v48, 0.0 }
 0x726   : > { %v8712_v53 = vpop.f32.mrf.mxu0  ;;  %8950 = vst.msk [vmem:[%s14686_s19 + $0x18] sm:$0xff] %vm8946_vm1, %v8917_v23 }
 0x727   : > { %v8755_v28 = vmax.f32 %v8721_v54, 0.0  ;;  %v8713_v30 = vadd.f32 %v14608_v36, %v8712_v53 }
 0x729   : > { %v8753_v41 = vmax.f32 %v8713_v30, 0.0  ;;  %v8771_v11 = vpack.c.bf16 %v8755_v28, %v8754_v19 }
 0x72b   : > { %v8770_v47 = vpack.c.bf16 %v8753_v41, %v8752_v9  ;;  %v8803_v61 = vunpack.c.h.bf16 %v8771_v11  ;;  %v8802_v29 = vunpack.c.l.bf16 %v8771_v11 }
 0x72d   : > { %v8801_v39 = vunpack.c.h.bf16 %v8770_v47  ;;  %v8800_v35 = vunpack.c.l.bf16 %v8770_v47  ;;  %v8842_v40 = vmul.f32 %v14617_v14, %v8803_v61  ;;  %v8841_v36 = vmul.f32 %v14617_v14, %v8802_v29 }
 0x72f   : > { %v8840_v55 = vmul.f32 %v14617_v14, %v8801_v39  ;;  %v8839_v20 = vmul.f32 %v14617_v14, %v8800_v35  ;;  %v8844_v14 = vpop.xlane.xlu0 %8843 }
 0x730   : > { %v8914_v59 = vadd.f32 %v14679_v13, %v8844_v14 }
 0x731   : > { %8901 = vadd.xlane.f32.xlu1 %v8840_v55  ;;  %8899 = vadd.xlane.f32.xlu0 %v8839_v20 }
 0x732   : > { %8947 = vst.msk [vmem:[%s14686_s19] sm:$0xff] %vm8946_vm1, %v8914_v59 }
 0x733   : > { %v8846_v63 = vpop.xlane.xlu0 %8845 }
 0x734   : > { %v8915_v12 = vadd.f32 %v14679_v13, %v8846_v63 }
 0x735   : > { %8905 = vadd.xlane.f32.xlu1 %v8842_v40  ;;  %8903 = vadd.xlane.f32.xlu0 %v8841_v36 }
 0x736   : > { %8948 = vst.msk [vmem:[%s14686_s19 + $0x8] sm:$0xff] %vm8946_vm1, %v8915_v12 }
 0x73a   : > { %v8858_v10 = vpop.xlane.xlu1 %8857  ;;  %v8856_v45 = vpop.xlane.xlu0 %8855 }
 0x73b   : > { %v8921_v2 = vadd.f32 %v14679_v13, %v8858_v10  ;;  %v8920_v18 = vadd.f32 %v14679_v13, %v8856_v45 }
 0x73d   : > { %8954 = vst.msk [vmem:[%s14686_s19 + $0x38] sm:$0xff] %vm8946_vm1, %v8921_v2  ;;  %8953 = vst.msk [vmem:[%s14686_s19 + $0x30] sm:$0xff] %vm8946_vm1, %v8920_v18 }
 0x73e   : > { %v8854_v44 = vpop.xlane.xlu1 %8853  ;;  %v8852_v22 = vpop.xlane.xlu0 %8851 }
 0x73f   : > { %v8919_v21 = vadd.f32 %v14679_v13, %v8854_v44  ;;  %v8918_v24 = vadd.f32 %v14679_v13, %v8852_v22 }
 0x741   : > { %8952 = vst.msk [vmem:[%s14686_s19 + $0x28] sm:$0xff] %vm8946_vm1, %v8919_v21  ;;  %8951 = vst.msk [vmem:[%s14686_s19 + $0x20] sm:$0xff] %vm8946_vm1, %v8918_v24 }
 0x74f   : > { %v8866_v26 = vpop.xlane.xlu1 %8865  ;;  %v8864_v6 = vpop.xlane.xlu0 %8863 }
 0x750   : > { %v8925_v4 = vadd.f32 %v14679_v13, %v8866_v26  ;;  %v8924_v34 = vadd.f32 %v14679_v13, %v8864_v6 }
 0x752   : > { %8958 = vst.msk [vmem:[%s14686_s19 + $0x58] sm:$0xff] %vm8946_vm1, %v8925_v4  ;;  %8957 = vst.msk [vmem:[%s14686_s19 + $0x50] sm:$0xff] %vm8946_vm1, %v8924_v34 }
 0x753   : > { %v8862_v25 = vpop.xlane.xlu1 %8861  ;;  %v8860_v8 = vpop.xlane.xlu0 %8859 }
 0x754   : > { %v8923_v7 = vadd.f32 %v14679_v13, %v8862_v25  ;;  %v8922_v46 = vadd.f32 %v14679_v13, %v8860_v8 }
 0x756   : > { %8956 = vst.msk [vmem:[%s14686_s19 + $0x48] sm:$0xff] %vm8946_vm1, %v8923_v7  ;;  %8955 = vst.msk [vmem:[%s14686_s19 + $0x40] sm:$0xff] %vm8946_vm1, %v8922_v46 }
 0x766   : > { %v8874_v38 = vpop.xlane.xlu1 %8873  ;;  %v8872_v58 = vpop.xlane.xlu0 %8871 }
 0x767   : > { %v8929_v15 = vadd.f32 %v14679_v13, %v8874_v38  ;;  %v8928_v56 = vadd.f32 %v14679_v13, %v8872_v58 }
 0x769   : > { %8962 = vst.msk [vmem:[%s14686_s19 + $0x78] sm:$0xff] %vm8946_vm1, %v8929_v15  ;;  %8961 = vst.msk [vmem:[%s14686_s19 + $0x70] sm:$0xff] %vm8946_vm1, %v8928_v56 }
 0x76a   : > { %v8870_v49 = vpop.xlane.xlu1 %8869  ;;  %v8868_v52 = vpop.xlane.xlu0 %8867 }
 0x76b   : > { %v8927_v27 = vadd.f32 %v14679_v13, %v8870_v49  ;;  %v8926_v32 = vadd.f32 %v14679_v13, %v8868_v52 }
 0x76d   : > { %8960 = vst.msk [vmem:[%s14686_s19 + $0x68] sm:$0xff] %vm8946_vm1, %v8927_v27  ;;  %8959 = vst.msk [vmem:[%s14686_s19 + $0x60] sm:$0xff] %vm8946_vm1, %v8926_v32 }
 0x77b   : > { %v8882_v62 = vpop.xlane.xlu1 %8881  ;;  %v8880_v33 = vpop.xlane.xlu0 %8879 }
 0x77c   : > { %v8933_v57 = vadd.f32 %v14679_v13, %v8882_v62  ;;  %v8932_v5 = vadd.f32 %v14679_v13, %v8880_v33 }
 0x77e   : > { %8966 = vst.msk [vmem:[%s14686_s19 + $0x98] sm:$0xff] %vm8946_vm1, %v8933_v57  ;;  %8965 = vst.msk [vmem:[%s14686_s19 + $0x90] sm:$0xff] %vm8946_vm1, %v8932_v5 }
 0x77f   : > { %v8878_v3 = vpop.xlane.xlu1 %8877  ;;  %v8876_v0 = vpop.xlane.xlu0 %8875 }
 0x780   : > { %v8931_v51 = vadd.f32 %v14679_v13, %v8878_v3  ;;  %v8930_v37 = vadd.f32 %v14679_v13, %v8876_v0 }
 0x782   : > { %8964 = vst.msk [vmem:[%s14686_s19 + $0x88] sm:$0xff] %vm8946_vm1, %v8931_v51  ;;  %8963 = vst.msk [vmem:[%s14686_s19 + $0x80] sm:$0xff] %vm8946_vm1, %v8930_v37 }
 0x792   : > { %v8890_v60 = vpop.xlane.xlu1 %8889  ;;  %v8888_v31 = vpop.xlane.xlu0 %8887 }
 0x793   : > { %v8937_v16 = vadd.f32 %v14679_v13, %v8890_v60  ;;  %v8936_v17 = vadd.f32 %v14679_v13, %v8888_v31 }
 0x795   : > { %8970 = vst.msk [vmem:[%s14686_s19 + $0xb8] sm:$0xff] %vm8946_vm1, %v8937_v16  ;;  %8969 = vst.msk [vmem:[%s14686_s19 + $0xb0] sm:$0xff] %vm8946_vm1, %v8936_v17 }
 0x796   : > { %v8886_v42 = vpop.xlane.xlu1 %8885  ;;  %v8884_v48 = vpop.xlane.xlu0 %8883 }
 0x797   : > { %v8935_v54 = vadd.f32 %v14679_v13, %v8886_v42  ;;  %v8934_v53 = vadd.f32 %v14679_v13, %v8884_v48 }
 0x799   : > { %8968 = vst.msk [vmem:[%s14686_s19 + $0xa8] sm:$0xff] %vm8946_vm1, %v8935_v54  ;;  %8967 = vst.msk [vmem:[%s14686_s19 + $0xa0] sm:$0xff] %vm8946_vm1, %v8934_v53 }
 0x7a7   : > { %v8898_v28 = vpop.xlane.xlu1 %8897  ;;  %v8896_v30 = vpop.xlane.xlu0 %8895 }
 0x7a8   : > { %v8941_v19 = vadd.f32 %v14679_v13, %v8898_v28  ;;  %v8940_v9 = vadd.f32 %v14679_v13, %v8896_v30 }
 0x7aa   : > { %8974 = vst.msk [vmem:[%s14686_s19 + $0xd8] sm:$0xff] %vm8946_vm1, %v8941_v19  ;;  %8973 = vst.msk [vmem:[%s14686_s19 + $0xd0] sm:$0xff] %vm8946_vm1, %v8940_v9 }
 0x7ab   : > { %v8894_v41 = vpop.xlane.xlu1 %8893  ;;  %v8892_v11 = vpop.xlane.xlu0 %8891 }
 0x7ac   : > { %v8939_v47 = vadd.f32 %v14679_v13, %v8894_v41  ;;  %v8938_v39 = vadd.f32 %v14679_v13, %v8892_v11 }
 0x7ae   : > { %8972 = vst.msk [vmem:[%s14686_s19 + $0xc8] sm:$0xff] %vm8946_vm1, %v8939_v47  ;;  %8971 = vst.msk [vmem:[%s14686_s19 + $0xc0] sm:$0xff] %vm8946_vm1, %v8938_v39 }
 0x7ba   : > { %v8902_v35 = vpop.xlane.xlu1 %8901  ;;  %v8900_v55 = vpop.xlane.xlu0 %8899 }
 0x7bb   : > { %v8943_v20 = vadd.f32 %v14679_v13, %v8902_v35  ;;  %v8942_v61 = vadd.f32 %v14679_v13, %v8900_v55 }
 0x7bd   : > { %8976 = vst.msk [vmem:[%s14686_s19 + $0xe8] sm:$0xff] %vm8946_vm1, %v8943_v20  ;;  %8975 = vst.msk [vmem:[%s14686_s19 + $0xe0] sm:$0xff] %vm8946_vm1, %v8942_v61 }
 0x7be   : > { %v8906_v29 = vpop.xlane.xlu1 %8905  ;;  %v8904_v40 = vpop.xlane.xlu0 %8903 }
 0x7bf   : > { %v8945_v36 = vadd.f32 %v14679_v13, %v8906_v29  ;;  %v8944_v43 = vadd.f32 %v14679_v13, %v8904_v40 }
 0x7c1   : > { %8978 = vst.msk [vmem:[%s14686_s19 + $0xf8] sm:$0xff] %vm8946_vm1, %v8945_v36  ;;  %8977 = vst.msk [vmem:[%s14686_s19 + $0xf0] sm:$0xff] %vm8946_vm1, %v8944_v43 }
 0x7c2 PF: > { %s27_s20 = sadd.s32 1, %s10694_s20  }
 0x7c3   : > { %p24_p4 = scmp.ge.s32.totalorder %s27_s20, 4  }
 0x7c5   :  { %26 = sbr.rel (!%p24_p4) target bundleno = 3 (0x3), region = 126 }

</bundles_post_ra>
